<compile_context>
chip_gen: v7x
topology: tpu7x:2x2x1
jax: 0.10.0
libtpu: 0.0.40
codegen_flags: <defaults>
</compile_context>

<pallas_src>
import functools

import numpy as np
import jax
import jax.numpy as jnp
from jax import lax
from jax.experimental import pallas as pl
from jax.experimental.pallas import tpu as pltpu

EPS = 1e-6  # GroupNorm eps (diffusers-style VAE ResBlock)


# --------------------------------------------------------------------------
# Fused Pallas kernel: GroupNorm -> SiLU -> Conv3x3 (+ fused shortcut)
# Operates on one image in (C, H*W) layout: lanes = pixels, sublanes = channels.
# --------------------------------------------------------------------------

def _make_fused_kernel(H, W, Cin, Cout, G, skip_mode):
    """skip_mode: None | 'identity' | 'proj' (fused 1x1 conv on the shortcut)."""
    HW = H * W
    Cg = Cin // G
    inv_cnt = 1.0 / float(HW * Cg)

    def kernel(*refs):
        x_ref, g_ref, b_ref, w_ref, cb_ref = refs[:5]
        idx = 5
        skip_ref = ws_ref = bs_ref = None
        if skip_mode is not None:
            skip_ref = refs[idx]
            idx += 1
        if skip_mode == "proj":
            ws_ref, bs_ref = refs[idx], refs[idx + 1]
            idx += 2
        o_ref = refs[idx]

        x = x_ref[0].astype(jnp.float32)          # (Cin, HW), pixels on lanes

        # ---- GroupNorm (two-pass centered variance), per contiguous channel
        #      group; channels live on sublanes so a group is a static slice.
        parts = []
        for g in range(G):
            sl = x[g * Cg:(g + 1) * Cg, :]                         # (Cg, HW)
            s1 = jnp.sum(jnp.sum(sl, axis=1, keepdims=True),
                         axis=0, keepdims=True)                    # (1, 1)
            mu = s1 * inv_cnt
            d = sl - mu
            s2 = jnp.sum(jnp.sum(d * d, axis=1, keepdims=True),
                         axis=0, keepdims=True)
            inv = lax.rsqrt(s2 * inv_cnt + EPS)
            parts.append(d * inv)
        xn = jnp.concatenate(parts, axis=0)                        # (Cin, HW)
        xn = xn * g_ref[...] + b_ref[...]                          # (Cin,1) bcast
        h = xn * jax.nn.sigmoid(xn)                                # SiLU (f32)
        hb = h.astype(jnp.bfloat16)                                # cast once

        # ---- conv3x3 as ONE matmul with K = 9*Cin.
        # Zero-pad the flattened pixel axis by W+1 on each side; each of the 9
        # taps is then a static lane slice.  Only the dx = +/-1 taps need a
        # column mask (to kill the row-wrap pixels); row overflow falls into
        # the zero pad automatically.
        zpad = jnp.zeros((Cin, W + 1), jnp.bfloat16)
        hp = jnp.concatenate([zpad, hb, zpad], axis=1)             # (Cin, HW+2W+2)
        col = lax.broadcasted_iota(jnp.int32, (1, HW), 1) % W
        left_ok = col >= 1          # valid positions for dx = -1
        right_ok = col <= W - 2     # valid positions for dx = +1
        zero = jnp.zeros((), jnp.bfloat16)

        patches = []
        for dy in (-1, 0, 1):
            for dx in (-1, 0, 1):
                off = (W + 1) + dy * W + dx
                p = hp[:, off:off + HW]                            # (Cin, HW)
                if dx == -1:
                    p = jnp.where(left_ok, p, zero)
                elif dx == 1:
                    p = jnp.where(right_ok, p, zero)
                patches.append(p)
        patch = jnp.concatenate(patches, axis=0)                   # (9*Cin, HW)

        # bf16 x bf16 -> f32 accumulation on the MXU; output is lane-dense.
        acc = jnp.dot(w_ref[...], patch,
                      preferred_element_type=jnp.float32)          # (Cout, HW)
        acc = acc + cb_ref[...]                                    # (Cout, 1)

        # ---- fused shortcut (identity or 1x1 projection) ----
        if skip_mode == "identity":
            acc = acc + skip_ref[0].astype(jnp.float32)
        elif skip_mode == "proj":
            acc = acc + jnp.dot(ws_ref[...],
                                skip_ref[0].astype(jnp.bfloat16),
                                preferred_element_type=jnp.float32)
            acc = acc + bs_ref[...]

        o_ref[0] = acc.astype(o_ref.dtype)                         # dense store

    return kernel


def gn_silu_conv3x3(x, gamma, beta, w_cat, cbias, H, W, *, num_groups,
                    skip=None, skip_w=None, skip_b=None,
                    out_dtype=jnp.bfloat16):
    """Fused GroupNorm -> SiLU -> 3x3 SAME conv (+ optional fused shortcut).

    x:      (N, Cin, H*W)  (NCHW flattened per image; H*W on lanes)
    gamma/beta/cbias: (C, 1)
    w_cat:  (Cout, 9*Cin) bf16, packed as (ky, kx, ci) along K (see _pack_conv3x3)
    skip:   (N, Cskip, H*W); identity add if skip_w is None, else 1x1 projection.
    """
    N, Cin, HW = x.shape
    assert HW == H * W
    Cout, K = w_cat.shape
    assert K == 9 * Cin
    assert Cin % num_groups == 0

    skip_mode = None
    if skip is not None:
        if skip_w is not None:
            skip_mode = "proj"
        else:
            skip_mode = "identity"
            # Guard against silently-wrong identity adds (review concern).
            assert skip.shape[1] == Cout, (skip.shape, Cout)

    kernel = _make_fused_kernel(H, W, Cin, Cout, num_groups, skip_mode)

    in_specs = [
        pl.BlockSpec((1, Cin, HW), lambda n: (n, 0, 0)),
        pl.BlockSpec((Cin, 1), lambda n: (0, 0)),
        pl.BlockSpec((Cin, 1), lambda n: (0, 0)),
        pl.BlockSpec((Cout, 9 * Cin), lambda n: (0, 0)),
        pl.BlockSpec((Cout, 1), lambda n: (0, 0)),
    ]
    args = [x, gamma, beta, w_cat, cbias]
    if skip is not None:
        in_specs.append(pl.BlockSpec((1, skip.shape[1], HW), lambda n: (n, 0, 0)))
        args.append(skip)
        if skip_mode == "proj":
            in_specs.append(pl.BlockSpec((Cout, skip.shape[1]), lambda n: (0, 0)))
            in_specs.append(pl.BlockSpec((Cout, 1), lambda n: (0, 0)))
            args += [skip_w, skip_b]

    return pl.pallas_call(
        kernel,
        out_shape=jax.ShapeDtypeStruct((N, Cout, HW), out_dtype),
        grid=(N,),
        in_specs=in_specs,
        out_specs=pl.BlockSpec((1, Cout, HW), lambda n: (n, 0, 0)),
        compiler_params=pltpu.CompilerParams(
            dimension_semantics=("parallel",),  # batch -> both v7x TensorCores
            # 48 MiB is v7x-safe; raise toward ~96 MiB on v5e/v6e for large
            # tiles once the spatial-tiling TODO lands.
            vmem_limit_bytes=48 * 1024 * 1024),
    )(*args)


# --------------------------------------------------------------------------
# Parameter init (PyTorch-like OIHW f32 for the reference + pre-packed bf16
# MXU layout for the kernels) and DecoderBlock forward.
# --------------------------------------------------------------------------

def _pack_conv3x3(w_oihw):
    # OIHW -> (Cout, ky, kx, Cin) -> (Cout, 9*Cin), bf16 for the MXU.
    o, i, kh, kw = w_oihw.shape
    return jnp.transpose(w_oihw, (0, 2, 3, 1)).reshape(o, kh * kw * i) \
              .astype(jnp.bfloat16)


def init_decoder_block_params(key, in_dim, out_dim, num_resblocks):
    dims = [(in_dim, out_dim)] + [(out_dim, out_dim)] * (num_resblocks - 1)
    params = []
    for (i_d, o_d) in dims:
        key, *ks = jax.random.split(key, 11)
        w1 = 0.1 * jax.random.normal(ks[2], (o_d, i_d, 3, 3), jnp.float32)
        w2 = 0.1 * jax.random.normal(ks[6], (o_d, o_d, 3, 3), jnp.float32)
        p = {
            "g1": 1.0 + 0.1 * jax.random.normal(ks[0], (i_d, 1), jnp.float32),
            "b1": 0.05 * jax.random.normal(ks[1], (i_d, 1), jnp.float32),
            "w1": w1, "w1k": _pack_conv3x3(w1),
            "c1b": 0.02 * jax.random.normal(ks[3], (o_d, 1), jnp.float32),
            "g2": 1.0 + 0.1 * jax.random.normal(ks[4], (o_d, 1), jnp.float32),
            "b2": 0.05 * jax.random.normal(ks[5], (o_d, 1), jnp.float32),
            "w2": w2, "w2k": _pack_conv3x3(w2),
            "c2b": 0.02 * jax.random.normal(ks[7], (o_d, 1), jnp.float32),
        }
        if i_d != o_d:
            ws = 0.1 * jax.random.normal(ks[8], (o_d, i_d), jnp.float32)
            p["ws"] = ws
            p["wsk"] = ws.astype(jnp.bfloat16)
            p["bs"] = 0.02 * jax.random.normal(ks[9], (o_d, 1), jnp.float32)
        params.append(p)
    return params


@functools.partial(jax.jit, static_argnums=(2, 3))
def decoder_block_forward(x_nchw, params, up, num_groups):
    """x_nchw: (N, Cin, H, W) f32.  Returns (N, Cout, [2]H, [2]W) bf16."""
    N, _, H, W = x_nchw.shape
    x = x_nchw.reshape(N, -1, H * W)   # free row-major view; pixels on lanes
    for p in params:
        # first half: GN -> SiLU -> conv3x3   (intermediate kept in bf16)
        h = gn_silu_conv3x3(x, p["g1"], p["b1"], p["w1k"], p["c1b"], H, W,
                            num_groups=num_groups, out_dtype=jnp.bfloat16)
        # second half: GN -> SiLU -> conv3x3 + fused (identity / 1x1) shortcut
        x = gn_silu_conv3x3(h, p["g2"], p["b2"], p["w2k"], p["c2b"], H, W,
                            num_groups=num_groups, skip=x,
                            skip_w=p.get("wsk"), skip_b=p.get("bs"),
                            out_dtype=jnp.bfloat16)
    out = x.reshape(N, -1, H, W)
    if up:
        # 2x nearest upsample as one memory-bound XLA op on the bf16 output
        # (per review: cheaper than the old fused XLU-interleave writeback;
        # no in-block consumer exists to upsample-on-read into).
        out = jnp.repeat(jnp.repeat(out, 2, axis=2), 2, axis=3)
    return out


# --------------------------------------------------------------------------
# Pure-JAX reference (NCHW, f32 end-to-end) for correctness checking.
# --------------------------------------------------------------------------

def _ref_gn_silu(x, gamma, beta, G):
    N, C, H, W = x.shape
    xg = x.reshape(N, G, C // G, H, W)
    mean = xg.mean(axis=(2, 3, 4), keepdims=True)
    var = xg.var(axis=(2, 3, 4), keepdims=True)
    xn = ((xg - mean) / jnp.sqrt(var + EPS)).reshape(N, C, H, W)
    xn = xn * gamma.reshape(1, C, 1, 1) + beta.reshape(1, C, 1, 1)
    return xn * jax.nn.sigmoid(xn)


def _ref_conv3x3(x, w_oihw, b):
    y = lax.conv_general_dilated(x, w_oihw, (1, 1), "SAME",
                                 dimension_numbers=("NCHW", "OIHW", "NCHW"),
                                 precision=lax.Precision.HIGHEST)
    return y + b.reshape(1, -1, 1, 1)


def _ref_conv1x1(x, w, b):
    return jnp.einsum("nchw,oc->nohw", x, w,
                      precision=lax.Precision.HIGHEST) + b.reshape(1, -1, 1, 1)


def _ref_resblock(x, p, G):
    h = _ref_gn_silu(x, p["g1"], p["b1"], G)
    h = _ref_conv3x3(h, p["w1"], p["c1b"])
    h = _ref_gn_silu(h, p["g2"], p["b2"], G)
    h = _ref_conv3x3(h, p["w2"], p["c2b"])
    skip = _ref_conv1x1(x, p["ws"], p["bs"]) if "ws" in p else x
    return h + skip


def _ref_decoder_block(x, params, up, G):
    for p in params:
        x = _ref_resblock(x, p, G)
    if up:
        x = jnp.repeat(jnp.repeat(x, 2, axis=2), 2, axis=3)  # nearest 2x
    return x


# --------------------------------------------------------------------------

if __name__ == "__main__":
    key = jax.random.PRNGKey(0)
    N, H, W = 2, 16, 16
    in_dim, out_dim = 8, 16
    num_resblocks_per_layer = 2
    num_groups = 4
    up = True

    k_x, k_p = jax.random.split(key)
    x = jax.random.normal(k_x, (N, in_dim, H, W), jnp.float32)   # PyTorch NCHW
    params = init_decoder_block_params(k_p, in_dim, out_dim,
                                       num_resblocks_per_layer)

    out = decoder_block_forward(x, params, up, num_groups)
    out = jax.block_until_ready(out)
    assert out.shape == (N, out_dim, 2 * H, 2 * W), out.shape

    ref = _ref_decoder_block(x, params, up, num_groups)
    # bf16 weights/activations (and bf16 final output) vs. f32 reference.
    np.testing.assert_allclose(np.asarray(out.astype(jnp.float32)),
                               np.asarray(ref), rtol=6e-2, atol=6e-2)

    print("KERNEL_OK")
</pallas_src>

<mosaic_0001>
module attributes {stable_mosaic.version = 11 : i64} {
  func.func @kernel(%arg0: i32, %arg1: memref<1x16x256xbf16, #tpu.memory_space<vmem>>, %arg2: memref<16x1xf32, #tpu.memory_space<vmem>>, %arg3: memref<16x1xf32, #tpu.memory_space<vmem>>, %arg4: memref<16x144xbf16, #tpu.memory_space<vmem>>, %arg5: memref<16x1xf32, #tpu.memory_space<vmem>>, %arg6: memref<1x8x256xf32, #tpu.memory_space<vmem>>, %arg7: memref<16x8xbf16, #tpu.memory_space<vmem>>, %arg8: memref<16x1xf32, #tpu.memory_space<vmem>>, %arg9: memref<1x16x256xbf16, #tpu.memory_space<vmem>>) attributes {dimension_semantics = [#tpu.dimension_semantics<parallel>], iteration_bounds = array<i64: 2>, scalar_prefetch = 0 : i64, scratch_operands = 0 : i64, tpu.core_type = #tpu.core_type<tc>, window_params = [{transform_indices = @transform_0, window_bounds = array<i64: 1, 16, 256>}, {pipeline_mode = #tpu.pipeline_mode<synchronous>, transform_indices = @transform_1, window_bounds = array<i64: 16, 1>}, {pipeline_mode = #tpu.pipeline_mode<synchronous>, transform_indices = @transform_2, window_bounds = array<i64: 16, 1>}, {pipeline_mode = #tpu.pipeline_mode<synchronous>, transform_indices = @transform_3, window_bounds = array<i64: 16, 144>}, {pipeline_mode = #tpu.pipeline_mode<synchronous>, transform_indices = @transform_4, window_bounds = array<i64: 16, 1>}, {transform_indices = @transform_5, window_bounds = array<i64: 1, 8, 256>}, {pipeline_mode = #tpu.pipeline_mode<synchronous>, transform_indices = @transform_6, window_bounds = array<i64: 16, 8>}, {pipeline_mode = #tpu.pipeline_mode<synchronous>, transform_indices = @transform_7, window_bounds = array<i64: 16, 1>}, {transform_indices = @transform_8, window_bounds = array<i64: 1, 16, 256>}]} {
    %c0 = arith.constant 0 : index
    %c0_0 = arith.constant 0 : index
    %c0_1 = arith.constant 0 : index
    %0 = vector.load %arg1[%c0, %c0_0, %c0_1] : memref<1x16x256xbf16, #tpu.memory_space<vmem>>, vector<1x16x256xbf16>
    %1 = vector.shape_cast %0 : vector<1x16x256xbf16> to vector<16x256xbf16>
    %2 = arith.extf %1 : vector<16x256xbf16> to vector<16x256xf32>
    %3 = vector.extract_strided_slice %2 {offsets = [0, 0], sizes = [4, 256], strides = [1, 1]} : vector<16x256xf32> to vector<4x256xf32>
    %cst = arith.constant dense<0.000000e+00> : vector<4xf32>
    %4 = vector.multi_reduction <add>, %3, %cst [1] : vector<4x256xf32> to vector<4xf32>
    %5 = vector.shape_cast %4 : vector<4xf32> to vector<4x1xf32>
    %cst_2 = arith.constant dense<0.000000e+00> : vector<1xf32>
    %6 = vector.multi_reduction <add>, %5, %cst_2 [0] : vector<4x1xf32> to vector<1xf32>
    %7 = vector.shape_cast %6 : vector<1xf32> to vector<1x1xf32>
    %cst_3 = arith.constant 9.765625E-4 : f32
    %8 = vector.broadcast %cst_3 : f32 to vector<1x1xf32>
    %9 = arith.mulf %7, %8 : vector<1x1xf32>
    %10 = vector.broadcast %9 : vector<1x1xf32> to vector<4x256xf32>
    %11 = arith.subf %3, %10 : vector<4x256xf32>
    %12 = arith.mulf %11, %11 : vector<4x256xf32>
    %cst_4 = arith.constant dense<0.000000e+00> : vector<4xf32>
    %13 = vector.multi_reduction <add>, %12, %cst_4 [1] : vector<4x256xf32> to vector<4xf32>
    %14 = vector.shape_cast %13 : vector<4xf32> to vector<4x1xf32>
    %cst_5 = arith.constant dense<0.000000e+00> : vector<1xf32>
    %15 = vector.multi_reduction <add>, %14, %cst_5 [0] : vector<4x1xf32> to vector<1xf32>
    %16 = vector.shape_cast %15 : vector<1xf32> to vector<1x1xf32>
    %cst_6 = arith.constant 9.765625E-4 : f32
    %17 = vector.broadcast %cst_6 : f32 to vector<1x1xf32>
    %18 = arith.mulf %16, %17 : vector<1x1xf32>
    %cst_7 = arith.constant 9.99999997E-7 : f32
    %19 = vector.broadcast %cst_7 : f32 to vector<1x1xf32>
    %20 = arith.addf %18, %19 : vector<1x1xf32>
    %21 = math.rsqrt %20 : vector<1x1xf32>
    %22 = vector.broadcast %21 : vector<1x1xf32> to vector<4x256xf32>
    %23 = arith.mulf %11, %22 : vector<4x256xf32>
    %24 = vector.extract_strided_slice %2 {offsets = [4, 0], sizes = [4, 256], strides = [1, 1]} : vector<16x256xf32> to vector<4x256xf32>
    %cst_8 = arith.constant dense<0.000000e+00> : vector<4xf32>
    %25 = vector.multi_reduction <add>, %24, %cst_8 [1] : vector<4x256xf32> to vector<4xf32>
    %26 = vector.shape_cast %25 : vector<4xf32> to vector<4x1xf32>
    %cst_9 = arith.constant dense<0.000000e+00> : vector<1xf32>
    %27 = vector.multi_reduction <add>, %26, %cst_9 [0] : vector<4x1xf32> to vector<1xf32>
    %28 = vector.shape_cast %27 : vector<1xf32> to vector<1x1xf32>
    %cst_10 = arith.constant 9.765625E-4 : f32
    %29 = vector.broadcast %cst_10 : f32 to vector<1x1xf32>
    %30 = arith.mulf %28, %29 : vector<1x1xf32>
    %31 = vector.broadcast %30 : vector<1x1xf32> to vector<4x256xf32>
    %32 = arith.subf %24, %31 : vector<4x256xf32>
    %33 = arith.mulf %32, %32 : vector<4x256xf32>
    %cst_11 = arith.constant dense<0.000000e+00> : vector<4xf32>
    %34 = vector.multi_reduction <add>, %33, %cst_11 [1] : vector<4x256xf32> to vector<4xf32>
    %35 = vector.shape_cast %34 : vector<4xf32> to vector<4x1xf32>
    %cst_12 = arith.constant dense<0.000000e+00> : vector<1xf32>
    %36 = vector.multi_reduction <add>, %35, %cst_12 [0] : vector<4x1xf32> to vector<1xf32>
    %37 = vector.shape_cast %36 : vector<1xf32> to vector<1x1xf32>
    %cst_13 = arith.constant 9.765625E-4 : f32
    %38 = vector.broadcast %cst_13 : f32 to vector<1x1xf32>
    %39 = arith.mulf %37, %38 : vector<1x1xf32>
    %cst_14 = arith.constant 9.99999997E-7 : f32
    %40 = vector.broadcast %cst_14 : f32 to vector<1x1xf32>
    %41 = arith.addf %39, %40 : vector<1x1xf32>
    %42 = math.rsqrt %41 : vector<1x1xf32>
    %43 = vector.broadcast %42 : vector<1x1xf32> to vector<4x256xf32>
    %44 = arith.mulf %32, %43 : vector<4x256xf32>
    %45 = vector.extract_strided_slice %2 {offsets = [8, 0], sizes = [4, 256], strides = [1, 1]} : vector<16x256xf32> to vector<4x256xf32>
    %cst_15 = arith.constant dense<0.000000e+00> : vector<4xf32>
    %46 = vector.multi_reduction <add>, %45, %cst_15 [1] : vector<4x256xf32> to vector<4xf32>
    %47 = vector.shape_cast %46 : vector<4xf32> to vector<4x1xf32>
    %cst_16 = arith.constant dense<0.000000e+00> : vector<1xf32>
    %48 = vector.multi_reduction <add>, %47, %cst_16 [0] : vector<4x1xf32> to vector<1xf32>
    %49 = vector.shape_cast %48 : vector<1xf32> to vector<1x1xf32>
    %cst_17 = arith.constant 9.765625E-4 : f32
    %50 = vector.broadcast %cst_17 : f32 to vector<1x1xf32>
    %51 = arith.mulf %49, %50 : vector<1x1xf32>
    %52 = vector.broadcast %51 : vector<1x1xf32> to vector<4x256xf32>
    %53 = arith.subf %45, %52 : vector<4x256xf32>
    %54 = arith.mulf %53, %53 : vector<4x256xf32>
    %cst_18 = arith.constant dense<0.000000e+00> : vector<4xf32>
    %55 = vector.multi_reduction <add>, %54, %cst_18 [1] : vector<4x256xf32> to vector<4xf32>
    %56 = vector.shape_cast %55 : vector<4xf32> to vector<4x1xf32>
    %cst_19 = arith.constant dense<0.000000e+00> : vector<1xf32>
    %57 = vector.multi_reduction <add>, %56, %cst_19 [0] : vector<4x1xf32> to vector<1xf32>
    %58 = vector.shape_cast %57 : vector<1xf32> to vector<1x1xf32>
    %cst_20 = arith.constant 9.765625E-4 : f32
    %59 = vector.broadcast %cst_20 : f32 to vector<1x1xf32>
    %60 = arith.mulf %58, %59 : vector<1x1xf32>
    %cst_21 = arith.constant 9.99999997E-7 : f32
    %61 = vector.broadcast %cst_21 : f32 to vector<1x1xf32>
    %62 = arith.addf %60, %61 : vector<1x1xf32>
    %63 = math.rsqrt %62 : vector<1x1xf32>
    %64 = vector.broadcast %63 : vector<1x1xf32> to vector<4x256xf32>
    %65 = arith.mulf %53, %64 : vector<4x256xf32>
    %66 = vector.extract_strided_slice %2 {offsets = [12, 0], sizes = [4, 256], strides = [1, 1]} : vector<16x256xf32> to vector<4x256xf32>
    %cst_22 = arith.constant dense<0.000000e+00> : vector<4xf32>
    %67 = vector.multi_reduction <add>, %66, %cst_22 [1] : vector<4x256xf32> to vector<4xf32>
    %68 = vector.shape_cast %67 : vector<4xf32> to vector<4x1xf32>
    %cst_23 = arith.constant dense<0.000000e+00> : vector<1xf32>
    %69 = vector.multi_reduction <add>, %68, %cst_23 [0] : vector<4x1xf32> to vector<1xf32>
    %70 = vector.shape_cast %69 : vector<1xf32> to vector<1x1xf32>
    %cst_24 = arith.constant 9.765625E-4 : f32
    %71 = vector.broadcast %cst_24 : f32 to vector<1x1xf32>
    %72 = arith.mulf %70, %71 : vector<1x1xf32>
    %73 = vector.broadcast %72 : vector<1x1xf32> to vector<4x256xf32>
    %74 = arith.subf %66, %73 : vector<4x256xf32>
    %75 = arith.mulf %74, %74 : vector<4x256xf32>
    %cst_25 = arith.constant dense<0.000000e+00> : vector<4xf32>
    %76 = vector.multi_reduction <add>, %75, %cst_25 [1] : vector<4x256xf32> to vector<4xf32>
    %77 = vector.shape_cast %76 : vector<4xf32> to vector<4x1xf32>
    %cst_26 = arith.constant dense<0.000000e+00> : vector<1xf32>
    %78 = vector.multi_reduction <add>, %77, %cst_26 [0] : vector<4x1xf32> to vector<1xf32>
    %79 = vector.shape_cast %78 : vector<1xf32> to vector<1x1xf32>
    %cst_27 = arith.constant 9.765625E-4 : f32
    %80 = vector.broadcast %cst_27 : f32 to vector<1x1xf32>
    %81 = arith.mulf %79, %80 : vector<1x1xf32>
    %cst_28 = arith.constant 9.99999997E-7 : f32
    %82 = vector.broadcast %cst_28 : f32 to vector<1x1xf32>
    %83 = arith.addf %81, %82 : vector<1x1xf32>
    %84 = math.rsqrt %83 : vector<1x1xf32>
    %85 = vector.broadcast %84 : vector<1x1xf32> to vector<4x256xf32>
    %86 = arith.mulf %74, %85 : vector<4x256xf32>
    %87 = tpu.concatenate %23, %44, %65, %86 in 0 : vector<4x256xf32>, vector<4x256xf32>, vector<4x256xf32>, vector<4x256xf32> -> vector<16x256xf32>
    %c0_29 = arith.constant 0 : index
    %c0_30 = arith.constant 0 : index
    %88 = vector.load %arg2[%c0_29, %c0_30] : memref<16x1xf32, #tpu.memory_space<vmem>>, vector<16x1xf32>
    %89 = vector.broadcast %88 : vector<16x1xf32> to vector<16x256xf32>
    %90 = arith.mulf %87, %89 : vector<16x256xf32>
    %c0_31 = arith.constant 0 : index
    %c0_32 = arith.constant 0 : index
    %91 = vector.load %arg3[%c0_31, %c0_32] : memref<16x1xf32, #tpu.memory_space<vmem>>, vector<16x1xf32>
    %92 = vector.broadcast %91 : vector<16x1xf32> to vector<16x256xf32>
    %93 = arith.addf %90, %92 : vector<16x256xf32>
    %94 = arith.negf %93 : vector<16x256xf32>
    %95 = math.exp %94 : vector<16x256xf32>
    %cst_33 = arith.constant 1.000000e+00 : f32
    %96 = vector.broadcast %cst_33 : f32 to vector<16x256xf32>
    %97 = arith.addf %96, %95 : vector<16x256xf32>
    %98 = arith.divf %96, %97 : vector<16x256xf32>
    %99 = arith.mulf %93, %98 : vector<16x256xf32>
    %100 = arith.truncf %99 : vector<16x256xf32> to vector<16x256xbf16>
    %cst_34 = arith.constant 0.000000e+00 : bf16
    %101 = vector.broadcast %cst_34 : bf16 to vector<16x17xbf16>
    %102 = tpu.concatenate %101, %100, %101 in 1 : vector<16x17xbf16>, vector<16x256xbf16>, vector<16x17xbf16> -> vector<16x290xbf16>
    %103 = tpu.iota {dimensions = array<i32: 1>} : vector<1x256xi32>
    %c16_i32 = arith.constant 16 : i32
    %c0_i32 = arith.constant 0 : i32
    %104 = arith.cmpi eq, %c16_i32, %c0_i32 : i32
    %c1_i32 = arith.constant 1 : i32
    %105 = arith.select %104, %c1_i32, %c16_i32 : i32
    %106 = vector.broadcast %105 : i32 to vector<1x256xi32>
    %107 = arith.remsi %103, %106 : vector<1x256xi32>
    %c0_i32_35 = arith.constant 0 : i32
    %108 = vector.broadcast %c0_i32_35 : i32 to vector<1x256xi32>
    %109 = arith.cmpi ne, %107, %108 : vector<1x256xi32>
    %c0_i32_36 = arith.constant 0 : i32
    %110 = vector.broadcast %c0_i32_36 : i32 to vector<1x256xi32>
    %111 = arith.cmpi slt, %107, %110 : vector<1x256xi32>
    %c0_i32_37 = arith.constant 0 : i32
    %112 = arith.cmpi slt, %105, %c0_i32_37 : i32
    %113 = vector.broadcast %112 : i1 to vector<1x256xi1>
    %114 = vector.broadcast %113 : vector<1x256xi1> to vector<1x256xi1>
    %115 = arith.xori %111, %114 : vector<1x256xi1>
    %116 = arith.andi %115, %109 : vector<1x256xi1>
    %117 = vector.broadcast %105 : i32 to vector<1x256xi32>
    %118 = arith.addi %107, %117 : vector<1x256xi32>
    %119 = arith.select %116, %118, %107 : vector<1x256xi1>, vector<1x256xi32>
    %c1_i32_38 = arith.constant 1 : i32
    %120 = vector.broadcast %c1_i32_38 : i32 to vector<1x256xi32>
    %121 = arith.cmpi sge, %119, %120 : vector<1x256xi32>
    %c14_i32 = arith.constant 14 : i32
    %122 = vector.broadcast %c14_i32 : i32 to vector<1x256xi32>
    %123 = arith.cmpi sle, %119, %122 : vector<1x256xi32>
    %124 = vector.extract_strided_slice %102 {offsets = [0, 0], sizes = [16, 256], strides = [1, 1]} : vector<16x290xbf16> to vector<16x256xbf16>
    %cst_39 = arith.constant 0.000000e+00 : bf16
    %125 = vector.shape_cast %121 : vector<1x256xi1> to vector<1x256xi1>
    %126 = vector.broadcast %125 : vector<1x256xi1> to vector<16x256xi1>
    %127 = vector.broadcast %cst_39 : bf16 to vector<16x256xbf16>
    %128 = arith.select %126, %124, %127 : vector<16x256xi1>, vector<16x256xbf16>
    %129 = vector.extract_strided_slice %102 {offsets = [0, 1], sizes = [16, 256], strides = [1, 1]} : vector<16x290xbf16> to vector<16x256xbf16>
    %130 = vector.extract_strided_slice %102 {offsets = [0, 2], sizes = [16, 256], strides = [1, 1]} : vector<16x290xbf16> to vector<16x256xbf16>
    %cst_40 = arith.constant 0.000000e+00 : bf16
    %131 = vector.shape_cast %123 : vector<1x256xi1> to vector<1x256xi1>
    %132 = vector.broadcast %131 : vector<1x256xi1> to vector<16x256xi1>
    %133 = vector.broadcast %cst_40 : bf16 to vector<16x256xbf16>
    %134 = arith.select %132, %130, %133 : vector<16x256xi1>, vector<16x256xbf16>
    %135 = vector.extract_strided_slice %102 {offsets = [0, 16], sizes = [16, 256], strides = [1, 1]} : vector<16x290xbf16> to vector<16x256xbf16>
    %cst_41 = arith.constant 0.000000e+00 : bf16
    %136 = vector.shape_cast %121 : vector<1x256xi1> to vector<1x256xi1>
    %137 = vector.broadcast %136 : vector<1x256xi1> to vector<16x256xi1>
    %138 = vector.broadcast %cst_41 : bf16 to vector<16x256xbf16>
    %139 = arith.select %137, %135, %138 : vector<16x256xi1>, vector<16x256xbf16>
    %140 = vector.extract_strided_slice %102 {offsets = [0, 17], sizes = [16, 256], strides = [1, 1]} : vector<16x290xbf16> to vector<16x256xbf16>
    %141 = vector.extract_strided_slice %102 {offsets = [0, 18], sizes = [16, 256], strides = [1, 1]} : vector<16x290xbf16> to vector<16x256xbf16>
    %cst_42 = arith.constant 0.000000e+00 : bf16
    %142 = vector.shape_cast %123 : vector<1x256xi1> to vector<1x256xi1>
    %143 = vector.broadcast %142 : vector<1x256xi1> to vector<16x256xi1>
    %144 = vector.broadcast %cst_42 : bf16 to vector<16x256xbf16>
    %145 = arith.select %143, %141, %144 : vector<16x256xi1>, vector<16x256xbf16>
    %146 = vector.extract_strided_slice %102 {offsets = [0, 32], sizes = [16, 256], strides = [1, 1]} : vector<16x290xbf16> to vector<16x256xbf16>
    %cst_43 = arith.constant 0.000000e+00 : bf16
    %147 = vector.shape_cast %121 : vector<1x256xi1> to vector<1x256xi1>
    %148 = vector.broadcast %147 : vector<1x256xi1> to vector<16x256xi1>
    %149 = vector.broadcast %cst_43 : bf16 to vector<16x256xbf16>
    %150 = arith.select %148, %146, %149 : vector<16x256xi1>, vector<16x256xbf16>
    %151 = vector.extract_strided_slice %102 {offsets = [0, 33], sizes = [16, 256], strides = [1, 1]} : vector<16x290xbf16> to vector<16x256xbf16>
    %152 = vector.extract_strided_slice %102 {offsets = [0, 34], sizes = [16, 256], strides = [1, 1]} : vector<16x290xbf16> to vector<16x256xbf16>
    %cst_44 = arith.constant 0.000000e+00 : bf16
    %153 = vector.shape_cast %123 : vector<1x256xi1> to vector<1x256xi1>
    %154 = vector.broadcast %153 : vector<1x256xi1> to vector<16x256xi1>
    %155 = vector.broadcast %cst_44 : bf16 to vector<16x256xbf16>
    %156 = arith.select %154, %152, %155 : vector<16x256xi1>, vector<16x256xbf16>
    %157 = tpu.concatenate %128, %129, %134, %139, %140, %145, %150, %151, %156 in 0 : vector<16x256xbf16>, vector<16x256xbf16>, vector<16x256xbf16>, vector<16x256xbf16>, vector<16x256xbf16>, vector<16x256xbf16>, vector<16x256xbf16>, vector<16x256xbf16>, vector<16x256xbf16> -> vector<144x256xbf16>
    %c0_45 = arith.constant 0 : index
    %c0_46 = arith.constant 0 : index
    %158 = vector.load %arg4[%c0_45, %c0_46] : memref<16x144xbf16, #tpu.memory_space<vmem>>, vector<16x144xbf16>
    %cst_47 = arith.constant dense<0.000000e+00> : vector<16x256xf32>
    %159 = tpu.matmul %158, %157, %cst_47 {dimension_numbers = #tpu.dot_dimension_numbers<[1], [0], [0], [1], [0, 0, 1, 1], [], []>} : vector<16x144xbf16>, vector<144x256xbf16>, vector<16x256xf32> -> vector<16x256xf32>
    %c0_48 = arith.constant 0 : index
    %c0_49 = arith.constant 0 : index
    %160 = vector.load %arg5[%c0_48, %c0_49] : memref<16x1xf32, #tpu.memory_space<vmem>>, vector<16x1xf32>
    %161 = vector.broadcast %160 : vector<16x1xf32> to vector<16x256xf32>
    %162 = arith.addf %159, %161 : vector<16x256xf32>
    %c0_50 = arith.constant 0 : index
    %c0_51 = arith.constant 0 : index
    %163 = vector.load %arg7[%c0_50, %c0_51] : memref<16x8xbf16, #tpu.memory_space<vmem>>, vector<16x8xbf16>
    %c0_52 = arith.constant 0 : index
    %c0_53 = arith.constant 0 : index
    %c0_54 = arith.constant 0 : index
    %164 = vector.load %arg6[%c0_52, %c0_53, %c0_54] : memref<1x8x256xf32, #tpu.memory_space<vmem>>, vector<1x8x256xf32>
    %165 = vector.shape_cast %164 : vector<1x8x256xf32> to vector<8x256xf32>
    %166 = arith.truncf %165 : vector<8x256xf32> to vector<8x256xbf16>
    %cst_55 = arith.constant dense<0.000000e+00> : vector<16x256xf32>
    %167 = tpu.matmul %163, %166, %cst_55 {dimension_numbers = #tpu.dot_dimension_numbers<[1], [0], [0], [1], [0, 0, 1, 1], [], []>} : vector<16x8xbf16>, vector<8x256xbf16>, vector<16x256xf32> -> vector<16x256xf32>
    %168 = arith.addf %162, %167 : vector<16x256xf32>
    %c0_56 = arith.constant 0 : index
    %c0_57 = arith.constant 0 : index
    %169 = vector.load %arg8[%c0_56, %c0_57] : memref<16x1xf32, #tpu.memory_space<vmem>>, vector<16x1xf32>
    %170 = vector.broadcast %169 : vector<16x1xf32> to vector<16x256xf32>
    %171 = arith.addf %168, %170 : vector<16x256xf32>
    %172 = arith.truncf %171 : vector<16x256xf32> to vector<16x256xbf16>
    %c0_58 = arith.constant 0 : index
    %c0_59 = arith.constant 0 : index
    %c0_60 = arith.constant 0 : index
    %173 = vector.load %arg9[%c0_58, %c0_59, %c0_60] : memref<1x16x256xbf16, #tpu.memory_space<vmem>>, vector<1x16x256xbf16>
    %174 = vector.shape_cast %173 : vector<1x16x256xbf16> to vector<16x256xbf16>
    %175 = vector.shape_cast %172 : vector<16x256xbf16> to vector<1x16x256xbf16>
    tpu.vector_store %arg9[%c0_58, %c0_59, %c0_60], %175 {strides = array<i32>} : memref<1x16x256xbf16, #tpu.memory_space<vmem>>, vector<1x16x256xbf16>,
    return
  }
  func.func @transform_0(%arg0: i32) -> (i32, i32, i32) {
    %c0_i32 = arith.constant 0 : i32
    %c0_i32_0 = arith.constant 0 : i32
    %c0_i32_1 = arith.constant 0 : i32
    return %arg0, %c0_i32, %c0_i32_0 : i32, i32, i32
  }
  func.func @transform_1(%arg0: i32) -> (i32, i32) {
    %c0_i32 = arith.constant 0 : i32
    %c0_i32_0 = arith.constant 0 : i32
    %c0_i32_1 = arith.constant 0 : i32
    return %c0_i32, %c0_i32_0 : i32, i32
  }
  func.func @transform_2(%arg0: i32) -> (i32, i32) {
    %c0_i32 = arith.constant 0 : i32
    %c0_i32_0 = arith.constant 0 : i32
    %c0_i32_1 = arith.constant 0 : i32
    return %c0_i32, %c0_i32_0 : i32, i32
  }
  func.func @transform_3(%arg0: i32) -> (i32, i32) {
    %c0_i32 = arith.constant 0 : i32
    %c0_i32_0 = arith.constant 0 : i32
    %c0_i32_1 = arith.constant 0 : i32
    return %c0_i32, %c0_i32_0 : i32, i32
  }
  func.func @transform_4(%arg0: i32) -> (i32, i32) {
    %c0_i32 = arith.constant 0 : i32
    %c0_i32_0 = arith.constant 0 : i32
    %c0_i32_1 = arith.constant 0 : i32
    return %c0_i32, %c0_i32_0 : i32, i32
  }
  func.func @transform_5(%arg0: i32) -> (i32, i32, i32) {
    %c0_i32 = arith.constant 0 : i32
    %c0_i32_0 = arith.constant 0 : i32
    %c0_i32_1 = arith.constant 0 : i32
    return %arg0, %c0_i32, %c0_i32_0 : i32, i32, i32
  }
  func.func @transform_6(%arg0: i32) -> (i32, i32) {
    %c0_i32 = arith.constant 0 : i32
    %c0_i32_0 = arith.constant 0 : i32
    %c0_i32_1 = arith.constant 0 : i32
    return %c0_i32, %c0_i32_0 : i32, i32
  }
  func.func @transform_7(%arg0: i32) -> (i32, i32) {
    %c0_i32 = arith.constant 0 : i32
    %c0_i32_0 = arith.constant 0 : i32
    %c0_i32_1 = arith.constant 0 : i32
    return %c0_i32, %c0_i32_0 : i32, i32
  }
  func.func @transform_8(%arg0: i32) -> (i32, i32, i32) {
    %c0_i32 = arith.constant 0 : i32
    %c0_i32_0 = arith.constant 0 : i32
    %c0_i32_1 = arith.constant 0 : i32
    return %arg0, %c0_i32, %c0_i32_0 : i32, i32, i32
  }
}

module attributes {stable_mosaic.version = 11 : i64} {
  func.func @kernel(%arg0: i32, %arg1: memref<1x16x256xbf16, #tpu.memory_space<vmem>>, %arg2: memref<16x1xf32, #tpu.memory_space<vmem>>, %arg3: memref<16x1xf32, #tpu.memory_space<vmem>>, %arg4: memref<16x144xbf16, #tpu.memory_space<vmem>>, %arg5: memref<16x1xf32, #tpu.memory_space<vmem>>, %arg6: memref<1x16x256xbf16, #tpu.memory_space<vmem>>) attributes {dimension_semantics = [#tpu.dimension_semantics<parallel>], iteration_bounds = array<i64: 2>, scalar_prefetch = 0 : i64, scratch_operands = 0 : i64, tpu.core_type = #tpu.core_type<tc>, window_params = [{transform_indices = @transform_0, window_bounds = array<i64: 1, 16, 256>}, {pipeline_mode = #tpu.pipeline_mode<synchronous>, transform_indices = @transform_1, window_bounds = array<i64: 16, 1>}, {pipeline_mode = #tpu.pipeline_mode<synchronous>, transform_indices = @transform_2, window_bounds = array<i64: 16, 1>}, {pipeline_mode = #tpu.pipeline_mode<synchronous>, transform_indices = @transform_3, window_bounds = array<i64: 16, 144>}, {pipeline_mode = #tpu.pipeline_mode<synchronous>, transform_indices = @transform_4, window_bounds = array<i64: 16, 1>}, {transform_indices = @transform_5, window_bounds = array<i64: 1, 16, 256>}]} {
    %c0 = arith.constant 0 : index
    %c0_0 = arith.constant 0 : index
    %c0_1 = arith.constant 0 : index
    %0 = vector.load %arg1[%c0, %c0_0, %c0_1] : memref<1x16x256xbf16, #tpu.memory_space<vmem>>, vector<1x16x256xbf16>
    %1 = vector.shape_cast %0 : vector<1x16x256xbf16> to vector<16x256xbf16>
    %2 = arith.extf %1 : vector<16x256xbf16> to vector<16x256xf32>
    %3 = vector.extract_strided_slice %2 {offsets = [0, 0], sizes = [4, 256], strides = [1, 1]} : vector<16x256xf32> to vector<4x256xf32>
    %cst = arith.constant dense<0.000000e+00> : vector<4xf32>
    %4 = vector.multi_reduction <add>, %3, %cst [1] : vector<4x256xf32> to vector<4xf32>
    %5 = vector.shape_cast %4 : vector<4xf32> to vector<4x1xf32>
    %cst_2 = arith.constant dense<0.000000e+00> : vector<1xf32>
    %6 = vector.multi_reduction <add>, %5, %cst_2 [0] : vector<4x1xf32> to vector<1xf32>
    %7 = vector.shape_cast %6 : vector<1xf32> to vector<1x1xf32>
    %cst_3 = arith.constant 9.765625E-4 : f32
    %8 = vector.broadcast %cst_3 : f32 to vector<1x1xf32>
    %9 = arith.mulf %7, %8 : vector<1x1xf32>
    %10 = vector.broadcast %9 : vector<1x1xf32> to vector<4x256xf32>
    %11 = arith.subf %3, %10 : vector<4x256xf32>
    %12 = arith.mulf %11, %11 : vector<4x256xf32>
    %cst_4 = arith.constant dense<0.000000e+00> : vector<4xf32>
    %13 = vector.multi_reduction <add>, %12, %cst_4 [1] : vector<4x256xf32> to vector<4xf32>
    %14 = vector.shape_cast %13 : vector<4xf32> to vector<4x1xf32>
    %cst_5 = arith.constant dense<0.000000e+00> : vector<1xf32>
    %15 = vector.multi_reduction <add>, %14, %cst_5 [0] : vector<4x1xf32> to vector<1xf32>
    %16 = vector.shape_cast %15 : vector<1xf32> to vector<1x1xf32>
    %cst_6 = arith.constant 9.765625E-4 : f32
    %17 = vector.broadcast %cst_6 : f32 to vector<1x1xf32>
    %18 = arith.mulf %16, %17 : vector<1x1xf32>
    %cst_7 = arith.constant 9.99999997E-7 : f32
    %19 = vector.broadcast %cst_7 : f32 to vector<1x1xf32>
    %20 = arith.addf %18, %19 : vector<1x1xf32>
    %21 = math.rsqrt %20 : vector<1x1xf32>
    %22 = vector.broadcast %21 : vector<1x1xf32> to vector<4x256xf32>
    %23 = arith.mulf %11, %22 : vector<4x256xf32>
    %24 = vector.extract_strided_slice %2 {offsets = [4, 0], sizes = [4, 256], strides = [1, 1]} : vector<16x256xf32> to vector<4x256xf32>
    %cst_8 = arith.constant dense<0.000000e+00> : vector<4xf32>
    %25 = vector.multi_reduction <add>, %24, %cst_8 [1] : vector<4x256xf32> to vector<4xf32>
    %26 = vector.shape_cast %25 : vector<4xf32> to vector<4x1xf32>
    %cst_9 = arith.constant dense<0.000000e+00> : vector<1xf32>
    %27 = vector.multi_reduction <add>, %26, %cst_9 [0] : vector<4x1xf32> to vector<1xf32>
    %28 = vector.shape_cast %27 : vector<1xf32> to vector<1x1xf32>
    %cst_10 = arith.constant 9.765625E-4 : f32
    %29 = vector.broadcast %cst_10 : f32 to vector<1x1xf32>
    %30 = arith.mulf %28, %29 : vector<1x1xf32>
    %31 = vector.broadcast %30 : vector<1x1xf32> to vector<4x256xf32>
    %32 = arith.subf %24, %31 : vector<4x256xf32>
    %33 = arith.mulf %32, %32 : vector<4x256xf32>
    %cst_11 = arith.constant dense<0.000000e+00> : vector<4xf32>
    %34 = vector.multi_reduction <add>, %33, %cst_11 [1] : vector<4x256xf32> to vector<4xf32>
    %35 = vector.shape_cast %34 : vector<4xf32> to vector<4x1xf32>
    %cst_12 = arith.constant dense<0.000000e+00> : vector<1xf32>
    %36 = vector.multi_reduction <add>, %35, %cst_12 [0] : vector<4x1xf32> to vector<1xf32>
    %37 = vector.shape_cast %36 : vector<1xf32> to vector<1x1xf32>
    %cst_13 = arith.constant 9.765625E-4 : f32
    %38 = vector.broadcast %cst_13 : f32 to vector<1x1xf32>
    %39 = arith.mulf %37, %38 : vector<1x1xf32>
    %cst_14 = arith.constant 9.99999997E-7 : f32
    %40 = vector.broadcast %cst_14 : f32 to vector<1x1xf32>
    %41 = arith.addf %39, %40 : vector<1x1xf32>
    %42 = math.rsqrt %41 : vector<1x1xf32>
    %43 = vector.broadcast %42 : vector<1x1xf32> to vector<4x256xf32>
    %44 = arith.mulf %32, %43 : vector<4x256xf32>
    %45 = vector.extract_strided_slice %2 {offsets = [8, 0], sizes = [4, 256], strides = [1, 1]} : vector<16x256xf32> to vector<4x256xf32>
    %cst_15 = arith.constant dense<0.000000e+00> : vector<4xf32>
    %46 = vector.multi_reduction <add>, %45, %cst_15 [1] : vector<4x256xf32> to vector<4xf32>
    %47 = vector.shape_cast %46 : vector<4xf32> to vector<4x1xf32>
    %cst_16 = arith.constant dense<0.000000e+00> : vector<1xf32>
    %48 = vector.multi_reduction <add>, %47, %cst_16 [0] : vector<4x1xf32> to vector<1xf32>
    %49 = vector.shape_cast %48 : vector<1xf32> to vector<1x1xf32>
    %cst_17 = arith.constant 9.765625E-4 : f32
    %50 = vector.broadcast %cst_17 : f32 to vector<1x1xf32>
    %51 = arith.mulf %49, %50 : vector<1x1xf32>
    %52 = vector.broadcast %51 : vector<1x1xf32> to vector<4x256xf32>
    %53 = arith.subf %45, %52 : vector<4x256xf32>
    %54 = arith.mulf %53, %53 : vector<4x256xf32>
    %cst_18 = arith.constant dense<0.000000e+00> : vector<4xf32>
    %55 = vector.multi_reduction <add>, %54, %cst_18 [1] : vector<4x256xf32> to vector<4xf32>
    %56 = vector.shape_cast %55 : vector<4xf32> to vector<4x1xf32>
    %cst_19 = arith.constant dense<0.000000e+00> : vector<1xf32>
    %57 = vector.multi_reduction <add>, %56, %cst_19 [0] : vector<4x1xf32> to vector<1xf32>
    %58 = vector.shape_cast %57 : vector<1xf32> to vector<1x1xf32>
    %cst_20 = arith.constant 9.765625E-4 : f32
    %59 = vector.broadcast %cst_20 : f32 to vector<1x1xf32>
    %60 = arith.mulf %58, %59 : vector<1x1xf32>
    %cst_21 = arith.constant 9.99999997E-7 : f32
    %61 = vector.broadcast %cst_21 : f32 to vector<1x1xf32>
    %62 = arith.addf %60, %61 : vector<1x1xf32>
    %63 = math.rsqrt %62 : vector<1x1xf32>
    %64 = vector.broadcast %63 : vector<1x1xf32> to vector<4x256xf32>
    %65 = arith.mulf %53, %64 : vector<4x256xf32>
    %66 = vector.extract_strided_slice %2 {offsets = [12, 0], sizes = [4, 256], strides = [1, 1]} : vector<16x256xf32> to vector<4x256xf32>
    %cst_22 = arith.constant dense<0.000000e+00> : vector<4xf32>
    %67 = vector.multi_reduction <add>, %66, %cst_22 [1] : vector<4x256xf32> to vector<4xf32>
    %68 = vector.shape_cast %67 : vector<4xf32> to vector<4x1xf32>
    %cst_23 = arith.constant dense<0.000000e+00> : vector<1xf32>
    %69 = vector.multi_reduction <add>, %68, %cst_23 [0] : vector<4x1xf32> to vector<1xf32>
    %70 = vector.shape_cast %69 : vector<1xf32> to vector<1x1xf32>
    %cst_24 = arith.constant 9.765625E-4 : f32
    %71 = vector.broadcast %cst_24 : f32 to vector<1x1xf32>
    %72 = arith.mulf %70, %71 : vector<1x1xf32>
    %73 = vector.broadcast %72 : vector<1x1xf32> to vector<4x256xf32>
    %74 = arith.subf %66, %73 : vector<4x256xf32>
    %75 = arith.mulf %74, %74 : vector<4x256xf32>
    %cst_25 = arith.constant dense<0.000000e+00> : vector<4xf32>
    %76 = vector.multi_reduction <add>, %75, %cst_25 [1] : vector<4x256xf32> to vector<4xf32>
    %77 = vector.shape_cast %76 : vector<4xf32> to vector<4x1xf32>
    %cst_26 = arith.constant dense<0.000000e+00> : vector<1xf32>
    %78 = vector.multi_reduction <add>, %77, %cst_26 [0] : vector<4x1xf32> to vector<1xf32>
    %79 = vector.shape_cast %78 : vector<1xf32> to vector<1x1xf32>
    %cst_27 = arith.constant 9.765625E-4 : f32
    %80 = vector.broadcast %cst_27 : f32 to vector<1x1xf32>
    %81 = arith.mulf %79, %80 : vector<1x1xf32>
    %cst_28 = arith.constant 9.99999997E-7 : f32
    %82 = vector.broadcast %cst_28 : f32 to vector<1x1xf32>
    %83 = arith.addf %81, %82 : vector<1x1xf32>
    %84 = math.rsqrt %83 : vector<1x1xf32>
    %85 = vector.broadcast %84 : vector<1x1xf32> to vector<4x256xf32>
    %86 = arith.mulf %74, %85 : vector<4x256xf32>
    %87 = tpu.concatenate %23, %44, %65, %86 in 0 : vector<4x256xf32>, vector<4x256xf32>, vector<4x256xf32>, vector<4x256xf32> -> vector<16x256xf32>
    %c0_29 = arith.constant 0 : index
    %c0_30 = arith.constant 0 : index
    %88 = vector.load %arg2[%c0_29, %c0_30] : memref<16x1xf32, #tpu.memory_space<vmem>>, vector<16x1xf32>
    %89 = vector.broadcast %88 : vector<16x1xf32> to vector<16x256xf32>
    %90 = arith.mulf %87, %89 : vector<16x256xf32>
    %c0_31 = arith.constant 0 : index
    %c0_32 = arith.constant 0 : index
    %91 = vector.load %arg3[%c0_31, %c0_32] : memref<16x1xf32, #tpu.memory_space<vmem>>, vector<16x1xf32>
    %92 = vector.broadcast %91 : vector<16x1xf32> to vector<16x256xf32>
    %93 = arith.addf %90, %92 : vector<16x256xf32>
    %94 = arith.negf %93 : vector<16x256xf32>
    %95 = math.exp %94 : vector<16x256xf32>
    %cst_33 = arith.constant 1.000000e+00 : f32
    %96 = vector.broadcast %cst_33 : f32 to vector<16x256xf32>
    %97 = arith.addf %96, %95 : vector<16x256xf32>
    %98 = arith.divf %96, %97 : vector<16x256xf32>
    %99 = arith.mulf %93, %98 : vector<16x256xf32>
    %100 = arith.truncf %99 : vector<16x256xf32> to vector<16x256xbf16>
    %cst_34 = arith.constant 0.000000e+00 : bf16
    %101 = vector.broadcast %cst_34 : bf16 to vector<16x17xbf16>
    %102 = tpu.concatenate %101, %100, %101 in 1 : vector<16x17xbf16>, vector<16x256xbf16>, vector<16x17xbf16> -> vector<16x290xbf16>
    %103 = tpu.iota {dimensions = array<i32: 1>} : vector<1x256xi32>
    %c16_i32 = arith.constant 16 : i32
    %c0_i32 = arith.constant 0 : i32
    %104 = arith.cmpi eq, %c16_i32, %c0_i32 : i32
    %c1_i32 = arith.constant 1 : i32
    %105 = arith.select %104, %c1_i32, %c16_i32 : i32
    %106 = vector.broadcast %105 : i32 to vector<1x256xi32>
    %107 = arith.remsi %103, %106 : vector<1x256xi32>
    %c0_i32_35 = arith.constant 0 : i32
    %108 = vector.broadcast %c0_i32_35 : i32 to vector<1x256xi32>
    %109 = arith.cmpi ne, %107, %108 : vector<1x256xi32>
    %c0_i32_36 = arith.constant 0 : i32
    %110 = vector.broadcast %c0_i32_36 : i32 to vector<1x256xi32>
    %111 = arith.cmpi slt, %107, %110 : vector<1x256xi32>
    %c0_i32_37 = arith.constant 0 : i32
    %112 = arith.cmpi slt, %105, %c0_i32_37 : i32
    %113 = vector.broadcast %112 : i1 to vector<1x256xi1>
    %114 = vector.broadcast %113 : vector<1x256xi1> to vector<1x256xi1>
    %115 = arith.xori %111, %114 : vector<1x256xi1>
    %116 = arith.andi %115, %109 : vector<1x256xi1>
    %117 = vector.broadcast %105 : i32 to vector<1x256xi32>
    %118 = arith.addi %107, %117 : vector<1x256xi32>
    %119 = arith.select %116, %118, %107 : vector<1x256xi1>, vector<1x256xi32>
    %c1_i32_38 = arith.constant 1 : i32
    %120 = vector.broadcast %c1_i32_38 : i32 to vector<1x256xi32>
    %121 = arith.cmpi sge, %119, %120 : vector<1x256xi32>
    %c14_i32 = arith.constant 14 : i32
    %122 = vector.broadcast %c14_i32 : i32 to vector<1x256xi32>
    %123 = arith.cmpi sle, %119, %122 : vector<1x256xi32>
    %124 = vector.extract_strided_slice %102 {offsets = [0, 0], sizes = [16, 256], strides = [1, 1]} : vector<16x290xbf16> to vector<16x256xbf16>
    %cst_39 = arith.constant 0.000000e+00 : bf16
    %125 = vector.shape_cast %121 : vector<1x256xi1> to vector<1x256xi1>
    %126 = vector.broadcast %125 : vector<1x256xi1> to vector<16x256xi1>
    %127 = vector.broadcast %cst_39 : bf16 to vector<16x256xbf16>
    %128 = arith.select %126, %124, %127 : vector<16x256xi1>, vector<16x256xbf16>
    %129 = vector.extract_strided_slice %102 {offsets = [0, 1], sizes = [16, 256], strides = [1, 1]} : vector<16x290xbf16> to vector<16x256xbf16>
    %130 = vector.extract_strided_slice %102 {offsets = [0, 2], sizes = [16, 256], strides = [1, 1]} : vector<16x290xbf16> to vector<16x256xbf16>
    %cst_40 = arith.constant 0.000000e+00 : bf16
    %131 = vector.shape_cast %123 : vector<1x256xi1> to vector<1x256xi1>
    %132 = vector.broadcast %131 : vector<1x256xi1> to vector<16x256xi1>
    %133 = vector.broadcast %cst_40 : bf16 to vector<16x256xbf16>
    %134 = arith.select %132, %130, %133 : vector<16x256xi1>, vector<16x256xbf16>
    %135 = vector.extract_strided_slice %102 {offsets = [0, 16], sizes = [16, 256], strides = [1, 1]} : vector<16x290xbf16> to vector<16x256xbf16>
    %cst_41 = arith.constant 0.000000e+00 : bf16
    %136 = vector.shape_cast %121 : vector<1x256xi1> to vector<1x256xi1>
    %137 = vector.broadcast %136 : vector<1x256xi1> to vector<16x256xi1>
    %138 = vector.broadcast %cst_41 : bf16 to vector<16x256xbf16>
    %139 = arith.select %137, %135, %138 : vector<16x256xi1>, vector<16x256xbf16>
    %140 = vector.extract_strided_slice %102 {offsets = [0, 17], sizes = [16, 256], strides = [1, 1]} : vector<16x290xbf16> to vector<16x256xbf16>
    %141 = vector.extract_strided_slice %102 {offsets = [0, 18], sizes = [16, 256], strides = [1, 1]} : vector<16x290xbf16> to vector<16x256xbf16>
    %cst_42 = arith.constant 0.000000e+00 : bf16
    %142 = vector.shape_cast %123 : vector<1x256xi1> to vector<1x256xi1>
    %143 = vector.broadcast %142 : vector<1x256xi1> to vector<16x256xi1>
    %144 = vector.broadcast %cst_42 : bf16 to vector<16x256xbf16>
    %145 = arith.select %143, %141, %144 : vector<16x256xi1>, vector<16x256xbf16>
    %146 = vector.extract_strided_slice %102 {offsets = [0, 32], sizes = [16, 256], strides = [1, 1]} : vector<16x290xbf16> to vector<16x256xbf16>
    %cst_43 = arith.constant 0.000000e+00 : bf16
    %147 = vector.shape_cast %121 : vector<1x256xi1> to vector<1x256xi1>
    %148 = vector.broadcast %147 : vector<1x256xi1> to vector<16x256xi1>
    %149 = vector.broadcast %cst_43 : bf16 to vector<16x256xbf16>
    %150 = arith.select %148, %146, %149 : vector<16x256xi1>, vector<16x256xbf16>
    %151 = vector.extract_strided_slice %102 {offsets = [0, 33], sizes = [16, 256], strides = [1, 1]} : vector<16x290xbf16> to vector<16x256xbf16>
    %152 = vector.extract_strided_slice %102 {offsets = [0, 34], sizes = [16, 256], strides = [1, 1]} : vector<16x290xbf16> to vector<16x256xbf16>
    %cst_44 = arith.constant 0.000000e+00 : bf16
    %153 = vector.shape_cast %123 : vector<1x256xi1> to vector<1x256xi1>
    %154 = vector.broadcast %153 : vector<1x256xi1> to vector<16x256xi1>
    %155 = vector.broadcast %cst_44 : bf16 to vector<16x256xbf16>
    %156 = arith.select %154, %152, %155 : vector<16x256xi1>, vector<16x256xbf16>
    %157 = tpu.concatenate %128, %129, %134, %139, %140, %145, %150, %151, %156 in 0 : vector<16x256xbf16>, vector<16x256xbf16>, vector<16x256xbf16>, vector<16x256xbf16>, vector<16x256xbf16>, vector<16x256xbf16>, vector<16x256xbf16>, vector<16x256xbf16>, vector<16x256xbf16> -> vector<144x256xbf16>
    %c0_45 = arith.constant 0 : index
    %c0_46 = arith.constant 0 : index
    %158 = vector.load %arg4[%c0_45, %c0_46] : memref<16x144xbf16, #tpu.memory_space<vmem>>, vector<16x144xbf16>
    %cst_47 = arith.constant dense<0.000000e+00> : vector<16x256xf32>
    %159 = tpu.matmul %158, %157, %cst_47 {dimension_numbers = #tpu.dot_dimension_numbers<[1], [0], [0], [1], [0, 0, 1, 1], [], []>} : vector<16x144xbf16>, vector<144x256xbf16>, vector<16x256xf32> -> vector<16x256xf32>
    %c0_48 = arith.constant 0 : index
    %c0_49 = arith.constant 0 : index
    %160 = vector.load %arg5[%c0_48, %c0_49] : memref<16x1xf32, #tpu.memory_space<vmem>>, vector<16x1xf32>
    %161 = vector.broadcast %160 : vector<16x1xf32> to vector<16x256xf32>
    %162 = arith.addf %159, %161 : vector<16x256xf32>
    %163 = arith.truncf %162 : vector<16x256xf32> to vector<16x256xbf16>
    %c0_50 = arith.constant 0 : index
    %c0_51 = arith.constant 0 : index
    %c0_52 = arith.constant 0 : index
    %164 = vector.load %arg6[%c0_50, %c0_51, %c0_52] : memref<1x16x256xbf16, #tpu.memory_space<vmem>>, vector<1x16x256xbf16>
    %165 = vector.shape_cast %164 : vector<1x16x256xbf16> to vector<16x256xbf16>
    %166 = vector.shape_cast %163 : vector<16x256xbf16> to vector<1x16x256xbf16>
    tpu.vector_store %arg6[%c0_50, %c0_51, %c0_52], %166 {strides = array<i32>} : memref<1x16x256xbf16, #tpu.memory_space<vmem>>, vector<1x16x256xbf16>,
    return
  }
  func.func @transform_0(%arg0: i32) -> (i32, i32, i32) {
    %c0_i32 = arith.constant 0 : i32
    %c0_i32_0 = arith.constant 0 : i32
    %c0_i32_1 = arith.constant 0 : i32
    return %arg0, %c0_i32, %c0_i32_0 : i32, i32, i32
  }
  func.func @transform_1(%arg0: i32) -> (i32, i32) {
    %c0_i32 = arith.constant 0 : i32
    %c0_i32_0 = arith.constant 0 : i32
    %c0_i32_1 = arith.constant 0 : i32
    return %c0_i32, %c0_i32_0 : i32, i32
  }
  func.func @transform_2(%arg0: i32) -> (i32, i32) {
    %c0_i32 = arith.constant 0 : i32
    %c0_i32_0 = arith.constant 0 : i32
    %c0_i32_1 = arith.constant 0 : i32
    return %c0_i32, %c0_i32_0 : i32, i32
  }
  func.func @transform_3(%arg0: i32) -> (i32, i32) {
    %c0_i32 = arith.constant 0 : i32
    %c0_i32_0 = arith.constant 0 : i32
    %c0_i32_1 = arith.constant 0 : i32
    return %c0_i32, %c0_i32_0 : i32, i32
  }
  func.func @transform_4(%arg0: i32) -> (i32, i32) {
    %c0_i32 = arith.constant 0 : i32
    %c0_i32_0 = arith.constant 0 : i32
    %c0_i32_1 = arith.constant 0 : i32
    return %c0_i32, %c0_i32_0 : i32, i32
  }
  func.func @transform_5(%arg0: i32) -> (i32, i32, i32) {
    %c0_i32 = arith.constant 0 : i32
    %c0_i32_0 = arith.constant 0 : i32
    %c0_i32_1 = arith.constant 0 : i32
    return %arg0, %c0_i32, %c0_i32_0 : i32, i32, i32
  }
}

module attributes {stable_mosaic.version = 11 : i64} {
  func.func @kernel(%arg0: i32, %arg1: memref<1x16x256xbf16, #tpu.memory_space<vmem>>, %arg2: memref<16x1xf32, #tpu.memory_space<vmem>>, %arg3: memref<16x1xf32, #tpu.memory_space<vmem>>, %arg4: memref<16x144xbf16, #tpu.memory_space<vmem>>, %arg5: memref<16x1xf32, #tpu.memory_space<vmem>>, %arg6: memref<1x16x256xbf16, #tpu.memory_space<vmem>>, %arg7: memref<1x16x256xbf16, #tpu.memory_space<vmem>>) attributes {dimension_semantics = [#tpu.dimension_semantics<parallel>], iteration_bounds = array<i64: 2>, scalar_prefetch = 0 : i64, scratch_operands = 0 : i64, tpu.core_type = #tpu.core_type<tc>, window_params = [{transform_indices = @transform_0, window_bounds = array<i64: 1, 16, 256>}, {pipeline_mode = #tpu.pipeline_mode<synchronous>, transform_indices = @transform_1, window_bounds = array<i64: 16, 1>}, {pipeline_mode = #tpu.pipeline_mode<synchronous>, transform_indices = @transform_2, window_bounds = array<i64: 16, 1>}, {pipeline_mode = #tpu.pipeline_mode<synchronous>, transform_indices = @transform_3, window_bounds = array<i64: 16, 144>}, {pipeline_mode = #tpu.pipeline_mode<synchronous>, transform_indices = @transform_4, window_bounds = array<i64: 16, 1>}, {transform_indices = @transform_5, window_bounds = array<i64: 1, 16, 256>}, {transform_indices = @transform_6, window_bounds = array<i64: 1, 16, 256>}]} {
    %c0 = arith.constant 0 : index
    %c0_0 = arith.constant 0 : index
    %c0_1 = arith.constant 0 : index
    %0 = vector.load %arg1[%c0, %c0_0, %c0_1] : memref<1x16x256xbf16, #tpu.memory_space<vmem>>, vector<1x16x256xbf16>
    %1 = vector.shape_cast %0 : vector<1x16x256xbf16> to vector<16x256xbf16>
    %2 = arith.extf %1 : vector<16x256xbf16> to vector<16x256xf32>
    %3 = vector.extract_strided_slice %2 {offsets = [0, 0], sizes = [4, 256], strides = [1, 1]} : vector<16x256xf32> to vector<4x256xf32>
    %cst = arith.constant dense<0.000000e+00> : vector<4xf32>
    %4 = vector.multi_reduction <add>, %3, %cst [1] : vector<4x256xf32> to vector<4xf32>
    %5 = vector.shape_cast %4 : vector<4xf32> to vector<4x1xf32>
    %cst_2 = arith.constant dense<0.000000e+00> : vector<1xf32>
    %6 = vector.multi_reduction <add>, %5, %cst_2 [0] : vector<4x1xf32> to vector<1xf32>
    %7 = vector.shape_cast %6 : vector<1xf32> to vector<1x1xf32>
    %cst_3 = arith.constant 9.765625E-4 : f32
    %8 = vector.broadcast %cst_3 : f32 to vector<1x1xf32>
    %9 = arith.mulf %7, %8 : vector<1x1xf32>
    %10 = vector.broadcast %9 : vector<1x1xf32> to vector<4x256xf32>
    %11 = arith.subf %3, %10 : vector<4x256xf32>
    %12 = arith.mulf %11, %11 : vector<4x256xf32>
    %cst_4 = arith.constant dense<0.000000e+00> : vector<4xf32>
    %13 = vector.multi_reduction <add>, %12, %cst_4 [1] : vector<4x256xf32> to vector<4xf32>
    %14 = vector.shape_cast %13 : vector<4xf32> to vector<4x1xf32>
    %cst_5 = arith.constant dense<0.000000e+00> : vector<1xf32>
    %15 = vector.multi_reduction <add>, %14, %cst_5 [0] : vector<4x1xf32> to vector<1xf32>
    %16 = vector.shape_cast %15 : vector<1xf32> to vector<1x1xf32>
    %cst_6 = arith.constant 9.765625E-4 : f32
    %17 = vector.broadcast %cst_6 : f32 to vector<1x1xf32>
    %18 = arith.mulf %16, %17 : vector<1x1xf32>
    %cst_7 = arith.constant 9.99999997E-7 : f32
    %19 = vector.broadcast %cst_7 : f32 to vector<1x1xf32>
    %20 = arith.addf %18, %19 : vector<1x1xf32>
    %21 = math.rsqrt %20 : vector<1x1xf32>
    %22 = vector.broadcast %21 : vector<1x1xf32> to vector<4x256xf32>
    %23 = arith.mulf %11, %22 : vector<4x256xf32>
    %24 = vector.extract_strided_slice %2 {offsets = [4, 0], sizes = [4, 256], strides = [1, 1]} : vector<16x256xf32> to vector<4x256xf32>
    %cst_8 = arith.constant dense<0.000000e+00> : vector<4xf32>
    %25 = vector.multi_reduction <add>, %24, %cst_8 [1] : vector<4x256xf32> to vector<4xf32>
    %26 = vector.shape_cast %25 : vector<4xf32> to vector<4x1xf32>
    %cst_9 = arith.constant dense<0.000000e+00> : vector<1xf32>
    %27 = vector.multi_reduction <add>, %26, %cst_9 [0] : vector<4x1xf32> to vector<1xf32>
    %28 = vector.shape_cast %27 : vector<1xf32> to vector<1x1xf32>
    %cst_10 = arith.constant 9.765625E-4 : f32
    %29 = vector.broadcast %cst_10 : f32 to vector<1x1xf32>
    %30 = arith.mulf %28, %29 : vector<1x1xf32>
    %31 = vector.broadcast %30 : vector<1x1xf32> to vector<4x256xf32>
    %32 = arith.subf %24, %31 : vector<4x256xf32>
    %33 = arith.mulf %32, %32 : vector<4x256xf32>
    %cst_11 = arith.constant dense<0.000000e+00> : vector<4xf32>
    %34 = vector.multi_reduction <add>, %33, %cst_11 [1] : vector<4x256xf32> to vector<4xf32>
    %35 = vector.shape_cast %34 : vector<4xf32> to vector<4x1xf32>
    %cst_12 = arith.constant dense<0.000000e+00> : vector<1xf32>
    %36 = vector.multi_reduction <add>, %35, %cst_12 [0] : vector<4x1xf32> to vector<1xf32>
    %37 = vector.shape_cast %36 : vector<1xf32> to vector<1x1xf32>
    %cst_13 = arith.constant 9.765625E-4 : f32
    %38 = vector.broadcast %cst_13 : f32 to vector<1x1xf32>
    %39 = arith.mulf %37, %38 : vector<1x1xf32>
    %cst_14 = arith.constant 9.99999997E-7 : f32
    %40 = vector.broadcast %cst_14 : f32 to vector<1x1xf32>
    %41 = arith.addf %39, %40 : vector<1x1xf32>
    %42 = math.rsqrt %41 : vector<1x1xf32>
    %43 = vector.broadcast %42 : vector<1x1xf32> to vector<4x256xf32>
    %44 = arith.mulf %32, %43 : vector<4x256xf32>
    %45 = vector.extract_strided_slice %2 {offsets = [8, 0], sizes = [4, 256], strides = [1, 1]} : vector<16x256xf32> to vector<4x256xf32>
    %cst_15 = arith.constant dense<0.000000e+00> : vector<4xf32>
    %46 = vector.multi_reduction <add>, %45, %cst_15 [1] : vector<4x256xf32> to vector<4xf32>
    %47 = vector.shape_cast %46 : vector<4xf32> to vector<4x1xf32>
    %cst_16 = arith.constant dense<0.000000e+00> : vector<1xf32>
    %48 = vector.multi_reduction <add>, %47, %cst_16 [0] : vector<4x1xf32> to vector<1xf32>
    %49 = vector.shape_cast %48 : vector<1xf32> to vector<1x1xf32>
    %cst_17 = arith.constant 9.765625E-4 : f32
    %50 = vector.broadcast %cst_17 : f32 to vector<1x1xf32>
    %51 = arith.mulf %49, %50 : vector<1x1xf32>
    %52 = vector.broadcast %51 : vector<1x1xf32> to vector<4x256xf32>
    %53 = arith.subf %45, %52 : vector<4x256xf32>
    %54 = arith.mulf %53, %53 : vector<4x256xf32>
    %cst_18 = arith.constant dense<0.000000e+00> : vector<4xf32>
    %55 = vector.multi_reduction <add>, %54, %cst_18 [1] : vector<4x256xf32> to vector<4xf32>
    %56 = vector.shape_cast %55 : vector<4xf32> to vector<4x1xf32>
    %cst_19 = arith.constant dense<0.000000e+00> : vector<1xf32>
    %57 = vector.multi_reduction <add>, %56, %cst_19 [0] : vector<4x1xf32> to vector<1xf32>
    %58 = vector.shape_cast %57 : vector<1xf32> to vector<1x1xf32>
    %cst_20 = arith.constant 9.765625E-4 : f32
    %59 = vector.broadcast %cst_20 : f32 to vector<1x1xf32>
    %60 = arith.mulf %58, %59 : vector<1x1xf32>
    %cst_21 = arith.constant 9.99999997E-7 : f32
    %61 = vector.broadcast %cst_21 : f32 to vector<1x1xf32>
    %62 = arith.addf %60, %61 : vector<1x1xf32>
    %63 = math.rsqrt %62 : vector<1x1xf32>
    %64 = vector.broadcast %63 : vector<1x1xf32> to vector<4x256xf32>
    %65 = arith.mulf %53, %64 : vector<4x256xf32>
    %66 = vector.extract_strided_slice %2 {offsets = [12, 0], sizes = [4, 256], strides = [1, 1]} : vector<16x256xf32> to vector<4x256xf32>
    %cst_22 = arith.constant dense<0.000000e+00> : vector<4xf32>
    %67 = vector.multi_reduction <add>, %66, %cst_22 [1] : vector<4x256xf32> to vector<4xf32>
    %68 = vector.shape_cast %67 : vector<4xf32> to vector<4x1xf32>
    %cst_23 = arith.constant dense<0.000000e+00> : vector<1xf32>
    %69 = vector.multi_reduction <add>, %68, %cst_23 [0] : vector<4x1xf32> to vector<1xf32>
    %70 = vector.shape_cast %69 : vector<1xf32> to vector<1x1xf32>
    %cst_24 = arith.constant 9.765625E-4 : f32
    %71 = vector.broadcast %cst_24 : f32 to vector<1x1xf32>
    %72 = arith.mulf %70, %71 : vector<1x1xf32>
    %73 = vector.broadcast %72 : vector<1x1xf32> to vector<4x256xf32>
    %74 = arith.subf %66, %73 : vector<4x256xf32>
    %75 = arith.mulf %74, %74 : vector<4x256xf32>
    %cst_25 = arith.constant dense<0.000000e+00> : vector<4xf32>
    %76 = vector.multi_reduction <add>, %75, %cst_25 [1] : vector<4x256xf32> to vector<4xf32>
    %77 = vector.shape_cast %76 : vector<4xf32> to vector<4x1xf32>
    %cst_26 = arith.constant dense<0.000000e+00> : vector<1xf32>
    %78 = vector.multi_reduction <add>, %77, %cst_26 [0] : vector<4x1xf32> to vector<1xf32>
    %79 = vector.shape_cast %78 : vector<1xf32> to vector<1x1xf32>
    %cst_27 = arith.constant 9.765625E-4 : f32
    %80 = vector.broadcast %cst_27 : f32 to vector<1x1xf32>
    %81 = arith.mulf %79, %80 : vector<1x1xf32>
    %cst_28 = arith.constant 9.99999997E-7 : f32
    %82 = vector.broadcast %cst_28 : f32 to vector<1x1xf32>
    %83 = arith.addf %81, %82 : vector<1x1xf32>
    %84 = math.rsqrt %83 : vector<1x1xf32>
    %85 = vector.broadcast %84 : vector<1x1xf32> to vector<4x256xf32>
    %86 = arith.mulf %74, %85 : vector<4x256xf32>
    %87 = tpu.concatenate %23, %44, %65, %86 in 0 : vector<4x256xf32>, vector<4x256xf32>, vector<4x256xf32>, vector<4x256xf32> -> vector<16x256xf32>
    %c0_29 = arith.constant 0 : index
    %c0_30 = arith.constant 0 : index
    %88 = vector.load %arg2[%c0_29, %c0_30] : memref<16x1xf32, #tpu.memory_space<vmem>>, vector<16x1xf32>
    %89 = vector.broadcast %88 : vector<16x1xf32> to vector<16x256xf32>
    %90 = arith.mulf %87, %89 : vector<16x256xf32>
    %c0_31 = arith.constant 0 : index
    %c0_32 = arith.constant 0 : index
    %91 = vector.load %arg3[%c0_31, %c0_32] : memref<16x1xf32, #tpu.memory_space<vmem>>, vector<16x1xf32>
    %92 = vector.broadcast %91 : vector<16x1xf32> to vector<16x256xf32>
    %93 = arith.addf %90, %92 : vector<16x256xf32>
    %94 = arith.negf %93 : vector<16x256xf32>
    %95 = math.exp %94 : vector<16x256xf32>
    %cst_33 = arith.constant 1.000000e+00 : f32
    %96 = vector.broadcast %cst_33 : f32 to vector<16x256xf32>
    %97 = arith.addf %96, %95 : vector<16x256xf32>
    %98 = arith.divf %96, %97 : vector<16x256xf32>
    %99 = arith.mulf %93, %98 : vector<16x256xf32>
    %100 = arith.truncf %99 : vector<16x256xf32> to vector<16x256xbf16>
    %cst_34 = arith.constant 0.000000e+00 : bf16
    %101 = vector.broadcast %cst_34 : bf16 to vector<16x17xbf16>
    %102 = tpu.concatenate %101, %100, %101 in 1 : vector<16x17xbf16>, vector<16x256xbf16>, vector<16x17xbf16> -> vector<16x290xbf16>
    %103 = tpu.iota {dimensions = array<i32: 1>} : vector<1x256xi32>
    %c16_i32 = arith.constant 16 : i32
    %c0_i32 = arith.constant 0 : i32
    %104 = arith.cmpi eq, %c16_i32, %c0_i32 : i32
    %c1_i32 = arith.constant 1 : i32
    %105 = arith.select %104, %c1_i32, %c16_i32 : i32
    %106 = vector.broadcast %105 : i32 to vector<1x256xi32>
    %107 = arith.remsi %103, %106 : vector<1x256xi32>
    %c0_i32_35 = arith.constant 0 : i32
    %108 = vector.broadcast %c0_i32_35 : i32 to vector<1x256xi32>
    %109 = arith.cmpi ne, %107, %108 : vector<1x256xi32>
    %c0_i32_36 = arith.constant 0 : i32
    %110 = vector.broadcast %c0_i32_36 : i32 to vector<1x256xi32>
    %111 = arith.cmpi slt, %107, %110 : vector<1x256xi32>
    %c0_i32_37 = arith.constant 0 : i32
    %112 = arith.cmpi slt, %105, %c0_i32_37 : i32
    %113 = vector.broadcast %112 : i1 to vector<1x256xi1>
    %114 = vector.broadcast %113 : vector<1x256xi1> to vector<1x256xi1>
    %115 = arith.xori %111, %114 : vector<1x256xi1>
    %116 = arith.andi %115, %109 : vector<1x256xi1>
    %117 = vector.broadcast %105 : i32 to vector<1x256xi32>
    %118 = arith.addi %107, %117 : vector<1x256xi32>
    %119 = arith.select %116, %118, %107 : vector<1x256xi1>, vector<1x256xi32>
    %c1_i32_38 = arith.constant 1 : i32
    %120 = vector.broadcast %c1_i32_38 : i32 to vector<1x256xi32>
    %121 = arith.cmpi sge, %119, %120 : vector<1x256xi32>
    %c14_i32 = arith.constant 14 : i32
    %122 = vector.broadcast %c14_i32 : i32 to vector<1x256xi32>
    %123 = arith.cmpi sle, %119, %122 : vector<1x256xi32>
    %124 = vector.extract_strided_slice %102 {offsets = [0, 0], sizes = [16, 256], strides = [1, 1]} : vector<16x290xbf16> to vector<16x256xbf16>
    %cst_39 = arith.constant 0.000000e+00 : bf16
    %125 = vector.shape_cast %121 : vector<1x256xi1> to vector<1x256xi1>
    %126 = vector.broadcast %125 : vector<1x256xi1> to vector<16x256xi1>
    %127 = vector.broadcast %cst_39 : bf16 to vector<16x256xbf16>
    %128 = arith.select %126, %124, %127 : vector<16x256xi1>, vector<16x256xbf16>
    %129 = vector.extract_strided_slice %102 {offsets = [0, 1], sizes = [16, 256], strides = [1, 1]} : vector<16x290xbf16> to vector<16x256xbf16>
    %130 = vector.extract_strided_slice %102 {offsets = [0, 2], sizes = [16, 256], strides = [1, 1]} : vector<16x290xbf16> to vector<16x256xbf16>
    %cst_40 = arith.constant 0.000000e+00 : bf16
    %131 = vector.shape_cast %123 : vector<1x256xi1> to vector<1x256xi1>
    %132 = vector.broadcast %131 : vector<1x256xi1> to vector<16x256xi1>
    %133 = vector.broadcast %cst_40 : bf16 to vector<16x256xbf16>
    %134 = arith.select %132, %130, %133 : vector<16x256xi1>, vector<16x256xbf16>
    %135 = vector.extract_strided_slice %102 {offsets = [0, 16], sizes = [16, 256], strides = [1, 1]} : vector<16x290xbf16> to vector<16x256xbf16>
    %cst_41 = arith.constant 0.000000e+00 : bf16
    %136 = vector.shape_cast %121 : vector<1x256xi1> to vector<1x256xi1>
    %137 = vector.broadcast %136 : vector<1x256xi1> to vector<16x256xi1>
    %138 = vector.broadcast %cst_41 : bf16 to vector<16x256xbf16>
    %139 = arith.select %137, %135, %138 : vector<16x256xi1>, vector<16x256xbf16>
    %140 = vector.extract_strided_slice %102 {offsets = [0, 17], sizes = [16, 256], strides = [1, 1]} : vector<16x290xbf16> to vector<16x256xbf16>
    %141 = vector.extract_strided_slice %102 {offsets = [0, 18], sizes = [16, 256], strides = [1, 1]} : vector<16x290xbf16> to vector<16x256xbf16>
    %cst_42 = arith.constant 0.000000e+00 : bf16
    %142 = vector.shape_cast %123 : vector<1x256xi1> to vector<1x256xi1>
    %143 = vector.broadcast %142 : vector<1x256xi1> to vector<16x256xi1>
    %144 = vector.broadcast %cst_42 : bf16 to vector<16x256xbf16>
    %145 = arith.select %143, %141, %144 : vector<16x256xi1>, vector<16x256xbf16>
    %146 = vector.extract_strided_slice %102 {offsets = [0, 32], sizes = [16, 256], strides = [1, 1]} : vector<16x290xbf16> to vector<16x256xbf16>
    %cst_43 = arith.constant 0.000000e+00 : bf16
    %147 = vector.shape_cast %121 : vector<1x256xi1> to vector<1x256xi1>
    %148 = vector.broadcast %147 : vector<1x256xi1> to vector<16x256xi1>
    %149 = vector.broadcast %cst_43 : bf16 to vector<16x256xbf16>
    %150 = arith.select %148, %146, %149 : vector<16x256xi1>, vector<16x256xbf16>
    %151 = vector.extract_strided_slice %102 {offsets = [0, 33], sizes = [16, 256], strides = [1, 1]} : vector<16x290xbf16> to vector<16x256xbf16>
    %152 = vector.extract_strided_slice %102 {offsets = [0, 34], sizes = [16, 256], strides = [1, 1]} : vector<16x290xbf16> to vector<16x256xbf16>
    %cst_44 = arith.constant 0.000000e+00 : bf16
    %153 = vector.shape_cast %123 : vector<1x256xi1> to vector<1x256xi1>
    %154 = vector.broadcast %153 : vector<1x256xi1> to vector<16x256xi1>
    %155 = vector.broadcast %cst_44 : bf16 to vector<16x256xbf16>
    %156 = arith.select %154, %152, %155 : vector<16x256xi1>, vector<16x256xbf16>
    %157 = tpu.concatenate %128, %129, %134, %139, %140, %145, %150, %151, %156 in 0 : vector<16x256xbf16>, vector<16x256xbf16>, vector<16x256xbf16>, vector<16x256xbf16>, vector<16x256xbf16>, vector<16x256xbf16>, vector<16x256xbf16>, vector<16x256xbf16>, vector<16x256xbf16> -> vector<144x256xbf16>
    %c0_45 = arith.constant 0 : index
    %c0_46 = arith.constant 0 : index
    %158 = vector.load %arg4[%c0_45, %c0_46] : memref<16x144xbf16, #tpu.memory_space<vmem>>, vector<16x144xbf16>
    %cst_47 = arith.constant dense<0.000000e+00> : vector<16x256xf32>
    %159 = tpu.matmul %158, %157, %cst_47 {dimension_numbers = #tpu.dot_dimension_numbers<[1], [0], [0], [1], [0, 0, 1, 1], [], []>} : vector<16x144xbf16>, vector<144x256xbf16>, vector<16x256xf32> -> vector<16x256xf32>
    %c0_48 = arith.constant 0 : index
    %c0_49 = arith.constant 0 : index
    %160 = vector.load %arg5[%c0_48, %c0_49] : memref<16x1xf32, #tpu.memory_space<vmem>>, vector<16x1xf32>
    %161 = vector.broadcast %160 : vector<16x1xf32> to vector<16x256xf32>
    %162 = arith.addf %159, %161 : vector<16x256xf32>
    %c0_50 = arith.constant 0 : index
    %c0_51 = arith.constant 0 : index
    %c0_52 = arith.constant 0 : index
    %163 = vector.load %arg6[%c0_50, %c0_51, %c0_52] : memref<1x16x256xbf16, #tpu.memory_space<vmem>>, vector<1x16x256xbf16>
    %164 = vector.shape_cast %163 : vector<1x16x256xbf16> to vector<16x256xbf16>
    %165 = arith.extf %164 : vector<16x256xbf16> to vector<16x256xf32>
    %166 = arith.addf %162, %165 : vector<16x256xf32>
    %167 = arith.truncf %166 : vector<16x256xf32> to vector<16x256xbf16>
    %c0_53 = arith.constant 0 : index
    %c0_54 = arith.constant 0 : index
    %c0_55 = arith.constant 0 : index
    %168 = vector.load %arg7[%c0_53, %c0_54, %c0_55] : memref<1x16x256xbf16, #tpu.memory_space<vmem>>, vector<1x16x256xbf16>
    %169 = vector.shape_cast %168 : vector<1x16x256xbf16> to vector<16x256xbf16>
    %170 = vector.shape_cast %167 : vector<16x256xbf16> to vector<1x16x256xbf16>
    tpu.vector_store %arg7[%c0_53, %c0_54, %c0_55], %170 {strides = array<i32>} : memref<1x16x256xbf16, #tpu.memory_space<vmem>>, vector<1x16x256xbf16>,
    return
  }
  func.func @transform_0(%arg0: i32) -> (i32, i32, i32) {
    %c0_i32 = arith.constant 0 : i32
    %c0_i32_0 = arith.constant 0 : i32
    %c0_i32_1 = arith.constant 0 : i32
    return %arg0, %c0_i32, %c0_i32_0 : i32, i32, i32
  }
  func.func @transform_1(%arg0: i32) -> (i32, i32) {
    %c0_i32 = arith.constant 0 : i32
    %c0_i32_0 = arith.constant 0 : i32
    %c0_i32_1 = arith.constant 0 : i32
    return %c0_i32, %c0_i32_0 : i32, i32
  }
  func.func @transform_2(%arg0: i32) -> (i32, i32) {
    %c0_i32 = arith.constant 0 : i32
    %c0_i32_0 = arith.constant 0 : i32
    %c0_i32_1 = arith.constant 0 : i32
    return %c0_i32, %c0_i32_0 : i32, i32
  }
  func.func @transform_3(%arg0: i32) -> (i32, i32) {
    %c0_i32 = arith.constant 0 : i32
    %c0_i32_0 = arith.constant 0 : i32
    %c0_i32_1 = arith.constant 0 : i32
    return %c0_i32, %c0_i32_0 : i32, i32
  }
  func.func @transform_4(%arg0: i32) -> (i32, i32) {
    %c0_i32 = arith.constant 0 : i32
    %c0_i32_0 = arith.constant 0 : i32
    %c0_i32_1 = arith.constant 0 : i32
    return %c0_i32, %c0_i32_0 : i32, i32
  }
  func.func @transform_5(%arg0: i32) -> (i32, i32, i32) {
    %c0_i32 = arith.constant 0 : i32
    %c0_i32_0 = arith.constant 0 : i32
    %c0_i32_1 = arith.constant 0 : i32
    return %arg0, %c0_i32, %c0_i32_0 : i32, i32, i32
  }
  func.func @transform_6(%arg0: i32) -> (i32, i32, i32) {
    %c0_i32 = arith.constant 0 : i32
    %c0_i32_0 = arith.constant 0 : i32
    %c0_i32_1 = arith.constant 0 : i32
    return %arg0, %c0_i32, %c0_i32_0 : i32, i32, i32
  }
}

module attributes {stable_mosaic.version = 11 : i64} {
  func.func @kernel(%arg0: i32, %arg1: memref<1x8x256xf32, #tpu.memory_space<vmem>>, %arg2: memref<8x1xf32, #tpu.memory_space<vmem>>, %arg3: memref<8x1xf32, #tpu.memory_space<vmem>>, %arg4: memref<16x72xbf16, #tpu.memory_space<vmem>>, %arg5: memref<16x1xf32, #tpu.memory_space<vmem>>, %arg6: memref<1x16x256xbf16, #tpu.memory_space<vmem>>) attributes {dimension_semantics = [#tpu.dimension_semantics<parallel>], iteration_bounds = array<i64: 2>, scalar_prefetch = 0 : i64, scratch_operands = 0 : i64, tpu.core_type = #tpu.core_type<tc>, window_params = [{transform_indices = @transform_0, window_bounds = array<i64: 1, 8, 256>}, {pipeline_mode = #tpu.pipeline_mode<synchronous>, transform_indices = @transform_1, window_bounds = array<i64: 8, 1>}, {pipeline_mode = #tpu.pipeline_mode<synchronous>, transform_indices = @transform_2, window_bounds = array<i64: 8, 1>}, {pipeline_mode = #tpu.pipeline_mode<synchronous>, transform_indices = @transform_3, window_bounds = array<i64: 16, 72>}, {pipeline_mode = #tpu.pipeline_mode<synchronous>, transform_indices = @transform_4, window_bounds = array<i64: 16, 1>}, {transform_indices = @transform_5, window_bounds = array<i64: 1, 16, 256>}]} {
    %c0 = arith.constant 0 : index
    %c0_0 = arith.constant 0 : index
    %c0_1 = arith.constant 0 : index
    %0 = vector.load %arg1[%c0, %c0_0, %c0_1] : memref<1x8x256xf32, #tpu.memory_space<vmem>>, vector<1x8x256xf32>
    %1 = vector.shape_cast %0 : vector<1x8x256xf32> to vector<8x256xf32>
    %2 = vector.extract_strided_slice %1 {offsets = [0, 0], sizes = [2, 256], strides = [1, 1]} : vector<8x256xf32> to vector<2x256xf32>
    %cst = arith.constant dense<0.000000e+00> : vector<2xf32>
    %3 = vector.multi_reduction <add>, %2, %cst [1] : vector<2x256xf32> to vector<2xf32>
    %4 = vector.shape_cast %3 : vector<2xf32> to vector<2x1xf32>
    %cst_2 = arith.constant dense<0.000000e+00> : vector<1xf32>
    %5 = vector.multi_reduction <add>, %4, %cst_2 [0] : vector<2x1xf32> to vector<1xf32>
    %6 = vector.shape_cast %5 : vector<1xf32> to vector<1x1xf32>
    %cst_3 = arith.constant 0.001953125 : f32
    %7 = vector.broadcast %cst_3 : f32 to vector<1x1xf32>
    %8 = arith.mulf %6, %7 : vector<1x1xf32>
    %9 = vector.broadcast %8 : vector<1x1xf32> to vector<2x256xf32>
    %10 = arith.subf %2, %9 : vector<2x256xf32>
    %11 = arith.mulf %10, %10 : vector<2x256xf32>
    %cst_4 = arith.constant dense<0.000000e+00> : vector<2xf32>
    %12 = vector.multi_reduction <add>, %11, %cst_4 [1] : vector<2x256xf32> to vector<2xf32>
    %13 = vector.shape_cast %12 : vector<2xf32> to vector<2x1xf32>
    %cst_5 = arith.constant dense<0.000000e+00> : vector<1xf32>
    %14 = vector.multi_reduction <add>, %13, %cst_5 [0] : vector<2x1xf32> to vector<1xf32>
    %15 = vector.shape_cast %14 : vector<1xf32> to vector<1x1xf32>
    %cst_6 = arith.constant 0.001953125 : f32
    %16 = vector.broadcast %cst_6 : f32 to vector<1x1xf32>
    %17 = arith.mulf %15, %16 : vector<1x1xf32>
    %cst_7 = arith.constant 9.99999997E-7 : f32
    %18 = vector.broadcast %cst_7 : f32 to vector<1x1xf32>
    %19 = arith.addf %17, %18 : vector<1x1xf32>
    %20 = math.rsqrt %19 : vector<1x1xf32>
    %21 = vector.broadcast %20 : vector<1x1xf32> to vector<2x256xf32>
    %22 = arith.mulf %10, %21 : vector<2x256xf32>
    %23 = vector.extract_strided_slice %1 {offsets = [2, 0], sizes = [2, 256], strides = [1, 1]} : vector<8x256xf32> to vector<2x256xf32>
    %cst_8 = arith.constant dense<0.000000e+00> : vector<2xf32>
    %24 = vector.multi_reduction <add>, %23, %cst_8 [1] : vector<2x256xf32> to vector<2xf32>
    %25 = vector.shape_cast %24 : vector<2xf32> to vector<2x1xf32>
    %cst_9 = arith.constant dense<0.000000e+00> : vector<1xf32>
    %26 = vector.multi_reduction <add>, %25, %cst_9 [0] : vector<2x1xf32> to vector<1xf32>
    %27 = vector.shape_cast %26 : vector<1xf32> to vector<1x1xf32>
    %cst_10 = arith.constant 0.001953125 : f32
    %28 = vector.broadcast %cst_10 : f32 to vector<1x1xf32>
    %29 = arith.mulf %27, %28 : vector<1x1xf32>
    %30 = vector.broadcast %29 : vector<1x1xf32> to vector<2x256xf32>
    %31 = arith.subf %23, %30 : vector<2x256xf32>
    %32 = arith.mulf %31, %31 : vector<2x256xf32>
    %cst_11 = arith.constant dense<0.000000e+00> : vector<2xf32>
    %33 = vector.multi_reduction <add>, %32, %cst_11 [1] : vector<2x256xf32> to vector<2xf32>
    %34 = vector.shape_cast %33 : vector<2xf32> to vector<2x1xf32>
    %cst_12 = arith.constant dense<0.000000e+00> : vector<1xf32>
    %35 = vector.multi_reduction <add>, %34, %cst_12 [0] : vector<2x1xf32> to vector<1xf32>
    %36 = vector.shape_cast %35 : vector<1xf32> to vector<1x1xf32>
    %cst_13 = arith.constant 0.001953125 : f32
    %37 = vector.broadcast %cst_13 : f32 to vector<1x1xf32>
    %38 = arith.mulf %36, %37 : vector<1x1xf32>
    %cst_14 = arith.constant 9.99999997E-7 : f32
    %39 = vector.broadcast %cst_14 : f32 to vector<1x1xf32>
    %40 = arith.addf %38, %39 : vector<1x1xf32>
    %41 = math.rsqrt %40 : vector<1x1xf32>
    %42 = vector.broadcast %41 : vector<1x1xf32> to vector<2x256xf32>
    %43 = arith.mulf %31, %42 : vector<2x256xf32>
    %44 = vector.extract_strided_slice %1 {offsets = [4, 0], sizes = [2, 256], strides = [1, 1]} : vector<8x256xf32> to vector<2x256xf32>
    %cst_15 = arith.constant dense<0.000000e+00> : vector<2xf32>
    %45 = vector.multi_reduction <add>, %44, %cst_15 [1] : vector<2x256xf32> to vector<2xf32>
    %46 = vector.shape_cast %45 : vector<2xf32> to vector<2x1xf32>
    %cst_16 = arith.constant dense<0.000000e+00> : vector<1xf32>
    %47 = vector.multi_reduction <add>, %46, %cst_16 [0] : vector<2x1xf32> to vector<1xf32>
    %48 = vector.shape_cast %47 : vector<1xf32> to vector<1x1xf32>
    %cst_17 = arith.constant 0.001953125 : f32
    %49 = vector.broadcast %cst_17 : f32 to vector<1x1xf32>
    %50 = arith.mulf %48, %49 : vector<1x1xf32>
    %51 = vector.broadcast %50 : vector<1x1xf32> to vector<2x256xf32>
    %52 = arith.subf %44, %51 : vector<2x256xf32>
    %53 = arith.mulf %52, %52 : vector<2x256xf32>
    %cst_18 = arith.constant dense<0.000000e+00> : vector<2xf32>
    %54 = vector.multi_reduction <add>, %53, %cst_18 [1] : vector<2x256xf32> to vector<2xf32>
    %55 = vector.shape_cast %54 : vector<2xf32> to vector<2x1xf32>
    %cst_19 = arith.constant dense<0.000000e+00> : vector<1xf32>
    %56 = vector.multi_reduction <add>, %55, %cst_19 [0] : vector<2x1xf32> to vector<1xf32>
    %57 = vector.shape_cast %56 : vector<1xf32> to vector<1x1xf32>
    %cst_20 = arith.constant 0.001953125 : f32
    %58 = vector.broadcast %cst_20 : f32 to vector<1x1xf32>
    %59 = arith.mulf %57, %58 : vector<1x1xf32>
    %cst_21 = arith.constant 9.99999997E-7 : f32
    %60 = vector.broadcast %cst_21 : f32 to vector<1x1xf32>
    %61 = arith.addf %59, %60 : vector<1x1xf32>
    %62 = math.rsqrt %61 : vector<1x1xf32>
    %63 = vector.broadcast %62 : vector<1x1xf32> to vector<2x256xf32>
    %64 = arith.mulf %52, %63 : vector<2x256xf32>
    %65 = vector.extract_strided_slice %1 {offsets = [6, 0], sizes = [2, 256], strides = [1, 1]} : vector<8x256xf32> to vector<2x256xf32>
    %cst_22 = arith.constant dense<0.000000e+00> : vector<2xf32>
    %66 = vector.multi_reduction <add>, %65, %cst_22 [1] : vector<2x256xf32> to vector<2xf32>
    %67 = vector.shape_cast %66 : vector<2xf32> to vector<2x1xf32>
    %cst_23 = arith.constant dense<0.000000e+00> : vector<1xf32>
    %68 = vector.multi_reduction <add>, %67, %cst_23 [0] : vector<2x1xf32> to vector<1xf32>
    %69 = vector.shape_cast %68 : vector<1xf32> to vector<1x1xf32>
    %cst_24 = arith.constant 0.001953125 : f32
    %70 = vector.broadcast %cst_24 : f32 to vector<1x1xf32>
    %71 = arith.mulf %69, %70 : vector<1x1xf32>
    %72 = vector.broadcast %71 : vector<1x1xf32> to vector<2x256xf32>
    %73 = arith.subf %65, %72 : vector<2x256xf32>
    %74 = arith.mulf %73, %73 : vector<2x256xf32>
    %cst_25 = arith.constant dense<0.000000e+00> : vector<2xf32>
    %75 = vector.multi_reduction <add>, %74, %cst_25 [1] : vector<2x256xf32> to vector<2xf32>
    %76 = vector.shape_cast %75 : vector<2xf32> to vector<2x1xf32>
    %cst_26 = arith.constant dense<0.000000e+00> : vector<1xf32>
    %77 = vector.multi_reduction <add>, %76, %cst_26 [0] : vector<2x1xf32> to vector<1xf32>
    %78 = vector.shape_cast %77 : vector<1xf32> to vector<1x1xf32>
    %cst_27 = arith.constant 0.001953125 : f32
    %79 = vector.broadcast %cst_27 : f32 to vector<1x1xf32>
    %80 = arith.mulf %78, %79 : vector<1x1xf32>
    %cst_28 = arith.constant 9.99999997E-7 : f32
    %81 = vector.broadcast %cst_28 : f32 to vector<1x1xf32>
    %82 = arith.addf %80, %81 : vector<1x1xf32>
    %83 = math.rsqrt %82 : vector<1x1xf32>
    %84 = vector.broadcast %83 : vector<1x1xf32> to vector<2x256xf32>
    %85 = arith.mulf %73, %84 : vector<2x256xf32>
    %86 = tpu.concatenate %22, %43, %64, %85 in 0 : vector<2x256xf32>, vector<2x256xf32>, vector<2x256xf32>, vector<2x256xf32> -> vector<8x256xf32>
    %c0_29 = arith.constant 0 : index
    %c0_30 = arith.constant 0 : index
    %87 = vector.load %arg2[%c0_29, %c0_30] : memref<8x1xf32, #tpu.memory_space<vmem>>, vector<8x1xf32>
    %88 = vector.broadcast %87 : vector<8x1xf32> to vector<8x256xf32>
    %89 = arith.mulf %86, %88 : vector<8x256xf32>
    %c0_31 = arith.constant 0 : index
    %c0_32 = arith.constant 0 : index
    %90 = vector.load %arg3[%c0_31, %c0_32] : memref<8x1xf32, #tpu.memory_space<vmem>>, vector<8x1xf32>
    %91 = vector.broadcast %90 : vector<8x1xf32> to vector<8x256xf32>
    %92 = arith.addf %89, %91 : vector<8x256xf32>
    %93 = arith.negf %92 : vector<8x256xf32>
    %94 = math.exp %93 : vector<8x256xf32>
    %cst_33 = arith.constant 1.000000e+00 : f32
    %95 = vector.broadcast %cst_33 : f32 to vector<8x256xf32>
    %96 = arith.addf %95, %94 : vector<8x256xf32>
    %97 = arith.divf %95, %96 : vector<8x256xf32>
    %98 = arith.mulf %92, %97 : vector<8x256xf32>
    %99 = arith.truncf %98 : vector<8x256xf32> to vector<8x256xbf16>
    %cst_34 = arith.constant 0.000000e+00 : bf16
    %100 = vector.broadcast %cst_34 : bf16 to vector<8x17xbf16>
    %101 = tpu.concatenate %100, %99, %100 in 1 : vector<8x17xbf16>, vector<8x256xbf16>, vector<8x17xbf16> -> vector<8x290xbf16>
    %102 = tpu.iota {dimensions = array<i32: 1>} : vector<1x256xi32>
    %c16_i32 = arith.constant 16 : i32
    %c0_i32 = arith.constant 0 : i32
    %103 = arith.cmpi eq, %c16_i32, %c0_i32 : i32
    %c1_i32 = arith.constant 1 : i32
    %104 = arith.select %103, %c1_i32, %c16_i32 : i32
    %105 = vector.broadcast %104 : i32 to vector<1x256xi32>
    %106 = arith.remsi %102, %105 : vector<1x256xi32>
    %c0_i32_35 = arith.constant 0 : i32
    %107 = vector.broadcast %c0_i32_35 : i32 to vector<1x256xi32>
    %108 = arith.cmpi ne, %106, %107 : vector<1x256xi32>
    %c0_i32_36 = arith.constant 0 : i32
    %109 = vector.broadcast %c0_i32_36 : i32 to vector<1x256xi32>
    %110 = arith.cmpi slt, %106, %109 : vector<1x256xi32>
    %c0_i32_37 = arith.constant 0 : i32
    %111 = arith.cmpi slt, %104, %c0_i32_37 : i32
    %112 = vector.broadcast %111 : i1 to vector<1x256xi1>
    %113 = vector.broadcast %112 : vector<1x256xi1> to vector<1x256xi1>
    %114 = arith.xori %110, %113 : vector<1x256xi1>
    %115 = arith.andi %114, %108 : vector<1x256xi1>
    %116 = vector.broadcast %104 : i32 to vector<1x256xi32>
    %117 = arith.addi %106, %116 : vector<1x256xi32>
    %118 = arith.select %115, %117, %106 : vector<1x256xi1>, vector<1x256xi32>
    %c1_i32_38 = arith.constant 1 : i32
    %119 = vector.broadcast %c1_i32_38 : i32 to vector<1x256xi32>
    %120 = arith.cmpi sge, %118, %119 : vector<1x256xi32>
    %c14_i32 = arith.constant 14 : i32
    %121 = vector.broadcast %c14_i32 : i32 to vector<1x256xi32>
    %122 = arith.cmpi sle, %118, %121 : vector<1x256xi32>
    %123 = vector.extract_strided_slice %101 {offsets = [0, 0], sizes = [8, 256], strides = [1, 1]} : vector<8x290xbf16> to vector<8x256xbf16>
    %cst_39 = arith.constant 0.000000e+00 : bf16
    %124 = vector.shape_cast %120 : vector<1x256xi1> to vector<1x256xi1>
    %125 = vector.broadcast %124 : vector<1x256xi1> to vector<8x256xi1>
    %126 = vector.broadcast %cst_39 : bf16 to vector<8x256xbf16>
    %127 = arith.select %125, %123, %126 : vector<8x256xi1>, vector<8x256xbf16>
    %128 = vector.extract_strided_slice %101 {offsets = [0, 1], sizes = [8, 256], strides = [1, 1]} : vector<8x290xbf16> to vector<8x256xbf16>
    %129 = vector.extract_strided_slice %101 {offsets = [0, 2], sizes = [8, 256], strides = [1, 1]} : vector<8x290xbf16> to vector<8x256xbf16>
    %cst_40 = arith.constant 0.000000e+00 : bf16
    %130 = vector.shape_cast %122 : vector<1x256xi1> to vector<1x256xi1>
    %131 = vector.broadcast %130 : vector<1x256xi1> to vector<8x256xi1>
    %132 = vector.broadcast %cst_40 : bf16 to vector<8x256xbf16>
    %133 = arith.select %131, %129, %132 : vector<8x256xi1>, vector<8x256xbf16>
    %134 = vector.extract_strided_slice %101 {offsets = [0, 16], sizes = [8, 256], strides = [1, 1]} : vector<8x290xbf16> to vector<8x256xbf16>
    %cst_41 = arith.constant 0.000000e+00 : bf16
    %135 = vector.shape_cast %120 : vector<1x256xi1> to vector<1x256xi1>
    %136 = vector.broadcast %135 : vector<1x256xi1> to vector<8x256xi1>
    %137 = vector.broadcast %cst_41 : bf16 to vector<8x256xbf16>
    %138 = arith.select %136, %134, %137 : vector<8x256xi1>, vector<8x256xbf16>
    %139 = vector.extract_strided_slice %101 {offsets = [0, 17], sizes = [8, 256], strides = [1, 1]} : vector<8x290xbf16> to vector<8x256xbf16>
    %140 = vector.extract_strided_slice %101 {offsets = [0, 18], sizes = [8, 256], strides = [1, 1]} : vector<8x290xbf16> to vector<8x256xbf16>
    %cst_42 = arith.constant 0.000000e+00 : bf16
    %141 = vector.shape_cast %122 : vector<1x256xi1> to vector<1x256xi1>
    %142 = vector.broadcast %141 : vector<1x256xi1> to vector<8x256xi1>
    %143 = vector.broadcast %cst_42 : bf16 to vector<8x256xbf16>
    %144 = arith.select %142, %140, %143 : vector<8x256xi1>, vector<8x256xbf16>
    %145 = vector.extract_strided_slice %101 {offsets = [0, 32], sizes = [8, 256], strides = [1, 1]} : vector<8x290xbf16> to vector<8x256xbf16>
    %cst_43 = arith.constant 0.000000e+00 : bf16
    %146 = vector.shape_cast %120 : vector<1x256xi1> to vector<1x256xi1>
    %147 = vector.broadcast %146 : vector<1x256xi1> to vector<8x256xi1>
    %148 = vector.broadcast %cst_43 : bf16 to vector<8x256xbf16>
    %149 = arith.select %147, %145, %148 : vector<8x256xi1>, vector<8x256xbf16>
    %150 = vector.extract_strided_slice %101 {offsets = [0, 33], sizes = [8, 256], strides = [1, 1]} : vector<8x290xbf16> to vector<8x256xbf16>
    %151 = vector.extract_strided_slice %101 {offsets = [0, 34], sizes = [8, 256], strides = [1, 1]} : vector<8x290xbf16> to vector<8x256xbf16>
    %cst_44 = arith.constant 0.000000e+00 : bf16
    %152 = vector.shape_cast %122 : vector<1x256xi1> to vector<1x256xi1>
    %153 = vector.broadcast %152 : vector<1x256xi1> to vector<8x256xi1>
    %154 = vector.broadcast %cst_44 : bf16 to vector<8x256xbf16>
    %155 = arith.select %153, %151, %154 : vector<8x256xi1>, vector<8x256xbf16>
    %156 = tpu.concatenate %127, %128, %133, %138, %139, %144, %149, %150, %155 in 0 : vector<8x256xbf16>, vector<8x256xbf16>, vector<8x256xbf16>, vector<8x256xbf16>, vector<8x256xbf16>, vector<8x256xbf16>, vector<8x256xbf16>, vector<8x256xbf16>, vector<8x256xbf16> -> vector<72x256xbf16>
    %c0_45 = arith.constant 0 : index
    %c0_46 = arith.constant 0 : index
    %157 = vector.load %arg4[%c0_45, %c0_46] : memref<16x72xbf16, #tpu.memory_space<vmem>>, vector<16x72xbf16>
    %cst_47 = arith.constant dense<0.000000e+00> : vector<16x256xf32>
    %158 = tpu.matmul %157, %156, %cst_47 {dimension_numbers = #tpu.dot_dimension_numbers<[1], [0], [0], [1], [0, 0, 1, 1], [], []>} : vector<16x72xbf16>, vector<72x256xbf16>, vector<16x256xf32> -> vector<16x256xf32>
    %c0_48 = arith.constant 0 : index
    %c0_49 = arith.constant 0 : index
    %159 = vector.load %arg5[%c0_48, %c0_49] : memref<16x1xf32, #tpu.memory_space<vmem>>, vector<16x1xf32>
    %160 = vector.broadcast %159 : vector<16x1xf32> to vector<16x256xf32>
    %161 = arith.addf %158, %160 : vector<16x256xf32>
    %162 = arith.truncf %161 : vector<16x256xf32> to vector<16x256xbf16>
    %c0_50 = arith.constant 0 : index
    %c0_51 = arith.constant 0 : index
    %c0_52 = arith.constant 0 : index
    %163 = vector.load %arg6[%c0_50, %c0_51, %c0_52] : memref<1x16x256xbf16, #tpu.memory_space<vmem>>, vector<1x16x256xbf16>
    %164 = vector.shape_cast %163 : vector<1x16x256xbf16> to vector<16x256xbf16>
    %165 = vector.shape_cast %162 : vector<16x256xbf16> to vector<1x16x256xbf16>
    tpu.vector_store %arg6[%c0_50, %c0_51, %c0_52], %165 {strides = array<i32>} : memref<1x16x256xbf16, #tpu.memory_space<vmem>>, vector<1x16x256xbf16>,
    return
  }
  func.func @transform_0(%arg0: i32) -> (i32, i32, i32) {
    %c0_i32 = arith.constant 0 : i32
    %c0_i32_0 = arith.constant 0 : i32
    %c0_i32_1 = arith.constant 0 : i32
    return %arg0, %c0_i32, %c0_i32_0 : i32, i32, i32
  }
  func.func @transform_1(%arg0: i32) -> (i32, i32) {
    %c0_i32 = arith.constant 0 : i32
    %c0_i32_0 = arith.constant 0 : i32
    %c0_i32_1 = arith.constant 0 : i32
    return %c0_i32, %c0_i32_0 : i32, i32
  }
  func.func @transform_2(%arg0: i32) -> (i32, i32) {
    %c0_i32 = arith.constant 0 : i32
    %c0_i32_0 = arith.constant 0 : i32
    %c0_i32_1 = arith.constant 0 : i32
    return %c0_i32, %c0_i32_0 : i32, i32
  }
  func.func @transform_3(%arg0: i32) -> (i32, i32) {
    %c0_i32 = arith.constant 0 : i32
    %c0_i32_0 = arith.constant 0 : i32
    %c0_i32_1 = arith.constant 0 : i32
    return %c0_i32, %c0_i32_0 : i32, i32
  }
  func.func @transform_4(%arg0: i32) -> (i32, i32) {
    %c0_i32 = arith.constant 0 : i32
    %c0_i32_0 = arith.constant 0 : i32
    %c0_i32_1 = arith.constant 0 : i32
    return %c0_i32, %c0_i32_0 : i32, i32
  }
  func.func @transform_5(%arg0: i32) -> (i32, i32, i32) {
    %c0_i32 = arith.constant 0 : i32
    %c0_i32_0 = arith.constant 0 : i32
    %c0_i32_1 = arith.constant 0 : i32
    return %arg0, %c0_i32, %c0_i32_0 : i32, i32, i32
  }
}

</mosaic_0001>

<bundles_post_ra>
// kernel: decoder_block_forward.5
= control target key start
LH: loop header
LB: loop body
LE: loop exit
PB: predicated region body
PF: predicated region fallthrough
CT: control target
= control target key end

     0   :  { %s1191_s27 = smov 0   ;;  %s1415_s0 = inlined_call_operand.vmem [shape: bf16[2,16,256], index: 0, kind: input, shape index: {}]   ;;  %s1416_s1 = inlined_call_operand.vmem [shape: f32[16,1], index: 1, kind: input, shape index: {}]   ;;  %s1417_s2 = inlined_call_operand.vmem [shape: f32[16,1], index: 2, kind: input, shape index: {}]   ;;  %s1418_s3 = inlined_call_operand.vmem [shape: bf16[16,144], index: 3, kind: input, shape index: {}]   ;;  %s1419_s4 = inlined_call_operand.vmem [shape: f32[16,1], index: 4, kind: input, shape index: {}]   ;;  %s1420_s5 = inlined_call_operand.vmem [shape: f32[2,8,256], index: 5, kind: input, shape index: {}]   ;;  %s1421_s6 = inlined_call_operand.vmem [shape: bf16[16,8], index: 6, kind: input, shape index: {}]   ;;  %s1422_s7 = inlined_call_operand.vmem [shape: f32[16,1], index: 7, kind: input, shape index: {}]   ;;  %s1423_s8 = inlined_call_operand.vmem [shape: bf16[2,16,256], index: 8, kind: output, shape index: {}]  }
   0x1 LB: > { %s1031_s28 = sadd.s32 4294967295, %s1129_s27   ;;  %p1035_p0 = scmp.ge.s32.totalorder %s1129_s27, 1  ;;  %s1129_s27 = sphi %s1191_s27, %s18_s27  }
   0x2   : > { %p272_p1 = scmp.lt.s32.totalorder %s1129_s27, 3 }
   0x4   : > { %p273_p2 = pnand %p1035_p0, %p272_p1 }
   0x5   : > { %p311_p3 = scmp.lt.s32.totalorder (!%p273_p2), %s1031_s28, 1  ;;  %vm370_vm0 = vcmask (!%p273_p2), 1047556   ;;  %vm335_vm1 = vcmask (!%p273_p2), 1043456   ;;  %v1131_v18 = vmov (!%p273_p2), 0   ;;  %s1132_s19 = smov (!%p273_p2), 16   ;;  %vm557_vm8 = vcmask (!%p273_p2), 138240  }
   0x6   : > { %276 = sbr.rel (%p273_p2) target bundleno = 912 (0x390), region = 52  ;;  %1094 = vset.pattern.permute.xlu1 (!%p273_p2), %v1131_v18  ;;  %1093 = vset.pattern.permute.xlu0 (!%p273_p2), %v1131_v18  ;;  %s1133_s20 = smov (!%p273_p2), 18   ;;  %vm635_vm11 = vcmask (!%p273_p2), 15360   ;;  %vm647_vm13 = vcmask (!%p273_p2), 130048  }
   0x7   : > { %919 = vmatprep.mubr.bf16.mxu0 (!%p273_p2), %v1131_v18  ;;  %s1134_s21 = smov (!%p273_p2), 2   ;;  %s1135_s22 = smov (!%p273_p2), 32  }
   0x8   : > { %s1136_s23 = smov (!%p273_p2), 34   ;;  %s1137_s24 = smov (!%p273_p2), 17  }
   0x9   : > { %s1138_s25 = smov (!%p273_p2), 127   ;;  %s1139_s26 = smov (!%p273_p2), 111  }
   0xa   : > { %s1141_s30 = smov (!%p273_p2), 126   ;;  %s1142_s9 = smov (!%p273_p2), 112  }
   0xb   : > { %s1144_s14 = smov (!%p273_p2), 96  }
   0xd   : > { %s1425_s28 = smov (!%p311_p3, %s1031_s28), 1 }
   0xe   : > { %s1199_s29 = sshll.u32 %s1425_s28, 4  ;;  %s1140_s28 = smov 95  }
   0xf   : > { %s315_s10 = scalar_lea.vmem %s1415_s0, %s1199_s29  ;;  %s320_s13 = scalar_lea.vmem %s1420_s5, %s1199_s29 }
  0x10   : > { %v329_v0 = vld [vmem:[%s315_s10] sm:$0xff]  ;;  %v330_v1 = vld [vmem:[%s315_s10 + $0x8] sm:$0xff]  ;;  %s1143_s10 = smov 110   ;;  %s325_s12 = scalar_lea.vmem %s1423_s8, %s1199_s29 }
  0x11   : > { %v1205_v2 = vunpack.c.l.bf16 %v329_v0  ;;  %v1207_v3 = vunpack.c.h.bf16 %v329_v0  ;;  %v1209_v4 = vunpack.c.l.bf16 %v330_v1  ;;  %v1211_v5 = vunpack.c.h.bf16 %v330_v1 }
  0x13   : > { %v371_v6 = vsel %vm370_vm0, %v1205_v2, 0.0  ;;  %v372_v7 = vsel %vm370_vm0, %v1207_v3, 0.0  ;;  %v336_v8 = vsel %vm335_vm1, %v1205_v2, 0.0  ;;  %v337_v9 = vsel %vm335_vm1, %v1207_v3, 0.0 }
  0x14   : > { %v373_v10 = vadd.f32 %v372_v7, %v371_v6  ;;  %v338_v11 = vadd.f32 %v337_v9, %v336_v8  ;;  %v445_v12 = vsel %vm370_vm0, %v1209_v4, 0.0  ;;  %v446_v13 = vsel %vm370_vm0, %v1211_v5, 0.0 }
  0x15   : > { %v411_v14 = vsel %vm335_vm1, %v1209_v4, 0.0  ;;  %v412_v15 = vsel %vm335_vm1, %v1211_v5, 0.0  ;;  %v447_v16 = vadd.f32 %v446_v13, %v445_v12 }
  0x16   : > { %374 = vadd.xlane.f32.xlu0 %v373_v10  ;;  %339 = vadd.xlane.f32.xlu1 %v338_v11  ;;  %v413_v17 = vadd.f32 %v412_v15, %v411_v14 }
  0x1a   : > { %448 = vadd.xlane.f32.xlu0 %v447_v16  ;;  %414 = vadd.xlane.f32.xlu1 %v413_v17 }
  0xa3   : > { %v375_v19 = vpop.xlane.xlu0 %374  ;;  %v340_v20 = vpop.xlane.xlu1 %339 }
  0xa4   : > { %v377_v21 = vrot.slane %v375_v19, 4  ;;  %v341_v22 = vsel %vm335_vm1, %v340_v20, 0.0 }
  0xa5   : > { %v342_v23 = vrot.slane %v341_v22, 4 }
  0xa6   : > { %v379_v24 = vsel %vm335_vm1, %v377_v21, 0.0 }
  0xa7   : > { %v380_v25 = vrot.slane %v379_v24, 4  ;;  %v343_v26 = vadd.f32 %v342_v23, %v341_v22  ;;  %v449_v27 = vpop.xlane.xlu0 %448  ;;  %v415_v28 = vpop.xlane.xlu1 %414  ;;  %v490_v22 = vld [vmem:[%s1416_s1 + $0x8] sm:$0xff]  ;;  %v489_v23 = vld [vmem:[%s1416_s1] sm:$0xff] }
  0xa8   : > { %v451_v29 = vrot.slane %v449_v27, 4  ;;  %v416_v30 = vsel %vm335_vm1, %v415_v28, 0.0 }
  0xa9   : > { %v381_v31 = vadd.f32 %v380_v25, %v379_v24  ;;  %v344_v32 = vrot.slane %v343_v26, 2  ;;  %v417_v33 = vrot.slane %v416_v30, 4  ;;  %v505_v24 = vld [vmem:[%s1417_s2] sm:$0xff]  ;;  %v506_v25 = vld [vmem:[%s1417_s2 + $0x8] sm:$0xff] }
  0xaa   : > { %v453_v34 = vsel %vm335_vm1, %v451_v29, 0.0 }
  0xab   : > { %v382_v35 = vrot.slane %v381_v31, 2  ;;  %v345_v36 = vadd.f32 %v344_v32, %v343_v26  ;;  %v454_v37 = vrot.slane %v453_v34, 4  ;;  %v418_v38 = vadd.f32 %v417_v33, %v416_v30 }
  0xac   : > { %v568_v26 = vlaneseq }
  0xad   : > { %v383_v39 = vadd.f32 %v382_v35, %v381_v31  ;;  %v346_v40 = vrot.slane %v345_v36, 1  ;;  %v455_v41 = vadd.f32 %v454_v37, %v453_v34  ;;  %v419_v42 = vrot.slane %v418_v38, 2 }
  0xae   : > { %v569_v27 = vand.u32 127, %v568_v26  ;;  %v606_v31 = vshrl.u32 %v568_v26, 7 }
  0xaf   : > { %v384_v43 = vrot.slane %v383_v39, 1  ;;  %v347_v44 = vadd.f32 %v346_v40, %v345_v36  ;;  %v456_v45 = vrot.slane %v455_v41, 2  ;;  %v420_v46 = vadd.f32 %v419_v42, %v418_v38 }
  0xb0   : > { %v570_v28 = vadd.s32 128, %v569_v27  ;;  %v575_v29 = vand.u32 15, %v569_v27  ;;  %v611_v32 = vsub.s32 4, %v606_v31  ;;  %v607_v35 = vsub.s32 0, %v606_v31 }
  0xb1   : > { %v385_v47 = vadd.f32 %v384_v43, %v383_v39  ;;  %v348_v48 = vmul.f32 0.0009765625, %v347_v44  ;;  %v457_v49 = vadd.f32 %v456_v45, %v455_v41  ;;  %v421_v50 = vrot.slane %v420_v46, 1 }
  0xb2   : > { %v582_v30 = vand.u32 15, %v570_v28  ;;  %vm595_vm2 = vcmp.ge.s32.totalorder %v575_v29, 1  ;;  %vm597_vm5 = vcmp.le.s32.totalorder %v575_v29, 14 }
  0xb3   : > { %v386_v51 = vmul.f32 0.0009765625, %v385_v47  ;;  %v458_v52 = vrot.slane %v457_v49, 1  ;;  %v422_v53 = vadd.f32 %v421_v50, %v420_v46  ;;  %v1237_v54 = vsub.f32 %v1205_v2, %v348_v48 }
  0xb4   : > { %v1240_v55 = vsub.f32 %v1207_v3, %v348_v48  ;;  %vm596_vm3 = vcmp.ge.s32.totalorder %v582_v30, 1  ;;  %vm598_vm6 = vcmp.le.s32.totalorder %v582_v30, 14 }
  0xb5   : > { %v459_v56 = vadd.f32 %v458_v52, %v457_v49  ;;  %v423_v57 = vmul.f32 0.0009765625, %v422_v53  ;;  %v1243_v58 = vsub.f32 %v1205_v2, %v386_v51  ;;  %v1246_v59 = vsub.f32 %v1207_v3, %v386_v51  ;;  %vm603_vm4 = vmpackc.low %vm596_vm3, %vm595_vm2 }
  0xb6   : > { %v351_v60 = vmul.f32 %v1237_v54, %v1237_v54  ;;  %v352_v61 = vmul.f32 %v1240_v55, %v1240_v55  ;;  %v604_v33 = vsel %vm603_vm4, 65537, %v1131_v18  ;;  %vm621_vm7 = vmpackc.low %vm598_vm6, %vm597_vm5  ;;  %vm659_vm3 = vcmask 146432  }
  0xb7   : > { %v460_v62 = vmul.f32 0.0009765625, %v459_v56  ;;  %v389_v63 = vmul.f32 %v1243_v58, %v1243_v58  ;;  %v390_v0 = vmul.f32 %v1246_v59, %v1246_v59  ;;  %v1257_v1 = vsub.f32 %v1209_v4, %v423_v57 }
  0xb8   : > { %v1260_v2 = vsub.f32 %v1211_v5, %v423_v57  ;;  %v353_v13 = vsel %vm335_vm1, %v351_v60, 0.0  ;;  %v354_v14 = vsel %vm335_vm1, %v352_v61, 0.0  ;;  %v1297_v34 = vrot.slane %v604_v33, %v611_v32 }
  0xb9   : > { %v391_v3 = vsel %vm370_vm0, %v389_v63, 0.0  ;;  %v392_v6 = vsel %vm370_vm0, %v390_v0, 0.0  ;;  %v426_v7 = vmul.f32 %v1257_v1, %v1257_v1  ;;  %v1269_v10 = vsub.f32 %v1209_v4, %v460_v62 }
  0xba   : > { %v393_v8 = vadd.f32 %v392_v6, %v391_v3  ;;  %v427_v9 = vmul.f32 %v1260_v2, %v1260_v2  ;;  %v1272_v11 = vsub.f32 %v1211_v5, %v460_v62  ;;  %v355_v19 = vadd.f32 %v354_v14, %v353_v13 }
  0xbb   : > { %v428_v12 = vsel %vm335_vm1, %v426_v7, 0.0  ;;  %v463_v16 = vmul.f32 %v1269_v10, %v1269_v10  ;;  %v622_v36 = vsel %vm621_vm7, 65537, %v1131_v18  ;;  %v1314_v18 = vrot.slane %v604_v33, %v607_v35 }
  0xbc   : > { %394 = vadd.xlane.f32.xlu0 %v393_v8  ;;  %v429_v15 = vsel %vm335_vm1, %v427_v9, 0.0  ;;  %v464_v17 = vmul.f32 %v1272_v11, %v1272_v11  ;;  %v1302_v37 = vrot.slane %v622_v36, %v611_v32  ;;  %v1304_v38 = vrot.slane %v622_v36, %v607_v35 }
  0xbd   : > { %v430_v4 = vadd.f32 %v429_v15, %v428_v12  ;;  %v465_v5 = vsel %vm370_vm0, %v463_v16, 0.0  ;;  %vm614_vm9 = vcmp.ne.s16.totalorder %v1297_v34, 0  ;;  %vm613_vm10 = vcmp.ne.s16.totalorder %v1314_v18, 0 }
  0xbe   : > { %v466_v20 = vsel %vm370_vm0, %v464_v17, 0.0  ;;  %vm671_vm5 = vcmask 261120  }
  0xbf   : > { %431 = vadd.xlane.f32.xlu1 %v430_v4  ;;  %v467_v21 = vadd.f32 %v466_v20, %v465_v5 }
  0xc0   : > { %356 = vadd.xlane.f32.xlu0 %v355_v19 }
  0xc3   : > { %468 = vadd.xlane.f32.xlu1 %v467_v21 }
  0xd4   : > { %498 = vperm.xlu1 %1094, %v490_v22  }
  0xd6   : > { %493 = vperm.xlu0 %1093, %v489_v23  }
  0xd8   : > { %509 = vperm.xlu1 %1094, %v505_v24  }
  0xda   : > { %645 = vrot.lane.b32.xlu0 %v1297_v34, %s1132_s19 }
  0xdc   : > { %514 = vperm.xlu1 %1094, %v506_v25  }
  0xde   : > { %657 = vrot.lane.b32.xlu0 %v1302_v37, %s1133_s20 }
  0xe0   : > { %631 = vrot.lane.b32.xlu1 %v1304_v38, %s1134_s21 }
  0xe2   : > { %669 = vrot.lane.b32.xlu0 %v1297_v34, %s1135_s22 }
  0xe6   : > { %681 = vrot.lane.b32.xlu0 %v1302_v37, %s1136_s23 }
 0x149   : > { %v395_v39 = vpop.xlane.xlu0 %394 }
 0x14a   : > { %v397_v40 = vrot.slane %v395_v39, 4 }
 0x14c   : > { %v399_v41 = vsel %vm335_vm1, %v397_v40, 0.0  ;;  %v432_v42 = vpop.xlane.xlu1 %431 }
 0x14d   : > { %v400_v43 = vrot.slane %v399_v41, 4  ;;  %v433_v44 = vsel %vm335_vm1, %v432_v42, 0.0  ;;  %v357_v45 = vpop.xlane.xlu0 %356 }
 0x14e   : > { %v434_v46 = vrot.slane %v433_v44, 4  ;;  %v358_v47 = vsel %vm335_vm1, %v357_v45, 0.0 }
 0x14f   : > { %v401_v48 = vadd.f32 %v400_v43, %v399_v41  ;;  %v359_v49 = vrot.slane %v358_v47, 4 }
 0x150   : > { %v435_v50 = vadd.f32 %v434_v46, %v433_v44  ;;  %v469_v51 = vpop.xlane.xlu1 %468 }
 0x151   : > { %v402_v52 = vrot.slane %v401_v48, 2  ;;  %v360_v53 = vadd.f32 %v359_v49, %v358_v47  ;;  %v471_v56 = vrot.slane %v469_v51, 4 }
 0x152   : > { %v436_v57 = vrot.slane %v435_v50, 2 }
 0x153   : > { %v403_v60 = vadd.f32 %v402_v52, %v401_v48  ;;  %v361_v61 = vrot.slane %v360_v53, 2  ;;  %v473_v62 = vsel %vm335_vm1, %v471_v56, 0.0 }
 0x154   : > { %v437_v63 = vadd.f32 %v436_v57, %v435_v50  ;;  %v474_v0 = vrot.slane %v473_v62, 4  ;;  %v499_v27 = vpop.permute.xlu1 %498 }
 0x155   : > { %v404_v3 = vrot.slane %v403_v60, 1  ;;  %v362_v6 = vadd.f32 %v361_v61, %v360_v53  ;;  %v494_v33 = vpop.permute.xlu0 %493 }
 0x156   : > { %v438_v7 = vrot.slane %v437_v63, 1  ;;  %v475_v8 = vadd.f32 %v474_v0, %v473_v62 }
 0x157   : > { %v405_v9 = vadd.f32 %v404_v3, %v403_v60  ;;  %v363_v12 = vrot.slane %v362_v6, 1 }
 0x158   : > { %v439_v13 = vadd.f32 %v438_v7, %v437_v63  ;;  %v476_v14 = vrot.slane %v475_v8, 2  ;;  %v510_v40 = vpop.permute.xlu1 %509 }
 0x159   : > { %v406_v15 = vmul.f32 0.0009765625, %v405_v9  ;;  %v364_v16 = vadd.f32 %v363_v12, %v362_v6 }
 0x15a   : > { %v440_v17 = vmul.f32 0.0009765625, %v439_v13  ;;  %v477_v4 = vadd.f32 %v476_v14, %v475_v8 }
 0x15b   : > { %v407_v19 = vadd.f32 1e-06, %v406_v15  ;;  %v365_v5 = vmul.f32 0.0009765625, %v364_v16 }
 0x15c   : > { %v478_v20 = vrot.slane %v477_v4, 1  ;;  %v441_v21 = vadd.f32 1e-06, %v440_v17  ;;  %v515_v52 = vpop.permute.xlu1 %514 }
 0x15d   : > { %1099 = vrsqrt.f32 %v407_v19  ;;  %v366_v22 = vadd.f32 1e-06, %v365_v5 }
 0x15e   : > { %v479_v23 = vadd.f32 %v478_v20, %v477_v4 }
 0x15f   : > { %1101 = vrsqrt.f32 %v366_v22 }
 0x160   : > { %v480_v24 = vmul.f32 0.0009765625, %v479_v23  ;;  %1103 = vrsqrt.f32 %v441_v21  ;;  %v632_v17 = vpop.permute.xlu1 %631  ;;  %v646_v23 = vpop.permute.xlu0 %645 }
 0x161   : > { %vm637_vm15 = vcmp.ne.s16.totalorder %v632_v17, 0  ;;  %vm651_vm0 = vcmp.ne.s16.totalorder %v646_v23, 0 }
 0x162   : > { %v481_v25 = vadd.f32 1e-06, %v480_v24 }
 0x164   : > { %1105 = vrsqrt.f32 %v481_v25 }
 0x167   : > { %v1100_v26 = vpop.eup %1099 }
 0x168   : > { %v409_v31 = vmul.f32 %v1100_v26, %v1243_v58  ;;  %v410_v32 = vmul.f32 %v1100_v26, %v1246_v59 }
 0x169   : > { %v1102_v28 = vpop.eup %1101 }
 0x16a   : > { %v368_v29 = vmul.f32 %v1102_v28, %v1237_v54  ;;  %v369_v30 = vmul.f32 %v1102_v28, %v1240_v55  ;;  %v1104_v35 = vpop.eup %1103  ;;  %v658_v28 = vpop.permute.xlu0 %657 }
 0x16b   : > { %v443_v44 = vmul.f32 %v1104_v35, %v1257_v1  ;;  %v444_v54 = vmul.f32 %v1104_v35, %v1260_v2  ;;  %vm663_vm6 = vcmp.ne.s16.totalorder %v658_v28, 0 }
 0x16c   : > { %v485_v36 = vsel %vm335_vm1, %v368_v29, %v409_v31  ;;  %v486_v39 = vsel %vm335_vm1, %v369_v30, %v410_v32 }
 0x16d   : > { %v501_v41 = vmul.f32 %v494_v33, %v485_v36  ;;  %v502_v42 = vmul.f32 %v494_v33, %v486_v39 }
 0x16e   : > { %v1106_v43 = vpop.eup %1105  ;;  %v670_v35 = vpop.permute.xlu0 %669 }
 0x16f   : > { %v483_v55 = vmul.f32 %v1106_v43, %v1269_v10  ;;  %v484_v58 = vmul.f32 %v1106_v43, %v1272_v11  ;;  %v517_v45 = vadd.f32 %v510_v40, %v501_v41  ;;  %v518_v59 = vadd.f32 %v510_v40, %v502_v42  ;;  %v869_v41 = vld [vmem:[%s320_s13 + $0x8] sm:$0xff]  ;;  %v868_v42 = vld [vmem:[%s320_s13] sm:$0xff] }
 0x171   : > { %v487_v46 = vsel %vm335_vm1, %v443_v44, %v483_v55  ;;  %v488_v47 = vsel %vm335_vm1, %v444_v54, %v484_v58  ;;  %v1042_v48 = vmul.f32 -1.442695, %v517_v45  ;;  %v1043_v51 = vmul.f32 -1.442695, %v518_v59 }
 0x172   : > { %v503_v49 = vmul.f32 %v499_v27, %v487_v46  ;;  %v504_v50 = vmul.f32 %v499_v27, %v488_v47  ;;  %v871_v44 = vpack.c.bf16 %v869_v41, %v869_v41  ;;  %v870_v54 = vpack.c.bf16 %v868_v42, %v868_v42  ;;  %v1097_v47 = vld [vmem:[%s1418_s3 + $0x4] ss:$8 sps:$4 sm:$0xff]  }
 0x173   : > { %1107 = vpow2.f32 %v1042_v48  ;;  %v1098_v48 = vld [vmem:[%s1421_s6] sm:$0xff]   ;;  %1049 = vmatprep.mubr.msk.bf16.mxu1 %vm647_vm13, %v1097_v47 }
 0x174   : > { %v519_v53 = vadd.f32 %v515_v52, %v503_v49  ;;  %v520_v1 = vadd.f32 %v515_v52, %v504_v50  ;;  %1109 = vpow2.f32 %v1043_v51  ;;  %1051 = vmatprep.subr.msk.bf16.mxu0 %vm335_vm1, %v871_v44 }
 0x176   : > { %v1044_v56 = vmul.f32 -1.442695, %v519_v53  ;;  %v1045_v2 = vmul.f32 -1.442695, %v520_v1 }
 0x178   : > { %1111 = vpow2.f32 %v1044_v56  ;;  %v799_v56 = vld [vmem:[%s1419_s4 + $0x8] sm:$0xff] }
 0x179   : > { %1113 = vpow2.f32 %v1045_v2  ;;  %v934_v2 = vld [vmem:[%s1422_s7] sm:$0xff] }
 0x17d   : > { %v1108_v10 = vpop.eup %1107 }
 0x17e   : > { %v533_v11 = vadd.f32 1.0, %v1108_v10  ;;  %v1110_v57 = vpop.eup %1109  ;;  %v935_v10 = vld [vmem:[%s1422_s7 + $0x8] sm:$0xff] }
 0x17f   : > { %v534_v63 = vadd.f32 1.0, %v1110_v57 }
 0x180   : > { %1115 = vrcp.f32 %v533_v11 }
 0x182   : > { %v1112_v60 = vpop.eup %1111 }
 0x183   : > { %v1114_v61 = vpop.eup %1113  ;;  %v535_v62 = vadd.f32 1.0, %v1112_v60 }
 0x184   : > { %v536_v0 = vadd.f32 1.0, %v1114_v61 }
 0x185   : > { %1117 = vrcp.f32 %v535_v62 }
 0x186   : > { %1119 = vrcp.f32 %v536_v0 }
 0x187   : > { %1121 = vrcp.f32 %v534_v63 }
 0x18a   : > { %v1116_v3 = vpop.eup %1115 }
 0x18b   : > { %v545_v9 = vmul.f32 %v1116_v3, %v517_v45  ;;  %v682_v45 = vpop.permute.xlu0 %681 }
 0x18f   : > { %v1118_v6 = vpop.eup %1117 }
 0x190   : > { %v1120_v7 = vpop.eup %1119  ;;  %v547_v8 = vmul.f32 %v1118_v6, %v519_v53 }
 0x191   : > { %v1122_v12 = vpop.eup %1121  ;;  %v548_v13 = vmul.f32 %v1120_v7, %v520_v1  ;;  %v798_v1 = vld [vmem:[%s1419_s4] sm:$0xff] }
 0x192   : > { %v549_v14 = vpack.c.bf16 %v547_v8, %v545_v9  ;;  %v546_v15 = vmul.f32 %v1122_v12, %v518_v59  ;;  %v882_v59 = vsel %vm335_vm1, %v870_v54, 0  ;;  %vm687_vm1 = vcmp.ne.s16.totalorder %v682_v45, 0 }
 0x193   : > { %888 = vmatpush1.bf16.msra.mxu0 %v882_v59 }
 0x194   : > { %553 = vrot.lane.b32.xlu1 %v549_v14, %s1137_s24  ;;  %v550_v16 = vpack.c.bf16 %v548_v13, %v546_v15 }
 0x198   : > { %555 = vrot.lane.b32.xlu1 %v550_v16, %s1137_s24 }
 0x19c   : > { %633 = vrot.lane.b32.xlu1 %v1302_v37, %s1134_s21 }
 0x1a0   : > { %643 = vrot.lane.b32.xlu1 %v1314_v18, %s1132_s19  ;;  %s1145_s19 = smov 94  }
 0x1a4   : > { %655 = vrot.lane.b32.xlu1 %v1304_v38, %s1133_s20 }
 0x1a8   : > { %667 = vrot.lane.b32.xlu1 %v1314_v18, %s1135_s22 }
 0x1ac   : > { %679 = vrot.lane.b32.xlu1 %v1304_v38, %s1136_s23 }
 0x206   : > { %v554_v4 = vpop.permute.xlu1 %553 }
 0x207   : > { %v1342_v19 = vsel %vm557_vm8, 0, %v554_v4 }
 0x208   : > { %v615_v38 = vsel %vm613_vm10, %v1342_v19, 0  ;;  %v640_v26 = vsel %vm637_vm15, %v1342_v19, 0  ;;  %vm683_vm10 = vcmask 277504  }
 0x20a   : > { %v556_v5 = vpop.permute.xlu1 %555 }
 0x20b   : > { %v1346_v37 = vsel %vm557_vm8, %v554_v4, %v556_v5  ;;  %v1348_v20 = vsel %vm557_vm8, %v556_v5, 0 }
 0x20c   : > { %697 = vrot.lane.b32.xlu0 %v1348_v20, %s1138_s25  ;;  %695 = vrot.lane.b32.xlu1 %v1346_v37, %s1138_s25  ;;  %v654_v29 = vsel %vm651_vm0, %v1348_v20, 0  ;;  %v666_v39 = vsel %vm663_vm6, %v1348_v20, 0  ;;  %v690_v52 = vsel %vm687_vm1, %v1348_v20, 0  ;;  %vm766_vm6 = vcmask 785408  }
 0x20d   : > { %1048 = vmatprep.subr.msk.bf16.mxu1 %vm614_vm9, %v1346_v37 }
 0x20e   : > { %824 = vmatpush1.bf16.msra.mxu1 %v615_v38  ;;  %v634_v21 = vpop.permute.xlu1 %633 }
 0x20f   : > { %v636_v34 = vsel %vm635_vm11, %v632_v17, %v634_v21  ;;  %vm639_vm14 = vcmp.ne.s16.totalorder %v634_v21, 0  ;;  %vm675_vm11 = vcmp.ne.s16.totalorder %v670_v35, 0 }
 0x210   : > { %734 = vrot.lane.b32.xlu0 %v1346_v37, %s1139_s26  ;;  %693 = vrot.lane.b32.xlu1 %v1342_v19, %s1138_s25  ;;  %vm638_vm12 = vcmp.ne.s16.totalorder %v636_v34, 0  ;;  %v642_v25 = vsel %vm639_vm14, %v1348_v20, 0  ;;  %vm877_vm14 = vcmask 64512   ;;  %v678_v49 = vsel %vm675_vm11, %v1348_v20, 0 }
 0x211   : > { %v641_v22 = vsel %vm638_vm12, %v1346_v37, 0  ;;  %1052 = vmatmul.mubr.msk.bf16.vlgmr.msra.gmra.mrb[0].mxu0 %vm877_vm14, %v1098_v48 }
 0x212   : > { %v644_v18 = vpop.permute.xlu1 %643 }
 0x213   : > { %v648_v24 = vsel %vm647_vm13, %v644_v18, %v646_v23  ;;  %vm649_vm4 = vcmp.ne.s16.totalorder %v644_v18, 0  ;;  %vm699_vm13 = vcmask 1039360  }
 0x214   : > { %732 = vrot.lane.b32.xlu0 %v1342_v19, %s1139_s26  ;;  %736 = vrot.lane.b32.xlu1 %v1348_v20, %s1139_s26  ;;  %vm650_vm2 = vcmp.ne.s16.totalorder %v648_v24, 0  ;;  %v652_v33 = vsel %vm649_vm4, %v1342_v19, 0  ;;  %vm738_vm4 = vcmask 908288  }
 0x215   : > { %v653_v30 = vsel %vm650_vm2, %v1346_v37, 0  ;;  %vm713_vm2 = vcmask 1031168  }
 0x216   : > { %v656_v27 = vpop.permute.xlu1 %655 }
 0x217   : > { %v660_v31 = vsel %vm659_vm3, %v656_v27, %v658_v28  ;;  %vm661_vm8 = vcmp.ne.s16.totalorder %v656_v27, 0  ;;  %vm727_vm3 = vcmask 916480  }
 0x218   : > { %773 = vrot.lane.b32.xlu1 %v1346_v37, %s1140_s28  ;;  %709 = vrot.lane.b32.xlu0 %v641_v22, %s1141_s30  ;;  %vm662_vm7 = vcmp.ne.s16.totalorder %v660_v31, 0  ;;  %v664_v55 = vsel %vm661_vm8, %v1342_v19, 0  ;;  %vm791_vm8 = vcmask 769024  }
 0x219   : > { %v665_v40 = vsel %vm662_vm7, %v1346_v37, 0  ;;  %vm777_vm7 = vcmask 777216  }
 0x21a   : > { %v668_v32 = vpop.permute.xlu1 %667 }
 0x21b   : > { %v672_v36 = vsel %vm671_vm5, %v668_v32, %v670_v35  ;;  %vm673_vm12 = vcmp.ne.s16.totalorder %v668_v32, 0  ;;  %vm752_vm5 = vcmask 900096  }
 0x21c   : > { %711 = vrot.lane.b32.xlu1 %v642_v25, %s1141_s30  ;;  %707 = vrot.lane.b32.xlu0 %v640_v26, %s1141_s30  ;;  %vm674_vm9 = vcmp.ne.s16.totalorder %v672_v36, 0  ;;  %v676_v50 = vsel %vm673_vm12, %v1342_v19, 0  ;;  %v1095_v36 = vld [vmem:[%s1418_s3] ss:$8 sps:$4 sm:$0xff]  }
 0x21d   : > { %v677_v58 = vsel %vm674_vm9, %v1346_v37, 0 }
 0x21e   : > { %v680_v43 = vpop.permute.xlu1 %679 }
 0x21f   : > { %v684_v46 = vsel %vm683_vm10, %v680_v43, %v682_v45  ;;  %vm685_vm0 = vcmp.ne.s16.totalorder %v680_v43, 0 }
 0x220   : > { %725 = vrot.lane.b32.xlu0 %v654_v29, %s1142_s9  ;;  %723 = vrot.lane.b32.xlu1 %v653_v30, %s1142_s9  ;;  %vm686_vm15 = vcmp.ne.s16.totalorder %v684_v46, 0  ;;  %v688_v53 = vsel %vm685_vm0, %v1342_v19, 0 }
 0x221   : > { %v689_v51 = vsel %vm686_vm15, %v1346_v37, 0 }
 0x224   : > { %775 = vrot.lane.b32.xlu0 %v1348_v20, %s1140_s28  ;;  %721 = vrot.lane.b32.xlu1 %v652_v33, %s1142_s9 }
 0x228   : > { %750 = vrot.lane.b32.xlu0 %v666_v39, %s1143_s10  ;;  %748 = vrot.lane.b32.xlu1 %v665_v40, %s1143_s10 }
 0x22c   : > { %746 = vrot.lane.b32.xlu1 %v664_v55, %s1143_s10  ;;  %762 = vrot.lane.b32.xlu0 %v677_v58, %s1144_s14 }
 0x230   : > { %764 = vrot.lane.b32.xlu1 %v678_v49, %s1144_s14  ;;  %760 = vrot.lane.b32.xlu0 %v676_v50, %s1144_s14 }
 0x234   : > { %771 = vrot.lane.b32.xlu1 %v1342_v19, %s1140_s28  ;;  %787 = vrot.lane.b32.xlu0 %v689_v51, %s1145_s19 }
 0x238   : > { %789 = vrot.lane.b32.xlu1 %v690_v52, %s1145_s19  ;;  %785 = vrot.lane.b32.xlu0 %v688_v53, %s1145_s19 }
 0x23c   : > { %802 = vperm.xlu1 %1094, %v798_v1   ;;  %807 = vperm.xlu0 %1093, %v799_v56  }
 0x240   : > { %938 = vperm.xlu1 %1094, %v934_v2   ;;  %943 = vperm.xlu0 %1093, %v935_v10  }
 0x27e   : > { %v698_v11 = vpop.permute.xlu0 %697  ;;  %v696_v57 = vpop.permute.xlu1 %695 }
 0x27f   : > { %v701_v60 = vsel %vm699_vm13, %v696_v57, %v698_v11 }
 0x280   : > { %825 = vmatprep.subr.bf16.mxu1 %v701_v60 }
 0x282   : > { %v735_v61 = vpop.permute.xlu0 %734  ;;  %v694_v62 = vpop.permute.xlu1 %693 }
 0x283   : > { %v700_v63 = vsel %vm699_vm13, %v694_v62, %v696_v57 }
 0x284   : > { %826 = vmatpush1.bf16.msra.mxu1 %v700_v63 }
 0x286   : > { %v733_v0 = vpop.permute.xlu0 %732  ;;  %v737_v3 = vpop.permute.xlu1 %736 }
 0x287   : > { %v740_v5 = vsel %vm738_vm4, %v735_v61, %v737_v3  ;;  %v739_v38 = vsel %vm738_vm4, %v733_v0, %v735_v61 }
 0x28a   : > { %v710_v6 = vpop.permute.xlu0 %709  ;;  %v774_v7 = vpop.permute.xlu1 %773 }
 0x28e   : > { %v708_v8 = vpop.permute.xlu0 %707  ;;  %v712_v9 = vpop.permute.xlu1 %711 }
 0x28f   : > { %v715_v12 = vsel %vm713_vm2, %v710_v6, %v712_v9  ;;  %v714_v13 = vsel %vm713_vm2, %v708_v8, %v710_v6 }
 0x290   : > { %827 = vmatprep.subr.bf16.mxu1 %v715_v12 }
 0x291   : > { %828 = vmatpush1.bf16.msra.mxu1 %v714_v13 }
 0x292   : > { %v726_v14 = vpop.permute.xlu0 %725  ;;  %v724_v15 = vpop.permute.xlu1 %723 }
 0x293   : > { %v729_v16 = vsel %vm727_vm3, %v724_v15, %v726_v14 }
 0x294   : > { %829 = vmatprep.subr.bf16.mxu1 %v729_v16 }
 0x296   : > { %v776_v17 = vpop.permute.xlu0 %775  ;;  %v722_v4 = vpop.permute.xlu1 %721 }
 0x297   : > { %v728_v19 = vsel %vm727_vm3, %v722_v4, %v724_v15  ;;  %v779_v27 = vsel %vm777_vm7, %v774_v7, %v776_v17 }
 0x298   : > { %830 = vmatpush1.bf16.msra.mxu1 %v728_v19 }
 0x299   : > { %831 = vmatprep.subr.bf16.mxu1 %v740_v5 }
 0x29a   : > { %v751_v37 = vpop.permute.xlu0 %750  ;;  %v749_v20 = vpop.permute.xlu1 %748 }
 0x29b   : > { %v754_v21 = vsel %vm752_vm5, %v749_v20, %v751_v37 }
 0x29c   : > { %832 = vmatpush1.bf16.msra.mxu1 %v739_v38 }
 0x29d   : > { %833 = vmatprep.subr.bf16.mxu1 %v754_v21 }
 0x29e   : > { %v763_v34 = vpop.permute.xlu0 %762  ;;  %v747_v18 = vpop.permute.xlu1 %746 }
 0x29f   : > { %v753_v22 = vsel %vm752_vm5, %v747_v18, %v749_v20 }
 0x2a0   : > { %834 = vmatpush1.bf16.msra.mxu1 %v753_v22 }
 0x2a2   : > { %v761_v23 = vpop.permute.xlu0 %760  ;;  %v765_v24 = vpop.permute.xlu1 %764 }
 0x2a3   : > { %v768_v25 = vsel %vm766_vm6, %v763_v34, %v765_v24  ;;  %v767_v26 = vsel %vm766_vm6, %v761_v23, %v763_v34 }
 0x2a4   : > { %835 = vmatprep.subr.bf16.mxu1 %v768_v25 }
 0x2a5   : > { %836 = vmatpush1.bf16.msra.mxu1 %v767_v26 }
 0x2a6   : > { %v788_v28 = vpop.permute.xlu0 %787  ;;  %837 = vmatprep.subr.bf16.mxu1 %v779_v27  ;;  %v772_v29 = vpop.permute.xlu1 %771 }
 0x2a7   : > { %v778_v30 = vsel %vm777_vm7, %v772_v29, %v774_v7 }
 0x2a9   : > { %838 = vmatpush1.bf16.msra.mxu1 %v778_v30 }
 0x2aa   : > { %v786_v31 = vpop.permute.xlu0 %785  ;;  %v790_v32 = vpop.permute.xlu1 %789 }
 0x2ab   : > { %v793_v33 = vsel %vm791_vm8, %v788_v28, %v790_v32  ;;  %v792_v35 = vsel %vm791_vm8, %v786_v31, %v788_v28 }
 0x2ac   : > { %839 = vmatprep.subr.bf16.mxu1 %v793_v33 }
 0x2ad   : > { %840 = vmatpush1.bf16.msra.mxu1 %v792_v35 }
 0x2b0   : > { %856 = vmatmul.mubr.bf16.vlgmr.msra.gmra.mrb[0].mxu1 %v1095_v36 }
 0x2bb   : > { %v803_v43 = vpop.permute.xlu1 %802  ;;  %v808_v44 = vpop.permute.xlu0 %807 }
 0x2bf   : > { %v939_v49 = vpop.permute.xlu1 %938  ;;  %v944_v1 = vpop.permute.xlu0 %943 }
 0x2e4   : > { %v921_v39 = vpop.f32.mrb[0].mxu0 }
 0x2e5   : > { %v923_v40 = vpop.f32.mrb[1].mxu0 }
 0x2e6   : > { %v925_v41 = vpop.f32.mrb[2].mxu0 }
 0x2e7   : > { %v927_v42 = vpop.f32.mrb[3].mxu0 }
 0x383   : > { %v857_v54 = vpop.f32.mrb[0].mxu1 }
 0x384   : > { %v858_v55 = vadd.f32 %v857_v54, %v803_v43  ;;  %v859_v58 = vpop.f32.mrb[1].mxu1 }
 0x385   : > { %v860_v45 = vadd.f32 %v859_v58, %v803_v43  ;;  %v861_v59 = vpop.f32.mrb[2].mxu1 }
 0x386   : > { %v930_v46 = vadd.f32 %v921_v39, %v858_v55  ;;  %v862_v47 = vadd.f32 %v861_v59, %v808_v44  ;;  %v863_v48 = vpop.f32.mrb[3].mxu1 }
 0x387   : > { %v931_v50 = vadd.f32 %v923_v40, %v860_v45  ;;  %v864_v51 = vadd.f32 %v863_v48, %v808_v44 }
 0x388   : > { %v946_v52 = vadd.f32 %v939_v49, %v930_v46  ;;  %v932_v53 = vadd.f32 %v925_v41, %v862_v47 }
 0x389   : > { %v947_v56 = vadd.f32 %v939_v49, %v931_v50  ;;  %v933_v2 = vadd.f32 %v927_v42, %v864_v51 }
 0x38a   : > { %v948_v10 = vadd.f32 %v944_v1, %v932_v53 }
 0x38b   : > { %v1060_v11 = vpack.c.bf16 %v947_v56, %v946_v52  ;;  %v949_v57 = vadd.f32 %v944_v1, %v933_v2 }
 0x38d   : > { %962 = vst [vmem:[%s325_s12] sm:$0xff] %v1060_v11  ;;  %v1061_v60 = vpack.c.bf16 %v949_v57, %v948_v10 }
 0x38f   : > { %963 = vst [vmem:[%s325_s12 + $0x8] sm:$0xff] %v1061_v60 }
 0x390 PF: > { %s18_s27 = sadd.s32 1, %s1129_s27  }
 0x391   : > { %p15_p4 = scmp.ge.s32.totalorder %s18_s27, 4  }
 0x393   :  { %17 = sbr.rel (!%p15_p4) target bundleno = 1 (0x1), region = 85 }

// kernel: decoder_block_forward.4
= control target key start
LH: loop header
LB: loop body
LE: loop exit
PB: predicated region body
PF: predicated region fallthrough
CT: control target
= control target key end

     0   :  { %s956_s18 = smov 0   ;;  %s1169_s0 = inlined_call_operand.vmem [shape: f32[2,8,256], index: 0, kind: input, shape index: {}]   ;;  %s1170_s1 = inlined_call_operand.vmem [shape: f32[8,1], index: 1, kind: input, shape index: {}]   ;;  %s1171_s2 = inlined_call_operand.vmem [shape: f32[8,1], index: 2, kind: input, shape index: {}]   ;;  %s1172_s3 = inlined_call_operand.vmem [shape: bf16[16,72], index: 3, kind: input, shape index: {}]   ;;  %s1173_s4 = inlined_call_operand.vmem [shape: f32[16,1], index: 4, kind: input, shape index: {}]   ;;  %s1174_s5 = inlined_call_operand.vmem [shape: bf16[2,16,256], index: 5, kind: output, shape index: {}]  }
   0x1 LB: > { %s839_s19 = sadd.s32 4294967295, %s909_s18   ;;  %p843_p0 = scmp.ge.s32.totalorder %s909_s18, 1  ;;  %s909_s18 = sphi %s956_s18, %s15_s18  }
   0x2   : > { %p187_p1 = scmp.lt.s32.totalorder %s909_s18, 3 }
   0x4   : > { %p188_p2 = pnand %p843_p0, %p187_p1 }
   0x5   : > { %p215_p3 = scmp.lt.s32.totalorder (!%p188_p2), %s839_s19, 1  ;;  %vm347_vm0 = vcmask (!%p188_p2), 1047558   ;;  %vm265_vm1 = vcmask (!%p188_p2), 1043458   ;;  %vm306_vm2 = vcmask (!%p188_p2), 1045508   ;;  %vm230_vm3 = vcmask (!%p188_p2), 1041408   ;;  %s912_s28 = smov (!%p188_p2), 16  }
   0x6   : > { %191 = sbr.rel (%p188_p2) target bundleno = 908 (0x38c), region = 40  ;;  %v911_v14 = vmov (!%p188_p2), 0   ;;  %s913_s29 = smov (!%p188_p2), 2   ;;  %vm390_vm10 = vcmask (!%p188_p2), 1043456   ;;  %vm393_vm11 = vcmask (!%p188_p2), 1045504   ;;  %vm434_vm12 = vcmask (!%p188_p2), 138240  }
   0x7   : > { %884 = vset.pattern.permute.xlu0 (!%p188_p2), %v911_v14  ;;  %885 = vset.pattern.permute.xlu1 (!%p188_p2), %v911_v14  ;;  %s914_s30 = smov (!%p188_p2), 18   ;;  %s915_s6 = smov (!%p188_p2), 32   ;;  %vm512_vm13 = vcmask (!%p188_p2), 15360  }
   0x8   : > { %759 = vmatprep.mubr.bf16.mxu0 (!%p188_p2), %v911_v14  ;;  %s916_s7 = smov (!%p188_p2), 34   ;;  %s917_s8 = smov (!%p188_p2), 17  }
   0x9   : > { %s918_s9 = smov (!%p188_p2), 111   ;;  %s919_s10 = smov (!%p188_p2), 126  }
   0xa   : > { %s920_s11 = smov (!%p188_p2), 96   ;;  %s921_s12 = smov (!%p188_p2), 127  }
   0xb   : > { %s922_s13 = smov (!%p188_p2), 95   ;;  %s923_s14 = smov (!%p188_p2), 112  }
   0xc   : > { %s924_s15 = smov (!%p188_p2), 110   ;;  %s925_s16 = smov (!%p188_p2), 94  }
   0xd   : > { %s1176_s19 = smov (!%p215_p3, %s839_s19), 1 }
   0xe   : > { %s857_s20 = sshll.u32 %s1176_s19, 4 }
   0xf   : > { %s219_s23 = scalar_lea.vmem %s1169_s0, %s857_s20 }
  0x10   : > { %v972_v0 = vld [vmem:[%s219_s23] sm:$0xff]  ;;  %v974_v1 = vld [vmem:[%s219_s23 + $0x8] sm:$0xff] }
  0x11   : > { %v348_v2 = vsel %vm347_vm0, %v972_v0, 0.0  ;;  %v349_v3 = vsel %vm347_vm0, %v974_v1, 0.0  ;;  %v266_v4 = vsel %vm265_vm1, %v972_v0, 0.0  ;;  %v267_v5 = vsel %vm265_vm1, %v974_v1, 0.0 }
  0x12   : > { %v350_v6 = vadd.f32 %v349_v3, %v348_v2  ;;  %v268_v7 = vadd.f32 %v267_v5, %v266_v4  ;;  %v307_v8 = vsel %vm306_vm2, %v972_v0, 0.0  ;;  %v308_v9 = vsel %vm306_vm2, %v974_v1, 0.0 }
  0x13   : > { %v231_v10 = vsel %vm230_vm3, %v972_v0, 0.0  ;;  %v232_v11 = vsel %vm230_vm3, %v974_v1, 0.0  ;;  %v309_v12 = vadd.f32 %v308_v9, %v307_v8 }
  0x14   : > { %351 = vadd.xlane.f32.xlu1 %v350_v6  ;;  %269 = vadd.xlane.f32.xlu0 %v268_v7  ;;  %v233_v13 = vadd.f32 %v232_v11, %v231_v10 }
  0x18   : > { %310 = vadd.xlane.f32.xlu0 %v309_v12  ;;  %234 = vadd.xlane.f32.xlu1 %v233_v13 }
  0xa1   : > { %v352_v15 = vpop.xlane.xlu1 %351  ;;  %v270_v16 = vpop.xlane.xlu0 %269 }
  0xa2   : > { %v354_v17 = vrot.slane %v352_v15, 6  ;;  %v272_v18 = vrot.slane %v270_v16, 2 }
  0xa4   : > { %v356_v19 = vsel %vm230_vm3, %v354_v17, 0.0  ;;  %v274_v20 = vsel %vm230_vm3, %v272_v18, 0.0 }
  0xa5   : > { %v357_v21 = vrot.slane %v356_v19, 4  ;;  %v275_v22 = vrot.slane %v274_v20, 4  ;;  %v311_v23 = vpop.xlane.xlu0 %310  ;;  %v235_v24 = vpop.xlane.xlu1 %234 }
  0xa6   : > { %v313_v25 = vrot.slane %v311_v23, 4  ;;  %v236_v26 = vsel %vm230_vm3, %v235_v24, 0.0 }
  0xa7   : > { %v358_v27 = vadd.f32 %v357_v21, %v356_v19  ;;  %v276_v28 = vadd.f32 %v275_v22, %v274_v20  ;;  %v237_v29 = vrot.slane %v236_v26, 4  ;;  %v404_v19 = vld [vmem:[%s1171_s2] sm:$0xff]  ;;  %v445_v21 = vlaneseq }
  0xa8   : > { %v315_v30 = vsel %vm230_vm3, %v313_v25, 0.0  ;;  %v396_v20 = vld [vmem:[%s1170_s1] sm:$0xff] }
  0xa9   : > { %v359_v31 = vrot.slane %v358_v27, 2  ;;  %v277_v32 = vrot.slane %v276_v28, 2  ;;  %v316_v33 = vrot.slane %v315_v30, 4  ;;  %v238_v34 = vadd.f32 %v237_v29, %v236_v26 }
  0xaa   : > { %v446_v22 = vand.u32 127, %v445_v21  ;;  %v483_v26 = vshrl.u32 %v445_v21, 7 }
  0xab   : > { %v360_v35 = vadd.f32 %v359_v31, %v358_v27  ;;  %v278_v36 = vadd.f32 %v277_v32, %v276_v28  ;;  %v317_v37 = vadd.f32 %v316_v33, %v315_v30  ;;  %v239_v38 = vrot.slane %v238_v34, 2 }
  0xac   : > { %v447_v23 = vadd.s32 128, %v446_v22  ;;  %v452_v24 = vand.u32 15, %v446_v22  ;;  %v484_v27 = vsub.s32 0, %v483_v26  ;;  %v488_v30 = vsub.s32 4, %v483_v26 }
  0xad   : > { %v361_v39 = vrot.slane %v360_v35, 1  ;;  %v279_v40 = vrot.slane %v278_v36, 1  ;;  %v318_v41 = vrot.slane %v317_v37, 2  ;;  %v240_v42 = vadd.f32 %v239_v38, %v238_v34 }
  0xae   : > { %v459_v25 = vand.u32 15, %v447_v23  ;;  %vm472_vm4 = vcmp.ge.s32.totalorder %v452_v24, 1  ;;  %vm474_vm7 = vcmp.le.s32.totalorder %v452_v24, 14 }
  0xaf   : > { %v362_v43 = vadd.f32 %v361_v39, %v360_v35  ;;  %v280_v44 = vadd.f32 %v279_v40, %v278_v36  ;;  %v319_v45 = vadd.f32 %v318_v41, %v317_v37  ;;  %v241_v46 = vrot.slane %v240_v42, 1 }
  0xb0   : > { %vm473_vm5 = vcmp.ge.s32.totalorder %v459_v25, 1  ;;  %vm475_vm8 = vcmp.le.s32.totalorder %v459_v25, 14 }
  0xb1   : > { %v363_v47 = vmul.f32 0.001953125, %v362_v43  ;;  %v281_v48 = vmul.f32 0.001953125, %v280_v44  ;;  %v320_v49 = vrot.slane %v319_v45, 1  ;;  %v242_v50 = vadd.f32 %v241_v46, %v240_v42  ;;  %vm480_vm6 = vmpackc.low %vm473_vm5, %vm472_vm4 }
  0xb2   : > { %v481_v28 = vsel %vm480_vm6, 65537, %v911_v14  ;;  %vm498_vm9 = vmpackc.low %vm475_vm8, %vm474_vm7  ;;  %vm524_vm4 = vcmask 130048   ;;  %vm536_vm5 = vcmask 146432  }
  0xb3   : > { %v321_v51 = vadd.f32 %v320_v49, %v319_v45  ;;  %v243_v52 = vmul.f32 0.001953125, %v242_v50  ;;  %v1000_v53 = vsub.f32 %v972_v0, %v281_v48  ;;  %v1003_v54 = vsub.f32 %v974_v1, %v281_v48 }
  0xb4   : > { %v1006_v55 = vsub.f32 %v972_v0, %v363_v47  ;;  %v1009_v56 = vsub.f32 %v974_v1, %v363_v47  ;;  %v1054_v29 = vrot.slane %v481_v28, %v484_v27  ;;  %v1057_v31 = vrot.slane %v481_v28, %v488_v30 }
  0xb5   : > { %v322_v57 = vmul.f32 0.001953125, %v321_v51  ;;  %v284_v58 = vmul.f32 %v1000_v53, %v1000_v53  ;;  %v285_v59 = vmul.f32 %v1003_v54, %v1003_v54  ;;  %v1016_v60 = vsub.f32 %v972_v0, %v243_v52 }
  0xb6   : > { %v1019_v61 = vsub.f32 %v974_v1, %v243_v52  ;;  %v499_v32 = vsel %vm498_vm9, 65537, %v911_v14 }
  0xb7   : > { %v286_v62 = vsel %vm265_vm1, %v284_v58, 0.0  ;;  %v287_v63 = vsel %vm265_vm1, %v285_v59, 0.0  ;;  %v1024_v2 = vsub.f32 %v972_v0, %v322_v57  ;;  %v1027_v3 = vsub.f32 %v974_v1, %v322_v57 }
  0xb8   : > { %v288_v4 = vadd.f32 %v287_v63, %v286_v62  ;;  %v246_v5 = vmul.f32 %v1016_v60, %v1016_v60  ;;  %v247_v6 = vmul.f32 %v1019_v61, %v1019_v61  ;;  %v366_v0 = vmul.f32 %v1006_v55, %v1006_v55 }
  0xb9   : > { %v325_v7 = vmul.f32 %v1024_v2, %v1024_v2  ;;  %v326_v8 = vmul.f32 %v1027_v3, %v1027_v3  ;;  %v367_v1 = vmul.f32 %v1009_v56, %v1009_v56  ;;  %v1061_v33 = vrot.slane %v499_v32, %v484_v27 }
  0xba   : > { %289 = vadd.xlane.f32.xlu0 %v288_v4  ;;  %v248_v9 = vsel %vm230_vm3, %v246_v5, 0.0  ;;  %v249_v10 = vsel %vm230_vm3, %v247_v6, 0.0  ;;  %v368_v16 = vsel %vm347_vm0, %v366_v0, 0.0  ;;  %v1063_v34 = vrot.slane %v499_v32, %v488_v30 }
  0xbb   : > { %v327_v11 = vsel %vm306_vm2, %v325_v7, 0.0  ;;  %v328_v12 = vsel %vm306_vm2, %v326_v8, 0.0  ;;  %v250_v15 = vadd.f32 %v249_v10, %v248_v9  ;;  %v369_v17 = vsel %vm347_vm0, %v367_v1, 0.0 }
  0xbc   : > { %v329_v13 = vadd.f32 %v328_v12, %v327_v11  ;;  %v370_v18 = vadd.f32 %v369_v17, %v368_v16  ;;  %vm548_vm1 = vcmask 261120  }
  0xbe   : > { %330 = vadd.xlane.f32.xlu1 %v329_v13  ;;  %251 = vadd.xlane.f32.xlu0 %v250_v15 }
  0xc2   : > { %371 = vadd.xlane.f32.xlu1 %v370_v18 }
  0xd3   : > { %407 = vperm.xlu1 %885, %v404_v19  }
  0xd4   : > { %399 = vperm.xlu0 %884, %v396_v20  }
  0xd7   : > { %520 = vrot.lane.b32.xlu1 %v1054_v29, %s912_s28 }
  0xd8   : > { %534 = vrot.lane.b32.xlu0 %v1063_v34, %s914_s30 }
  0xdb   : > { %522 = vrot.lane.b32.xlu1 %v1057_v31, %s912_s28  ;;  %s224_s28 = scalar_lea.vmem %s1174_s5, %s857_s20 }
  0xdc   : > { %546 = vrot.lane.b32.xlu0 %v1057_v31, %s915_s6 }
  0xdf   : > { %508 = vrot.lane.b32.xlu1 %v1061_v33, %s913_s29 }
  0xe0   : > { %558 = vrot.lane.b32.xlu0 %v1063_v34, %s916_s7 }
 0x147   : > { %v290_v14 = vpop.xlane.xlu0 %289 }
 0x148   : > { %v292_v35 = vrot.slane %v290_v14, 2 }
 0x14a   : > { %v294_v36 = vsel %vm230_vm3, %v292_v35, 0.0 }
 0x14b   : > { %v295_v37 = vrot.slane %v294_v36, 4  ;;  %v252_v38 = vpop.xlane.xlu0 %251  ;;  %v331_v39 = vpop.xlane.xlu1 %330 }
 0x14c   : > { %v253_v40 = vsel %vm230_vm3, %v252_v38, 0.0  ;;  %v333_v41 = vrot.slane %v331_v39, 4 }
 0x14d   : > { %v296_v42 = vadd.f32 %v295_v37, %v294_v36  ;;  %v254_v43 = vrot.slane %v253_v40, 4 }
 0x14e   : > { %v335_v44 = vsel %vm230_vm3, %v333_v41, 0.0 }
 0x14f   : > { %v297_v45 = vrot.slane %v296_v42, 2  ;;  %v255_v46 = vadd.f32 %v254_v43, %v253_v40  ;;  %v336_v47 = vrot.slane %v335_v44, 4  ;;  %v372_v48 = vpop.xlane.xlu1 %371 }
 0x150   : > { %v374_v49 = vrot.slane %v372_v48, 6 }
 0x151   : > { %v298_v50 = vadd.f32 %v297_v45, %v296_v42  ;;  %v256_v51 = vrot.slane %v255_v46, 2  ;;  %v337_v52 = vadd.f32 %v336_v47, %v335_v44 }
 0x152   : > { %v376_v57 = vsel %vm230_vm3, %v374_v49, 0.0 }
 0x153   : > { %v299_v58 = vrot.slane %v298_v50, 1  ;;  %v257_v59 = vadd.f32 %v256_v51, %v255_v46  ;;  %v338_v62 = vrot.slane %v337_v52, 2  ;;  %v377_v63 = vrot.slane %v376_v57, 4  ;;  %v400_v37 = vpop.permute.xlu0 %399  ;;  %v408_v39 = vpop.permute.xlu1 %407 }
 0x155   : > { %v300_v4 = vadd.f32 %v299_v58, %v298_v50  ;;  %v258_v5 = vrot.slane %v257_v59, 1  ;;  %v339_v6 = vadd.f32 %v338_v62, %v337_v52  ;;  %v378_v7 = vadd.f32 %v377_v63, %v376_v57 }
 0x157   : > { %v301_v8 = vmul.f32 0.001953125, %v300_v4  ;;  %v259_v0 = vadd.f32 %v258_v5, %v257_v59  ;;  %v340_v1 = vrot.slane %v339_v6, 1  ;;  %v379_v9 = vrot.slane %v378_v7, 2  ;;  %v521_v57 = vpop.permute.xlu1 %520  ;;  %v1097_v63 = vpop.permute.xlu0 %534 }
 0x158   : > { %vm526_vm8 = vcmp.ne.s16.totalorder %v521_v57, 0 }
 0x159   : > { %v302_v10 = vadd.f32 1e-06, %v301_v8  ;;  %v260_v11 = vmul.f32 0.001953125, %v259_v0  ;;  %v341_v12 = vadd.f32 %v340_v1, %v339_v6  ;;  %v380_v13 = vadd.f32 %v379_v9, %v378_v7 }
 0x15b   : > { %v261_v15 = vadd.f32 1e-06, %v260_v11  ;;  %v342_v16 = vmul.f32 0.001953125, %v341_v12  ;;  %v381_v17 = vrot.slane %v380_v13, 1  ;;  %887 = vrsqrt.f32 %v302_v10  ;;  %v523_v58 = vpop.permute.xlu1 %522  ;;  %v547_v8 = vpop.permute.xlu0 %546 }
 0x15c   : > { %vm552_vm0 = vcmp.ne.s16.totalorder %v547_v8, 0  ;;  %vm528_vm6 = vcmp.ne.s16.totalorder %v523_v58, 0 }
 0x15d   : > { %889 = vrsqrt.f32 %v261_v15  ;;  %v343_v18 = vadd.f32 1e-06, %v342_v16  ;;  %v382_v19 = vadd.f32 %v381_v17, %v380_v13 }
 0x15f   : > { %891 = vrsqrt.f32 %v343_v18  ;;  %v383_v20 = vmul.f32 0.001953125, %v382_v19  ;;  %v509_v59 = vpop.permute.xlu1 %508  ;;  %v525_v19 = vsel %vm524_vm4, %v521_v57, %v523_v58  ;;  %vm490_vm4 = vcmp.ne.s16.totalorder %v1054_v29, 0 }
 0x160   : > { %vm514_vm2 = vcmp.ne.s16.totalorder %v509_v59, 0  ;;  %vm527_vm7 = vcmp.ne.s16.totalorder %v525_v19, 0 }
 0x161   : > { %v384_v21 = vadd.f32 1e-06, %v383_v20 }
 0x163   : > { %893 = vrsqrt.f32 %v384_v21 }
 0x165   : > { %v888_v22 = vpop.eup %887 }
 0x166   : > { %v304_v27 = vmul.f32 %v888_v22, %v1000_v53  ;;  %v305_v28 = vmul.f32 %v888_v22, %v1003_v54 }
 0x167   : > { %v890_v23 = vpop.eup %889 }
 0x168   : > { %v263_v24 = vmul.f32 %v890_v23, %v1016_v60  ;;  %v264_v25 = vmul.f32 %v890_v23, %v1019_v61 }
 0x169   : > { %v892_v26 = vpop.eup %891 }
 0x16a   : > { %v345_v30 = vmul.f32 %v892_v26, %v1024_v2  ;;  %v346_v32 = vmul.f32 %v892_v26, %v1027_v3  ;;  %v388_v14 = vsel %vm230_vm3, %v263_v24, %v304_v27  ;;  %v389_v35 = vsel %vm230_vm3, %v264_v25, %v305_v28 }
 0x16c   : > { %v391_v53 = vsel %vm390_vm10, %v388_v14, %v345_v30  ;;  %v392_v54 = vsel %vm390_vm10, %v389_v35, %v346_v32 }
 0x16d   : > { %v894_v36 = vpop.eup %893 }
 0x16e   : > { %v386_v60 = vmul.f32 %v894_v36, %v1006_v55  ;;  %v387_v61 = vmul.f32 %v894_v36, %v1009_v56 }
 0x170   : > { %v394_v38 = vsel %vm393_vm11, %v391_v53, %v386_v60  ;;  %v395_v2 = vsel %vm393_vm11, %v392_v54, %v387_v61  ;;  %vm540_vm11 = vcmp.ne.s16.totalorder %v1097_v63, 0  ;;  %v559_v60 = vpop.permute.xlu0 %558 }
 0x171   : > { %v402_v3 = vmul.f32 %v400_v37, %v394_v38  ;;  %v403_v40 = vmul.f32 %v400_v37, %v395_v2  ;;  %v701_v2 = vld [vmem:[%s1173_s4 + $0x8] sm:$0xff] }
 0x173   : > { %v410_v41 = vadd.f32 %v408_v39, %v402_v3  ;;  %v411_v42 = vadd.f32 %v408_v39, %v403_v40  ;;  %v700_v39 = vld [vmem:[%s1173_s4] sm:$0xff] }
 0x175   : > { %v848_v43 = vmul.f32 -1.442695, %v410_v41  ;;  %v849_v44 = vmul.f32 -1.442695, %v411_v42 }
 0x177   : > { %895 = vpow2.f32 %v848_v43 }
 0x178   : > { %897 = vpow2.f32 %v849_v44 }
 0x181   : > { %v896_v45 = vpop.eup %895 }
 0x182   : > { %v898_v46 = vpop.eup %897  ;;  %v418_v55 = vadd.f32 1.0, %v896_v45 }
 0x183   : > { %v419_v47 = vadd.f32 1.0, %v898_v46 }
 0x184   : > { %899 = vrcp.f32 %v418_v55 }
 0x185   : > { %901 = vrcp.f32 %v419_v47 }
 0x18e   : > { %v900_v56 = vpop.eup %899 }
 0x18f   : > { %v902_v48 = vpop.eup %901  ;;  %v424_v49 = vmul.f32 %v900_v56, %v410_v41 }
 0x190   : > { %v425_v50 = vmul.f32 %v902_v48, %v411_v42 }
 0x191   : > { %v426_v51 = vpack.c.bf16 %v424_v49, %v424_v49 }
 0x192   : > { %v427_v52 = vpack.c.bf16 %v425_v50, %v425_v50 }
 0x193   : > { %430 = vrot.lane.b32.xlu1 %v426_v51, %s917_s8 }
 0x197   : > { %432 = vrot.lane.b32.xlu1 %v427_v52, %s917_s8 }
 0x19b   : > { %510 = vrot.lane.b32.xlu1 %v1063_v34, %s913_s29 }
 0x19f   : > { %532 = vrot.lane.b32.xlu1 %v1061_v33, %s914_s30 }
 0x1a3   : > { %544 = vrot.lane.b32.xlu1 %v1054_v29, %s915_s6 }
 0x1a7   : > { %556 = vrot.lane.b32.xlu1 %v1061_v33, %s916_s7 }
 0x205   : > { %v431_v62 = vpop.permute.xlu1 %430 }
 0x206   : > { %v1105_v33 = vsel %vm434_vm12, 0, %v431_v62 }
 0x207   : > { %v517_v13 = vsel %vm514_vm2, %v1105_v33, 0  ;;  %v570_v17 = vrot.slane %v1105_v33, 4  ;;  %v529_v24 = vsel %vm526_vm8, %v1105_v33, 0  ;;  %vm579_vm2 = vcmask 1039360  }
 0x208   : > { %v597_v27 = vrot.slane %v529_v24, 4  ;;  %v492_v57 = vsel %vm490_vm4, %v1105_v33, 0  ;;  %vm630_vm8 = vcmask 900096  }
 0x209   : > { %v433_v4 = vpop.permute.xlu1 %432 }
 0x20a   : > { %v1099_v5 = vsel %vm434_vm12, %v431_v62, %v433_v4  ;;  %v1101_v34 = vsel %vm434_vm12, %v433_v4, 0 }
 0x20b   : > { %613 = vrot.lane.b32.xlu1 %v1101_v34, %s918_s9  ;;  %611 = vrot.lane.b32.xlu0 %v1099_v5, %s918_s9  ;;  %v555_v10 = vsel %vm552_vm0, %v1101_v34, 0  ;;  %v571_v15 = vrot.slane %v1099_v5, 4  ;;  %v572_v18 = vrot.slane %v1101_v34, 4  ;;  %v531_v20 = vsel %vm528_vm6, %v1101_v34, 0 }
 0x20c   : > { %v599_v22 = vrot.slane %v531_v20, 4  ;;  %v530_v23 = vsel %vm527_vm7, %v1099_v5, 0  ;;  %v543_v28 = vsel %vm540_vm11, %v1101_v34, 0  ;;  %vm564_vm0 = vcmp.ne.s16.totalorder %v559_v60, 0 }
 0x20d   : > { %v511_v6 = vpop.permute.xlu1 %510  ;;  %v598_v25 = vrot.slane %v530_v23, 4  ;;  %v623_v32 = vrot.slane %v543_v28, 4  ;;  %v567_v54 = vsel %vm564_vm0, %v1101_v34, 0  ;;  %vm606_vm6 = vcmask 916480  }
 0x20e   : > { %v513_v7 = vsel %vm512_vm13, %v509_v59, %v511_v6  ;;  %vm516_vm14 = vcmp.ne.s16.totalorder %v511_v6, 0  ;;  %vm615_vm7 = vcmask 908288   ;;  %vm642_vm11 = vcmask 785408  }
 0x20f   : > { %vm515_vm15 = vcmp.ne.s16.totalorder %v513_v7, 0  ;;  %609 = vrot.lane.b32.xlu0 %v1105_v33, %s918_s9  ;;  %v519_v0 = vsel %vm516_vm14, %v1101_v34, 0  ;;  %vm560_vm14 = vcmask 277504  }
 0x210   : > { %589 = vrot.lane.b32.xlu1 %v519_v0, %s919_s10  ;;  %v518_v9 = vsel %vm515_vm15, %v1099_v5, 0 }
 0x211   : > { %v533_v1 = vpop.permute.xlu1 %532 }
 0x212   : > { %v537_v21 = vsel %vm536_vm5, %v533_v1, %v1097_v63  ;;  %vm538_vm12 = vcmp.ne.s16.totalorder %v533_v1, 0  ;;  %vm591_vm5 = vcmask 1031168  }
 0x213   : > { %587 = vrot.lane.b32.xlu0 %v518_v9, %s919_s10  ;;  %vm539_vm9 = vcmp.ne.s16.totalorder %v537_v21, 0  ;;  %v541_v14 = vsel %vm538_vm12, %v1105_v33, 0  ;;  %vm663_vm12 = vcmask 769024  }
 0x214   : > { %640 = vrot.lane.b32.xlu1 %v555_v10, %s920_s11  ;;  %v542_v26 = vsel %vm539_vm9, %v1099_v5, 0  ;;  %v621_v36 = vrot.slane %v541_v14, 4  ;;  %vm651_vm9 = vcmask 777216  }
 0x215   : > { %v545_v11 = vpop.permute.xlu1 %544  ;;  %v622_v30 = vrot.slane %v542_v26, 4 }
 0x216   : > { %v549_v12 = vsel %vm548_vm1, %v545_v11, %v547_v8  ;;  %vm550_vm13 = vcmp.ne.s16.totalorder %v545_v11, 0 }
 0x217   : > { %vm551_vm3 = vcmp.ne.s16.totalorder %v549_v12, 0  ;;  %585 = vrot.lane.b32.xlu0 %v517_v13, %s919_s10  ;;  %v553_v37 = vsel %vm550_vm13, %v1105_v33, 0  ;;  %vm717_vm13 = vcmask 588800  }
 0x218   : > { %575 = vrot.lane.b32.xlu1 %v571_v15, %s921_s12  ;;  %v554_v16 = vsel %vm551_vm3, %v1099_v5, 0  ;;  %vm491_vm3 = vcmp.ne.s16.totalorder %v1057_v31, 0 }
 0x219   : > { %v557_v35 = vpop.permute.xlu1 %556  ;;  %v493_v51 = vsel %vm491_vm3, %v1099_v5, 0 }
 0x21a   : > { %vm562_vm15 = vcmp.ne.s16.totalorder %v557_v35, 0  ;;  %v561_v61 = vsel %vm560_vm14, %v557_v35, %v559_v60 }
 0x21b   : > { %638 = vrot.lane.b32.xlu0 %v554_v16, %s920_s11  ;;  %v565_v53 = vsel %vm562_vm15, %v1105_v33, 0  ;;  %vm563_vm1 = vcmp.ne.s16.totalorder %v561_v61, 0 }
 0x21c   : > { %573 = vrot.lane.b32.xlu1 %v570_v17, %s921_s12  ;;  %v566_v38 = vsel %vm563_vm1, %v1099_v5, 0 }
 0x21f   : > { %577 = vrot.lane.b32.xlu0 %v572_v18, %s921_s12 }
 0x220   : > { %649 = vrot.lane.b32.xlu1 %v572_v18, %s922_s13 }
 0x223   : > { %647 = vrot.lane.b32.xlu0 %v571_v15, %s922_s13 }
 0x224   : > { %604 = vrot.lane.b32.xlu1 %v599_v22, %s923_s14 }
 0x227   : > { %602 = vrot.lane.b32.xlu0 %v598_v25, %s923_s14 }
 0x228   : > { %600 = vrot.lane.b32.xlu1 %v597_v27, %s923_s14 }
 0x22b   : > { %626 = vrot.lane.b32.xlu0 %v622_v30, %s924_s15  ;;  %v886_v30 = vld [vmem:[%s1172_s3] sm:$0xff]  }
 0x22c   : > { %628 = vrot.lane.b32.xlu1 %v623_v32, %s924_s15 }
 0x22f   : > { %636 = vrot.lane.b32.xlu0 %v553_v37, %s920_s11 }
 0x230   : > { %624 = vrot.lane.b32.xlu1 %v621_v36, %s924_s15 }
 0x233   : > { %657 = vrot.lane.b32.xlu0 %v565_v53, %s925_s16 }
 0x234   : > { %645 = vrot.lane.b32.xlu1 %v570_v17, %s922_s13 }
 0x237   : > { %661 = vrot.lane.b32.xlu0 %v567_v54, %s925_s16 }
 0x238   : > { %659 = vrot.lane.b32.xlu1 %v566_v38, %s925_s16 }
 0x23b   : > { %709 = vperm.xlu0 %884, %v701_v2  }
 0x23c   : > { %704 = vperm.xlu1 %885, %v700_v39  }
 0x27d   : > { %v612_v3 = vpop.permute.xlu0 %611  ;;  %v614_v40 = vpop.permute.xlu1 %613 }
 0x27e   : > { %v617_v0 = vsel %vm615_vm7, %v612_v3, %v614_v40 }
 0x281   : > { %v610_v41 = vpop.permute.xlu0 %609 }
 0x282   : > { %v590_v42 = vpop.permute.xlu1 %589  ;;  %v616_v13 = vsel %vm615_vm7, %v610_v41, %v612_v3 }
 0x285   : > { %v588_v43 = vpop.permute.xlu0 %587 }
 0x286   : > { %v641_v44 = vpop.permute.xlu1 %640  ;;  %v593_v29 = vsel %vm591_vm5, %v588_v43, %v590_v42 }
 0x289   : > { %v586_v45 = vpop.permute.xlu0 %585 }
 0x28a   : > { %v576_v46 = vpop.permute.xlu1 %575  ;;  %v592_v34 = vsel %vm591_vm5, %v586_v45, %v588_v43 }
 0x28d   : > { %v639_v55 = vpop.permute.xlu0 %638 }
 0x28e   : > { %v574_v47 = vpop.permute.xlu1 %573  ;;  %v644_v16 = vsel %vm642_vm11, %v639_v55, %v641_v44 }
 0x28f   : > { %v580_v56 = vsel %vm579_vm2, %v574_v47, %v576_v46 }
 0x290   : > { %v668_v58 = vsel %vm390_vm10, %v492_v57, %v580_v56 }
 0x291   : > { %v578_v48 = vpop.permute.xlu0 %577 }
 0x292   : > { %v581_v49 = vsel %vm579_vm2, %v576_v46, %v578_v48  ;;  %v650_v50 = vpop.permute.xlu1 %649 }
 0x293   : > { %v672_v52 = vsel %vm390_vm10, %v493_v51, %v581_v49 }
 0x294   : > { %727 = vmatprep.subr.bf16.mxu0 %v672_v52 }
 0x295   : > { %v648_v59 = vpop.permute.xlu0 %647  ;;  %728 = vmatpush1.bf16.msra.mxu0 %v668_v58 }
 0x296   : > { %v605_v62 = vpop.permute.xlu1 %604  ;;  %v653_v11 = vsel %vm651_vm9, %v648_v59, %v650_v50 }
 0x297   : > { %v696_v19 = vsel %vm390_vm10, %v644_v16, %v653_v11 }
 0x299   : > { %v603_v31 = vpop.permute.xlu0 %602 }
 0x29a   : > { %v608_v63 = vsel %vm606_vm6, %v603_v31, %v605_v62  ;;  %v601_v4 = vpop.permute.xlu1 %600 }
 0x29b   : > { %v607_v6 = vsel %vm606_vm6, %v601_v4, %v603_v31  ;;  %v680_v5 = vsel %vm390_vm10, %v593_v29, %v608_v63 }
 0x29c   : > { %729 = vmatprep.subr.bf16.mxu0 %v680_v5  ;;  %v676_v33 = vsel %vm390_vm10, %v592_v34, %v607_v6 }
 0x29d   : > { %v627_v7 = vpop.permute.xlu0 %626  ;;  %730 = vmatpush1.bf16.msra.mxu0 %v676_v33 }
 0x29e   : > { %v629_v8 = vpop.permute.xlu1 %628 }
 0x29f   : > { %v632_v1 = vsel %vm630_vm8, %v627_v7, %v629_v8 }
 0x2a0   : > { %v688_v9 = vsel %vm390_vm10, %v617_v0, %v632_v1 }
 0x2a1   : > { %v637_v10 = vpop.permute.xlu0 %636  ;;  %731 = vmatprep.subr.bf16.mxu0 %v688_v9 }
 0x2a2   : > { %v625_v12 = vpop.permute.xlu1 %624  ;;  %v643_v21 = vsel %vm642_vm11, %v637_v10, %v639_v55 }
 0x2a3   : > { %v631_v15 = vsel %vm630_vm8, %v625_v12, %v627_v7 }
 0x2a4   : > { %v684_v17 = vsel %vm390_vm10, %v616_v13, %v631_v15 }
 0x2a5   : > { %v658_v18 = vpop.permute.xlu0 %657  ;;  %732 = vmatpush1.bf16.msra.mxu0 %v684_v17 }
 0x2a6   : > { %733 = vmatprep.subr.bf16.mxu0 %v696_v19  ;;  %v646_v20 = vpop.permute.xlu1 %645 }
 0x2a7   : > { %v652_v22 = vsel %vm651_vm9, %v646_v20, %v648_v59 }
 0x2a8   : > { %v692_v23 = vsel %vm390_vm10, %v643_v21, %v652_v22 }
 0x2a9   : > { %v662_v24 = vpop.permute.xlu0 %661  ;;  %734 = vmatpush1.bf16.msra.mxu0 %v692_v23 }
 0x2aa   : > { %v660_v25 = vpop.permute.xlu1 %659 }
 0x2ab   : > { %v664_v26 = vsel %vm663_vm12, %v658_v18, %v660_v25  ;;  %v665_v27 = vsel %vm663_vm12, %v660_v25, %v662_v24 }
 0x2ac   : > { %851 = vmatprep.subr.msk.bf16.mxu0 %vm390_vm10, %v665_v27  ;;  %v722_v28 = vsel %vm390_vm10, %v664_v26, 0 }
 0x2ad   : > { %736 = vmatpush1.bf16.msra.mxu0 %v722_v28 }
 0x2b0   : > { %852 = vmatmul.mubr.msk.bf16.vlgmr.msra.gmra.mrb[0].mxu0 %vm717_vm13, %v886_v30 }
 0x2ba   : > { %v710_v37 = vpop.permute.xlu0 %709 }
 0x2bb   : > { %v705_v32 = vpop.permute.xlu1 %704 }
 0x383   : > { %v761_v14 = vpop.f32.mrb[0].mxu0 }
 0x384   : > { %v762_v35 = vadd.f32 %v761_v14, %v705_v32  ;;  %v763_v36 = vpop.f32.mrb[1].mxu0 }
 0x385   : > { %v764_v60 = vadd.f32 %v763_v36, %v705_v32  ;;  %v765_v61 = vpop.f32.mrb[2].mxu0 }
 0x386   : > { %v766_v53 = vadd.f32 %v765_v61, %v710_v37  ;;  %v767_v54 = vpop.f32.mrb[3].mxu0 }
 0x387   : > { %v859_v38 = vpack.c.bf16 %v764_v60, %v762_v35  ;;  %v768_v2 = vadd.f32 %v767_v54, %v710_v37 }
 0x389   : > { %782 = vst [vmem:[%s224_s28] sm:$0xff] %v859_v38  ;;  %v860_v39 = vpack.c.bf16 %v768_v2, %v766_v53 }
 0x38b   : > { %783 = vst [vmem:[%s224_s28 + $0x8] sm:$0xff] %v860_v39 }
 0x38c PF: > { %s15_s18 = sadd.s32 1, %s909_s18  }
 0x38d   : > { %p12_p4 = scmp.ge.s32.totalorder %s15_s18, 4  }
 0x38f   :  { %14 = sbr.rel (!%p12_p4) target bundleno = 1 (0x1), region = 70 }

// kernel: decoder_block_forward.6
= control target key start
LH: loop header
LB: loop body
LE: loop exit
PB: predicated region body
PF: predicated region fallthrough
CT: control target
= control target key end

     0   :  { %s964_s18 = smov 0   ;;  %s1163_s0 = inlined_call_operand.vmem [shape: bf16[2,16,256], index: 0, kind: input, shape index: {}]   ;;  %s1164_s1 = inlined_call_operand.vmem [shape: f32[16,1], index: 1, kind: input, shape index: {}]   ;;  %s1165_s2 = inlined_call_operand.vmem [shape: f32[16,1], index: 2, kind: input, shape index: {}]   ;;  %s1166_s3 = inlined_call_operand.vmem [shape: bf16[16,144], index: 3, kind: input, shape index: {}]   ;;  %s1167_s4 = inlined_call_operand.vmem [shape: f32[16,1], index: 4, kind: input, shape index: {}]   ;;  %s1168_s5 = inlined_call_operand.vmem [shape: bf16[2,16,256], index: 5, kind: output, shape index: {}]  }
   0x1 LB: > { %s834_s19 = sadd.s32 4294967295, %s917_s18   ;;  %p838_p0 = scmp.ge.s32.totalorder %s917_s18, 1  ;;  %s917_s18 = sphi %s964_s18, %s15_s18  }
   0x2   : > { %p187_p1 = scmp.lt.s32.totalorder %s917_s18, 3 }
   0x4   : > { %p188_p2 = pnand %p838_p0, %p187_p1 }
   0x5   : > { %p215_p3 = scmp.lt.s32.totalorder (!%p188_p2), %s834_s19, 1  ;;  %vm269_vm0 = vcmask (!%p188_p2), 1047556   ;;  %vm234_vm1 = vcmask (!%p188_p2), 1043456   ;;  %v919_v18 = vmov (!%p188_p2), 0   ;;  %s920_s7 = smov (!%p188_p2), 16   ;;  %vm456_vm8 = vcmask (!%p188_p2), 138240  }
   0x6   : > { %191 = sbr.rel (%p188_p2) target bundleno = 908 (0x38c), region = 40  ;;  %883 = vset.pattern.permute.xlu1 (!%p188_p2), %v919_v18  ;;  %882 = vset.pattern.permute.xlu0 (!%p188_p2), %v919_v18  ;;  %s921_s8 = smov (!%p188_p2), 18   ;;  %vm534_vm11 = vcmask (!%p188_p2), 15360   ;;  %vm546_vm13 = vcmask (!%p188_p2), 130048  }
   0x7   : > { %s922_s9 = smov (!%p188_p2), 2   ;;  %s923_s10 = smov (!%p188_p2), 32  }
   0x8   : > { %s924_s11 = smov (!%p188_p2), 34   ;;  %s925_s12 = smov (!%p188_p2), 17  }
   0x9   : > { %s926_s13 = smov (!%p188_p2), 127   ;;  %s927_s14 = smov (!%p188_p2), 111  }
   0xa   : > { %s928_s15 = smov (!%p188_p2), 95   ;;  %s929_s16 = smov (!%p188_p2), 126  }
   0xb   : > { %s930_s17 = smov (!%p188_p2), 112   ;;  %s931_s21 = smov (!%p188_p2), 110  }
   0xc   : > { %s932_s22 = smov (!%p188_p2), 96   ;;  %s933_s25 = smov (!%p188_p2), 94  }
   0xd   : > { %s1170_s19 = smov (!%p215_p3, %s834_s19), 1 }
   0xe   : > { %s855_s20 = sshll.u32 %s1170_s19, 4 }
   0xf   : > { %s219_s23 = scalar_lea.vmem %s1163_s0, %s855_s20 }
  0x10   : > { %v228_v0 = vld [vmem:[%s219_s23] sm:$0xff]  ;;  %v229_v1 = vld [vmem:[%s219_s23 + $0x8] sm:$0xff] }
  0x11   : > { %v230_v2 = vunpack.c.l.bf16 %v228_v0  ;;  %v231_v3 = vunpack.c.h.bf16 %v228_v0  ;;  %v980_v4 = vunpack.c.l.bf16 %v229_v1  ;;  %v982_v5 = vunpack.c.h.bf16 %v229_v1 }
  0x13   : > { %v270_v6 = vsel %vm269_vm0, %v230_v2, 0.0  ;;  %v271_v7 = vsel %vm269_vm0, %v231_v3, 0.0  ;;  %v235_v8 = vsel %vm234_vm1, %v230_v2, 0.0  ;;  %v236_v9 = vsel %vm234_vm1, %v231_v3, 0.0 }
  0x14   : > { %v272_v10 = vadd.f32 %v271_v7, %v270_v6  ;;  %v237_v11 = vadd.f32 %v236_v9, %v235_v8  ;;  %v344_v12 = vsel %vm269_vm0, %v980_v4, 0.0  ;;  %v345_v13 = vsel %vm269_vm0, %v982_v5, 0.0 }
  0x15   : > { %v310_v14 = vsel %vm234_vm1, %v980_v4, 0.0  ;;  %v311_v15 = vsel %vm234_vm1, %v982_v5, 0.0  ;;  %v346_v16 = vadd.f32 %v345_v13, %v344_v12 }
  0x16   : > { %273 = vadd.xlane.f32.xlu0 %v272_v10  ;;  %238 = vadd.xlane.f32.xlu1 %v237_v11  ;;  %v312_v17 = vadd.f32 %v311_v15, %v310_v14 }
  0x1a   : > { %347 = vadd.xlane.f32.xlu0 %v346_v16  ;;  %313 = vadd.xlane.f32.xlu1 %v312_v17 }
  0xa3   : > { %v274_v19 = vpop.xlane.xlu0 %273  ;;  %v239_v20 = vpop.xlane.xlu1 %238 }
  0xa4   : > { %v276_v21 = vrot.slane %v274_v19, 4  ;;  %v240_v22 = vsel %vm234_vm1, %v239_v20, 0.0 }
  0xa5   : > { %v241_v23 = vrot.slane %v240_v22, 4 }
  0xa6   : > { %v278_v24 = vsel %vm234_vm1, %v276_v21, 0.0 }
  0xa7   : > { %v279_v25 = vrot.slane %v278_v24, 4  ;;  %v242_v26 = vadd.f32 %v241_v23, %v240_v22  ;;  %v348_v27 = vpop.xlane.xlu0 %347  ;;  %v314_v28 = vpop.xlane.xlu1 %313  ;;  %v389_v22 = vld [vmem:[%s1164_s1 + $0x8] sm:$0xff]  ;;  %v388_v23 = vld [vmem:[%s1164_s1] sm:$0xff] }
  0xa8   : > { %v350_v29 = vrot.slane %v348_v27, 4  ;;  %v315_v30 = vsel %vm234_vm1, %v314_v28, 0.0 }
  0xa9   : > { %v280_v31 = vadd.f32 %v279_v25, %v278_v24  ;;  %v243_v32 = vrot.slane %v242_v26, 2  ;;  %v316_v33 = vrot.slane %v315_v30, 4  ;;  %v404_v24 = vld [vmem:[%s1165_s2] sm:$0xff]  ;;  %v405_v25 = vld [vmem:[%s1165_s2 + $0x8] sm:$0xff] }
  0xaa   : > { %v352_v34 = vsel %vm234_vm1, %v350_v29, 0.0 }
  0xab   : > { %v281_v35 = vrot.slane %v280_v31, 2  ;;  %v244_v36 = vadd.f32 %v243_v32, %v242_v26  ;;  %v353_v37 = vrot.slane %v352_v34, 4  ;;  %v317_v38 = vadd.f32 %v316_v33, %v315_v30 }
  0xac   : > { %v467_v26 = vlaneseq }
  0xad   : > { %v282_v39 = vadd.f32 %v281_v35, %v280_v31  ;;  %v245_v40 = vrot.slane %v244_v36, 1  ;;  %v354_v41 = vadd.f32 %v353_v37, %v352_v34  ;;  %v318_v42 = vrot.slane %v317_v38, 2 }
  0xae   : > { %v468_v27 = vand.u32 127, %v467_v26  ;;  %v505_v31 = vshrl.u32 %v467_v26, 7 }
  0xaf   : > { %v283_v43 = vrot.slane %v282_v39, 1  ;;  %v246_v44 = vadd.f32 %v245_v40, %v244_v36  ;;  %v355_v45 = vrot.slane %v354_v41, 2  ;;  %v319_v46 = vadd.f32 %v318_v42, %v317_v38 }
  0xb0   : > { %v469_v28 = vadd.s32 128, %v468_v27  ;;  %v474_v29 = vand.u32 15, %v468_v27  ;;  %v510_v32 = vsub.s32 4, %v505_v31  ;;  %v506_v35 = vsub.s32 0, %v505_v31 }
  0xb1   : > { %v284_v47 = vadd.f32 %v283_v43, %v282_v39  ;;  %v247_v48 = vmul.f32 0.0009765625, %v246_v44  ;;  %v356_v49 = vadd.f32 %v355_v45, %v354_v41  ;;  %v320_v50 = vrot.slane %v319_v46, 1 }
  0xb2   : > { %v481_v30 = vand.u32 15, %v469_v28  ;;  %vm494_vm2 = vcmp.ge.s32.totalorder %v474_v29, 1  ;;  %vm496_vm5 = vcmp.le.s32.totalorder %v474_v29, 14 }
  0xb3   : > { %v285_v51 = vmul.f32 0.0009765625, %v284_v47  ;;  %v357_v52 = vrot.slane %v356_v49, 1  ;;  %v321_v53 = vadd.f32 %v320_v50, %v319_v46  ;;  %v1002_v54 = vsub.f32 %v230_v2, %v247_v48 }
  0xb4   : > { %v1004_v55 = vsub.f32 %v231_v3, %v247_v48  ;;  %vm495_vm3 = vcmp.ge.s32.totalorder %v481_v30, 1  ;;  %vm497_vm6 = vcmp.le.s32.totalorder %v481_v30, 14 }
  0xb5   : > { %v358_v56 = vadd.f32 %v357_v52, %v356_v49  ;;  %v322_v57 = vmul.f32 0.0009765625, %v321_v53  ;;  %v1006_v58 = vsub.f32 %v230_v2, %v285_v51  ;;  %v1008_v59 = vsub.f32 %v231_v3, %v285_v51  ;;  %vm502_vm4 = vmpackc.low %vm495_vm3, %vm494_vm2 }
  0xb6   : > { %v250_v60 = vmul.f32 %v1002_v54, %v1002_v54  ;;  %v251_v61 = vmul.f32 %v1004_v55, %v1004_v55  ;;  %v503_v33 = vsel %vm502_vm4, 65537, %v919_v18  ;;  %vm520_vm7 = vmpackc.low %vm497_vm6, %vm496_vm5  ;;  %vm558_vm2 = vcmask 146432  }
  0xb7   : > { %v359_v62 = vmul.f32 0.0009765625, %v358_v56  ;;  %v288_v63 = vmul.f32 %v1006_v58, %v1006_v58  ;;  %v289_v0 = vmul.f32 %v1008_v59, %v1008_v59  ;;  %v1019_v1 = vsub.f32 %v980_v4, %v322_v57 }
  0xb8   : > { %v1022_v2 = vsub.f32 %v982_v5, %v322_v57  ;;  %v252_v13 = vsel %vm234_vm1, %v250_v60, 0.0  ;;  %v253_v14 = vsel %vm234_vm1, %v251_v61, 0.0  ;;  %v1059_v34 = vrot.slane %v503_v33, %v510_v32 }
  0xb9   : > { %v290_v3 = vsel %vm269_vm0, %v288_v63, 0.0  ;;  %v291_v6 = vsel %vm269_vm0, %v289_v0, 0.0  ;;  %v325_v7 = vmul.f32 %v1019_v1, %v1019_v1  ;;  %v1031_v10 = vsub.f32 %v980_v4, %v359_v62 }
  0xba   : > { %v292_v8 = vadd.f32 %v291_v6, %v290_v3  ;;  %v326_v9 = vmul.f32 %v1022_v2, %v1022_v2  ;;  %v1034_v11 = vsub.f32 %v982_v5, %v359_v62  ;;  %v254_v19 = vadd.f32 %v253_v14, %v252_v13 }
  0xbb   : > { %v327_v12 = vsel %vm234_vm1, %v325_v7, 0.0  ;;  %v362_v16 = vmul.f32 %v1031_v10, %v1031_v10  ;;  %v521_v36 = vsel %vm520_vm7, 65537, %v919_v18  ;;  %v1076_v18 = vrot.slane %v503_v33, %v506_v35 }
  0xbc   : > { %293 = vadd.xlane.f32.xlu0 %v292_v8  ;;  %v328_v15 = vsel %vm234_vm1, %v326_v9, 0.0  ;;  %v363_v17 = vmul.f32 %v1034_v11, %v1034_v11  ;;  %v1064_v37 = vrot.slane %v521_v36, %v510_v32  ;;  %v1066_v38 = vrot.slane %v521_v36, %v506_v35 }
  0xbd   : > { %v329_v4 = vadd.f32 %v328_v15, %v327_v12  ;;  %v364_v5 = vsel %vm269_vm0, %v362_v16, 0.0  ;;  %vm513_vm9 = vcmp.ne.s16.totalorder %v1059_v34, 0  ;;  %vm512_vm10 = vcmp.ne.s16.totalorder %v1076_v18, 0 }
  0xbe   : > { %v365_v20 = vsel %vm269_vm0, %v363_v17, 0.0  ;;  %vm570_vm4 = vcmask 261120  }
  0xbf   : > { %330 = vadd.xlane.f32.xlu1 %v329_v4  ;;  %v366_v21 = vadd.f32 %v365_v20, %v364_v5 }
  0xc0   : > { %255 = vadd.xlane.f32.xlu0 %v254_v19 }
  0xc3   : > { %367 = vadd.xlane.f32.xlu1 %v366_v21 }
  0xd4   : > { %397 = vperm.xlu1 %883, %v389_v22  }
  0xd6   : > { %392 = vperm.xlu0 %882, %v388_v23  }
  0xd8   : > { %408 = vperm.xlu1 %883, %v404_v24  }
  0xda   : > { %544 = vrot.lane.b32.xlu0 %v1059_v34, %s920_s7 }
  0xdc   : > { %413 = vperm.xlu1 %883, %v405_v25  }
  0xde   : > { %556 = vrot.lane.b32.xlu0 %v1064_v37, %s921_s8 }
  0xe0   : > { %530 = vrot.lane.b32.xlu1 %v1066_v38, %s922_s9 }
  0xe2   : > { %568 = vrot.lane.b32.xlu0 %v1059_v34, %s923_s10 }
  0xe6   : > { %580 = vrot.lane.b32.xlu0 %v1064_v37, %s924_s11 }
 0x149   : > { %v294_v39 = vpop.xlane.xlu0 %293 }
 0x14a   : > { %v296_v40 = vrot.slane %v294_v39, 4 }
 0x14c   : > { %v298_v41 = vsel %vm234_vm1, %v296_v40, 0.0  ;;  %v331_v42 = vpop.xlane.xlu1 %330 }
 0x14d   : > { %v299_v43 = vrot.slane %v298_v41, 4  ;;  %v332_v44 = vsel %vm234_vm1, %v331_v42, 0.0  ;;  %v256_v45 = vpop.xlane.xlu0 %255 }
 0x14e   : > { %v333_v46 = vrot.slane %v332_v44, 4  ;;  %v257_v47 = vsel %vm234_vm1, %v256_v45, 0.0 }
 0x14f   : > { %v300_v48 = vadd.f32 %v299_v43, %v298_v41  ;;  %v258_v49 = vrot.slane %v257_v47, 4 }
 0x150   : > { %v334_v50 = vadd.f32 %v333_v46, %v332_v44  ;;  %v368_v51 = vpop.xlane.xlu1 %367 }
 0x151   : > { %v301_v52 = vrot.slane %v300_v48, 2  ;;  %v259_v53 = vadd.f32 %v258_v49, %v257_v47  ;;  %v370_v56 = vrot.slane %v368_v51, 4 }
 0x152   : > { %v335_v57 = vrot.slane %v334_v50, 2 }
 0x153   : > { %v302_v60 = vadd.f32 %v301_v52, %v300_v48  ;;  %v260_v61 = vrot.slane %v259_v53, 2  ;;  %v372_v62 = vsel %vm234_vm1, %v370_v56, 0.0 }
 0x154   : > { %v336_v63 = vadd.f32 %v335_v57, %v334_v50  ;;  %v373_v0 = vrot.slane %v372_v62, 4  ;;  %v398_v27 = vpop.permute.xlu1 %397 }
 0x155   : > { %v303_v3 = vrot.slane %v302_v60, 1  ;;  %v261_v6 = vadd.f32 %v260_v61, %v259_v53  ;;  %v393_v33 = vpop.permute.xlu0 %392 }
 0x156   : > { %v337_v7 = vrot.slane %v336_v63, 1  ;;  %v374_v8 = vadd.f32 %v373_v0, %v372_v62 }
 0x157   : > { %v304_v9 = vadd.f32 %v303_v3, %v302_v60  ;;  %v262_v12 = vrot.slane %v261_v6, 1 }
 0x158   : > { %v338_v13 = vadd.f32 %v337_v7, %v336_v63  ;;  %v375_v14 = vrot.slane %v374_v8, 2  ;;  %v409_v40 = vpop.permute.xlu1 %408 }
 0x159   : > { %v305_v15 = vmul.f32 0.0009765625, %v304_v9  ;;  %v263_v16 = vadd.f32 %v262_v12, %v261_v6 }
 0x15a   : > { %v339_v17 = vmul.f32 0.0009765625, %v338_v13  ;;  %v376_v4 = vadd.f32 %v375_v14, %v374_v8 }
 0x15b   : > { %v306_v19 = vadd.f32 1e-06, %v305_v15  ;;  %v264_v5 = vmul.f32 0.0009765625, %v263_v16 }
 0x15c   : > { %v377_v20 = vrot.slane %v376_v4, 1  ;;  %v340_v21 = vadd.f32 1e-06, %v339_v17  ;;  %v414_v52 = vpop.permute.xlu1 %413 }
 0x15d   : > { %887 = vrsqrt.f32 %v306_v19  ;;  %v265_v22 = vadd.f32 1e-06, %v264_v5 }
 0x15e   : > { %v378_v23 = vadd.f32 %v377_v20, %v376_v4 }
 0x15f   : > { %889 = vrsqrt.f32 %v265_v22 }
 0x160   : > { %v379_v24 = vmul.f32 0.0009765625, %v378_v23  ;;  %891 = vrsqrt.f32 %v340_v21  ;;  %v531_v17 = vpop.permute.xlu1 %530  ;;  %v545_v23 = vpop.permute.xlu0 %544 }
 0x161   : > { %vm536_vm15 = vcmp.ne.s16.totalorder %v531_v17, 0  ;;  %vm550_vm0 = vcmp.ne.s16.totalorder %v545_v23, 0 }
 0x162   : > { %v380_v25 = vadd.f32 1e-06, %v379_v24 }
 0x164   : > { %893 = vrsqrt.f32 %v380_v25 }
 0x167   : > { %v888_v26 = vpop.eup %887 }
 0x168   : > { %v308_v31 = vmul.f32 %v888_v26, %v1006_v58  ;;  %v309_v32 = vmul.f32 %v888_v26, %v1008_v59 }
 0x169   : > { %v890_v28 = vpop.eup %889 }
 0x16a   : > { %v267_v29 = vmul.f32 %v890_v28, %v1002_v54  ;;  %v268_v30 = vmul.f32 %v890_v28, %v1004_v55  ;;  %v892_v35 = vpop.eup %891  ;;  %v557_v28 = vpop.permute.xlu0 %556 }
 0x16b   : > { %v342_v44 = vmul.f32 %v892_v35, %v1019_v1  ;;  %v343_v54 = vmul.f32 %v892_v35, %v1022_v2  ;;  %vm562_vm5 = vcmp.ne.s16.totalorder %v557_v28, 0 }
 0x16c   : > { %v384_v36 = vsel %vm234_vm1, %v267_v29, %v308_v31  ;;  %v385_v39 = vsel %vm234_vm1, %v268_v30, %v309_v32 }
 0x16d   : > { %v400_v41 = vmul.f32 %v393_v33, %v384_v36  ;;  %v401_v42 = vmul.f32 %v393_v33, %v385_v39 }
 0x16e   : > { %v894_v43 = vpop.eup %893  ;;  %v569_v35 = vpop.permute.xlu0 %568 }
 0x16f   : > { %v382_v55 = vmul.f32 %v894_v43, %v1031_v10  ;;  %v383_v58 = vmul.f32 %v894_v43, %v1034_v11  ;;  %v416_v45 = vadd.f32 %v409_v40, %v400_v41  ;;  %v417_v59 = vadd.f32 %v409_v40, %v401_v42 }
 0x171   : > { %v386_v46 = vsel %vm234_vm1, %v342_v44, %v382_v55  ;;  %v387_v47 = vsel %vm234_vm1, %v343_v54, %v383_v58  ;;  %v843_v48 = vmul.f32 -1.442695, %v416_v45  ;;  %v844_v51 = vmul.f32 -1.442695, %v417_v59  ;;  %v886_v55 = vld [vmem:[%s1166_s3 + $0x4] ss:$8 sps:$4 sm:$0xff]  }
 0x172   : > { %v402_v49 = vmul.f32 %v398_v27, %v386_v46  ;;  %v403_v50 = vmul.f32 %v398_v27, %v387_v47  ;;  %v581_v44 = vpop.permute.xlu0 %580  ;;  %850 = vmatprep.mubr.msk.bf16.mxu0 %vm546_vm13, %v886_v55 }
 0x173   : > { %895 = vpow2.f32 %v843_v48  ;;  %v697_v48 = vld [vmem:[%s1167_s4] sm:$0xff] }
 0x174   : > { %v418_v53 = vadd.f32 %v414_v52, %v402_v49  ;;  %v419_v1 = vadd.f32 %v414_v52, %v403_v50  ;;  %897 = vpow2.f32 %v844_v51  ;;  %v698_v49 = vld [vmem:[%s1167_s4 + $0x8] sm:$0xff] }
 0x176   : > { %v845_v56 = vmul.f32 -1.442695, %v418_v53  ;;  %v846_v2 = vmul.f32 -1.442695, %v419_v1 }
 0x178   : > { %899 = vpow2.f32 %v845_v56 }
 0x179   : > { %901 = vpow2.f32 %v846_v2 }
 0x17d   : > { %v896_v10 = vpop.eup %895 }
 0x17e   : > { %v432_v11 = vadd.f32 1.0, %v896_v10  ;;  %v898_v57 = vpop.eup %897 }
 0x17f   : > { %v433_v63 = vadd.f32 1.0, %v898_v57 }
 0x180   : > { %903 = vrcp.f32 %v432_v11 }
 0x182   : > { %v900_v60 = vpop.eup %899 }
 0x183   : > { %v902_v61 = vpop.eup %901  ;;  %v434_v62 = vadd.f32 1.0, %v900_v60 }
 0x184   : > { %v435_v0 = vadd.f32 1.0, %v902_v61 }
 0x185   : > { %905 = vrcp.f32 %v434_v62 }
 0x186   : > { %907 = vrcp.f32 %v435_v0 }
 0x187   : > { %909 = vrcp.f32 %v433_v63 }
 0x18a   : > { %v904_v3 = vpop.eup %903 }
 0x18b   : > { %v444_v9 = vmul.f32 %v904_v3, %v416_v45 }
 0x18f   : > { %v906_v6 = vpop.eup %905 }
 0x190   : > { %v908_v7 = vpop.eup %907  ;;  %v446_v8 = vmul.f32 %v906_v6, %v418_v53 }
 0x191   : > { %v910_v12 = vpop.eup %909  ;;  %v447_v13 = vmul.f32 %v908_v7, %v419_v1 }
 0x192   : > { %v448_v14 = vpack.c.bf16 %v446_v8, %v444_v9  ;;  %v445_v15 = vmul.f32 %v910_v12, %v417_v59 }
 0x194   : > { %452 = vrot.lane.b32.xlu1 %v448_v14, %s925_s12  ;;  %v449_v16 = vpack.c.bf16 %v447_v13, %v445_v15 }
 0x198   : > { %454 = vrot.lane.b32.xlu1 %v449_v16, %s925_s12 }
 0x19c   : > { %532 = vrot.lane.b32.xlu1 %v1064_v37, %s922_s9  ;;  %s224_s9 = scalar_lea.vmem %s1168_s5, %s855_s20 }
 0x1a0   : > { %542 = vrot.lane.b32.xlu1 %v1076_v18, %s920_s7 }
 0x1a4   : > { %554 = vrot.lane.b32.xlu1 %v1066_v38, %s921_s8 }
 0x1a8   : > { %566 = vrot.lane.b32.xlu1 %v1076_v18, %s923_s10 }
 0x1ac   : > { %578 = vrot.lane.b32.xlu1 %v1066_v38, %s924_s11 }
 0x206   : > { %v453_v4 = vpop.permute.xlu1 %452 }
 0x207   : > { %v1104_v19 = vsel %vm456_vm8, 0, %v453_v4 }
 0x208   : > { %v514_v38 = vsel %vm512_vm10, %v1104_v19, 0  ;;  %v539_v26 = vsel %vm536_vm15, %v1104_v19, 0  ;;  %vm574_vm10 = vcmp.ne.s16.totalorder %v569_v35, 0 }
 0x20a   : > { %v455_v5 = vpop.permute.xlu1 %454 }
 0x20b   : > { %v1108_v37 = vsel %vm456_vm8, %v453_v4, %v455_v5  ;;  %v1110_v20 = vsel %vm456_vm8, %v455_v5, 0 }
 0x20c   : > { %596 = vrot.lane.b32.xlu0 %v1110_v20, %s926_s13  ;;  %594 = vrot.lane.b32.xlu1 %v1108_v37, %s926_s13  ;;  %v553_v29 = vsel %vm550_vm0, %v1110_v20, 0  ;;  %v565_v39 = vsel %vm562_vm5, %v1110_v20, 0  ;;  %v577_v58 = vsel %vm574_vm10, %v1110_v20, 0  ;;  %vm612_vm0 = vcmask 1031168  }
 0x20d   : > { %849 = vmatprep.subr.msk.bf16.mxu0 %vm513_vm9, %v1108_v37  ;;  %vm582_vm9 = vcmask 277504   ;;  %vm676_vm5 = vcmask 777216  }
 0x20e   : > { %723 = vmatpush1.bf16.msra.mxu0 %v514_v38  ;;  %v533_v21 = vpop.permute.xlu1 %532 }
 0x20f   : > { %v535_v34 = vsel %vm534_vm11, %v531_v17, %v533_v21  ;;  %vm538_vm14 = vcmp.ne.s16.totalorder %v533_v21, 0 }
 0x210   : > { %633 = vrot.lane.b32.xlu0 %v1108_v37, %s927_s14  ;;  %592 = vrot.lane.b32.xlu1 %v1104_v19, %s926_s13  ;;  %vm537_vm12 = vcmp.ne.s16.totalorder %v535_v34, 0  ;;  %v541_v25 = vsel %vm538_vm14, %v1110_v20, 0  ;;  %vm586_vm14 = vcmp.ne.s16.totalorder %v581_v44, 0 }
 0x211   : > { %v540_v22 = vsel %vm537_vm12, %v1108_v37, 0  ;;  %v589_v46 = vsel %vm586_vm14, %v1110_v20, 0 }
 0x212   : > { %v543_v18 = vpop.permute.xlu1 %542 }
 0x213   : > { %v547_v24 = vsel %vm546_vm13, %v543_v18, %v545_v23  ;;  %vm548_vm3 = vcmp.ne.s16.totalorder %v543_v18, 0  ;;  %vm598_vm13 = vcmask 1039360  }
 0x214   : > { %631 = vrot.lane.b32.xlu0 %v1104_v19, %s927_s14  ;;  %635 = vrot.lane.b32.xlu1 %v1110_v20, %s927_s14  ;;  %vm549_vm1 = vcmp.ne.s16.totalorder %v547_v24, 0  ;;  %v551_v33 = vsel %vm548_vm3, %v1104_v19, 0  ;;  %vm651_vm3 = vcmask 900096  }
 0x215   : > { %v552_v30 = vsel %vm549_vm1, %v1108_v37, 0  ;;  %vm626_vm1 = vcmask 916480  }
 0x216   : > { %v555_v27 = vpop.permute.xlu1 %554 }
 0x217   : > { %v559_v31 = vsel %vm558_vm2, %v555_v27, %v557_v28  ;;  %vm560_vm7 = vcmp.ne.s16.totalorder %v555_v27, 0  ;;  %vm637_vm2 = vcmask 908288   ;;  %v884_v27 = vld [vmem:[%s1166_s3] ss:$8 sps:$4 sm:$0xff]  }
 0x218   : > { %672 = vrot.lane.b32.xlu1 %v1108_v37, %s928_s15  ;;  %608 = vrot.lane.b32.xlu0 %v540_v22, %s929_s16  ;;  %vm561_vm6 = vcmp.ne.s16.totalorder %v559_v31, 0  ;;  %v563_v42 = vsel %vm560_vm7, %v1104_v19, 0 }
 0x219   : > { %v564_v40 = vsel %vm561_vm6, %v1108_v37, 0  ;;  %vm690_vm6 = vcmask 769024  }
 0x21a   : > { %v567_v32 = vpop.permute.xlu1 %566 }
 0x21b   : > { %v571_v36 = vsel %vm570_vm4, %v567_v32, %v569_v35  ;;  %vm572_vm11 = vcmp.ne.s16.totalorder %v567_v32, 0  ;;  %vm665_vm4 = vcmask 785408  }
 0x21c   : > { %610 = vrot.lane.b32.xlu1 %v541_v25, %s929_s16  ;;  %606 = vrot.lane.b32.xlu0 %v539_v26, %s929_s16  ;;  %vm573_vm8 = vcmp.ne.s16.totalorder %v571_v36, 0  ;;  %v575_v45 = vsel %vm572_vm11, %v1104_v19, 0 }
 0x21d   : > { %v576_v43 = vsel %vm573_vm8, %v1108_v37, 0 }
 0x21e   : > { %v579_v41 = vpop.permute.xlu1 %578 }
 0x21f   : > { %v583_v54 = vsel %vm582_vm9, %v579_v41, %v581_v44  ;;  %vm584_vm15 = vcmp.ne.s16.totalorder %v579_v41, 0 }
 0x220   : > { %624 = vrot.lane.b32.xlu0 %v553_v29, %s930_s17  ;;  %622 = vrot.lane.b32.xlu1 %v552_v30, %s930_s17  ;;  %vm585_vm12 = vcmp.ne.s16.totalorder %v583_v54, 0  ;;  %v587_v47 = vsel %vm584_vm15, %v1104_v19, 0 }
 0x221   : > { %v588_v59 = vsel %vm585_vm12, %v1108_v37, 0 }
 0x224   : > { %674 = vrot.lane.b32.xlu0 %v1110_v20, %s928_s15  ;;  %620 = vrot.lane.b32.xlu1 %v551_v33, %s930_s17 }
 0x228   : > { %649 = vrot.lane.b32.xlu0 %v565_v39, %s931_s21  ;;  %647 = vrot.lane.b32.xlu1 %v564_v40, %s931_s21 }
 0x22c   : > { %645 = vrot.lane.b32.xlu1 %v563_v42, %s931_s21  ;;  %661 = vrot.lane.b32.xlu0 %v576_v43, %s932_s22 }
 0x230   : > { %663 = vrot.lane.b32.xlu1 %v577_v58, %s932_s22  ;;  %659 = vrot.lane.b32.xlu0 %v575_v45, %s932_s22 }
 0x234   : > { %670 = vrot.lane.b32.xlu1 %v1104_v19, %s928_s15  ;;  %686 = vrot.lane.b32.xlu0 %v588_v59, %s933_s25 }
 0x238   : > { %688 = vrot.lane.b32.xlu1 %v589_v46, %s933_s25  ;;  %684 = vrot.lane.b32.xlu0 %v587_v47, %s933_s25 }
 0x23c   : > { %701 = vperm.xlu1 %883, %v697_v48   ;;  %706 = vperm.xlu0 %882, %v698_v49  }
 0x27e   : > { %v597_v50 = vpop.permute.xlu0 %596  ;;  %v595_v51 = vpop.permute.xlu1 %594 }
 0x27f   : > { %v600_v52 = vsel %vm598_vm13, %v595_v51, %v597_v50 }
 0x280   : > { %724 = vmatprep.subr.bf16.mxu0 %v600_v52 }
 0x282   : > { %v634_v53 = vpop.permute.xlu0 %633  ;;  %v593_v1 = vpop.permute.xlu1 %592 }
 0x283   : > { %v599_v56 = vsel %vm598_vm13, %v593_v1, %v595_v51 }
 0x284   : > { %725 = vmatpush1.bf16.msra.mxu0 %v599_v56 }
 0x286   : > { %v632_v2 = vpop.permute.xlu0 %631  ;;  %v636_v10 = vpop.permute.xlu1 %635 }
 0x287   : > { %v639_v12 = vsel %vm637_vm2, %v634_v53, %v636_v10  ;;  %v638_v15 = vsel %vm637_vm2, %v632_v2, %v634_v53 }
 0x28a   : > { %v609_v11 = vpop.permute.xlu0 %608  ;;  %v673_v57 = vpop.permute.xlu1 %672 }
 0x28e   : > { %v607_v60 = vpop.permute.xlu0 %606  ;;  %v611_v61 = vpop.permute.xlu1 %610 }
 0x28f   : > { %v614_v62 = vsel %vm612_vm0, %v609_v11, %v611_v61  ;;  %v613_v63 = vsel %vm612_vm0, %v607_v60, %v609_v11 }
 0x290   : > { %726 = vmatprep.subr.bf16.mxu0 %v614_v62 }
 0x291   : > { %727 = vmatpush1.bf16.msra.mxu0 %v613_v63 }
 0x292   : > { %v625_v0 = vpop.permute.xlu0 %624  ;;  %v623_v3 = vpop.permute.xlu1 %622 }
 0x293   : > { %v628_v6 = vsel %vm626_vm1, %v623_v3, %v625_v0 }
 0x294   : > { %728 = vmatprep.subr.bf16.mxu0 %v628_v6 }
 0x296   : > { %v675_v7 = vpop.permute.xlu0 %674  ;;  %v621_v8 = vpop.permute.xlu1 %620 }
 0x297   : > { %v627_v9 = vsel %vm626_vm1, %v621_v8, %v623_v3  ;;  %v678_v21 = vsel %vm676_vm5, %v673_v57, %v675_v7 }
 0x298   : > { %729 = vmatpush1.bf16.msra.mxu0 %v627_v9 }
 0x299   : > { %730 = vmatprep.subr.bf16.mxu0 %v639_v12 }
 0x29a   : > { %v650_v13 = vpop.permute.xlu0 %649  ;;  %v648_v14 = vpop.permute.xlu1 %647 }
 0x29b   : > { %v653_v16 = vsel %vm651_vm3, %v648_v14, %v650_v13 }
 0x29c   : > { %731 = vmatpush1.bf16.msra.mxu0 %v638_v15 }
 0x29d   : > { %732 = vmatprep.subr.bf16.mxu0 %v653_v16 }
 0x29e   : > { %v662_v17 = vpop.permute.xlu0 %661  ;;  %v646_v4 = vpop.permute.xlu1 %645 }
 0x29f   : > { %v652_v19 = vsel %vm651_vm3, %v646_v4, %v648_v14 }
 0x2a0   : > { %733 = vmatpush1.bf16.msra.mxu0 %v652_v19 }
 0x2a2   : > { %v660_v5 = vpop.permute.xlu0 %659  ;;  %v664_v37 = vpop.permute.xlu1 %663 }
 0x2a3   : > { %v667_v20 = vsel %vm665_vm4, %v662_v17, %v664_v37  ;;  %v666_v38 = vsel %vm665_vm4, %v660_v5, %v662_v17 }
 0x2a4   : > { %734 = vmatprep.subr.bf16.mxu0 %v667_v20 }
 0x2a5   : > { %735 = vmatpush1.bf16.msra.mxu0 %v666_v38 }
 0x2a6   : > { %v687_v34 = vpop.permute.xlu0 %686  ;;  %736 = vmatprep.subr.bf16.mxu0 %v678_v21  ;;  %v671_v18 = vpop.permute.xlu1 %670 }
 0x2a7   : > { %v677_v22 = vsel %vm676_vm5, %v671_v18, %v673_v57 }
 0x2a9   : > { %737 = vmatpush1.bf16.msra.mxu0 %v677_v22 }
 0x2aa   : > { %v685_v23 = vpop.permute.xlu0 %684  ;;  %v689_v24 = vpop.permute.xlu1 %688 }
 0x2ab   : > { %v692_v25 = vsel %vm690_vm6, %v687_v34, %v689_v24  ;;  %v691_v26 = vsel %vm690_vm6, %v685_v23, %v687_v34 }
 0x2ac   : > { %738 = vmatprep.subr.bf16.mxu0 %v692_v25 }
 0x2ad   : > { %739 = vmatpush1.bf16.msra.mxu0 %v691_v26 }
 0x2b0   : > { %755 = vmatmul.mubr.bf16.vlgmr.msra.gmra.mrb[0].mxu0 %v884_v27 }
 0x2bb   : > { %v702_v28 = vpop.permute.xlu1 %701  ;;  %v707_v32 = vpop.permute.xlu0 %706 }
 0x383   : > { %v756_v29 = vpop.f32.mrb[0].mxu0 }
 0x384   : > { %v757_v30 = vadd.f32 %v756_v29, %v702_v28  ;;  %v758_v31 = vpop.f32.mrb[1].mxu0 }
 0x385   : > { %v759_v33 = vadd.f32 %v758_v31, %v702_v28  ;;  %v760_v35 = vpop.f32.mrb[2].mxu0 }
 0x386   : > { %v761_v36 = vadd.f32 %v760_v35, %v707_v32  ;;  %v762_v39 = vpop.f32.mrb[3].mxu0 }
 0x387   : > { %v857_v40 = vpack.c.bf16 %v759_v33, %v757_v30  ;;  %v763_v41 = vadd.f32 %v762_v39, %v707_v32 }
 0x389   : > { %777 = vst [vmem:[%s224_s9] sm:$0xff] %v857_v40  ;;  %v858_v42 = vpack.c.bf16 %v763_v41, %v761_v36 }
 0x38b   : > { %778 = vst [vmem:[%s224_s9 + $0x8] sm:$0xff] %v858_v42 }
 0x38c PF: > { %s15_s18 = sadd.s32 1, %s917_s18  }
 0x38d   : > { %p12_p4 = scmp.ge.s32.totalorder %s15_s18, 4  }
 0x38f   :  { %14 = sbr.rel (!%p12_p4) target bundleno = 1 (0x1), region = 70 }

// kernel: decoder_block_forward.7
= control target key start
LH: loop header
LB: loop body
LE: loop exit
PB: predicated region body
PF: predicated region fallthrough
CT: control target
= control target key end

     0   :  { %s1041_s21 = smov 0   ;;  %s1241_s0 = inlined_call_operand.vmem [shape: bf16[2,16,256], index: 0, kind: input, shape index: {}]   ;;  %s1242_s1 = inlined_call_operand.vmem [shape: f32[16,1], index: 1, kind: input, shape index: {}]   ;;  %s1243_s2 = inlined_call_operand.vmem [shape: f32[16,1], index: 2, kind: input, shape index: {}]   ;;  %s1244_s3 = inlined_call_operand.vmem [shape: bf16[16,144], index: 3, kind: input, shape index: {}]   ;;  %s1245_s4 = inlined_call_operand.vmem [shape: f32[16,1], index: 4, kind: input, shape index: {}]   ;;  %s1246_s5 = inlined_call_operand.vmem [shape: bf16[2,16,256], index: 5, kind: input, shape index: {}]   ;;  %s1247_s6 = inlined_call_operand.vmem [shape: bf16[2,16,256], index: 6, kind: output, shape index: {}]  }
   0x1 LB: > { %s903_s22 = sadd.s32 4294967295, %s989_s21   ;;  %p907_p0 = scmp.ge.s32.totalorder %s989_s21, 1  ;;  %s989_s21 = sphi %s1041_s21, %s16_s21  }
   0x2   : > { %p222_p1 = scmp.lt.s32.totalorder %s989_s21, 3 }
   0x4   : > { %p223_p2 = pnand %p907_p0, %p222_p1 }
   0x5   : > { %p257_p3 = scmp.lt.s32.totalorder (!%p223_p2), %s903_s22, 1  ;;  %vm316_vm0 = vcmask (!%p223_p2), 1047556   ;;  %vm281_vm1 = vcmask (!%p223_p2), 1043456   ;;  %v991_v18 = vmov (!%p223_p2), 0   ;;  %s992_s11 = smov (!%p223_p2), 16   ;;  %vm503_vm8 = vcmask (!%p223_p2), 138240  }
   0x6   : > { %226 = sbr.rel (%p223_p2) target bundleno = 910 (0x38e), region = 44  ;;  %955 = vset.pattern.permute.xlu1 (!%p223_p2), %v991_v18  ;;  %954 = vset.pattern.permute.xlu0 (!%p223_p2), %v991_v18  ;;  %s993_s12 = smov (!%p223_p2), 18   ;;  %vm581_vm11 = vcmask (!%p223_p2), 15360   ;;  %vm593_vm13 = vcmask (!%p223_p2), 130048  }
   0x7   : > { %s994_s13 = smov (!%p223_p2), 2   ;;  %s995_s14 = smov (!%p223_p2), 32  }
   0x8   : > { %s996_s15 = smov (!%p223_p2), 34   ;;  %s997_s16 = smov (!%p223_p2), 17  }
   0x9   : > { %s998_s17 = smov (!%p223_p2), 127   ;;  %s999_s18 = smov (!%p223_p2), 111  }
   0xa   : > { %s1000_s19 = smov (!%p223_p2), 95   ;;  %s1001_s20 = smov (!%p223_p2), 126  }
   0xb   : > { %s1003_s24 = smov (!%p223_p2), 110   ;;  %s1004_s25 = smov (!%p223_p2), 96  }
   0xc   : > { %s1005_s28 = smov (!%p223_p2), 94  }
   0xd   : > { %s1249_s22 = smov (!%p257_p3, %s903_s22), 1 }
   0xe   : > { %s1049_s23 = sshll.u32 %s1249_s22, 4  ;;  %s1002_s22 = smov 112  }
   0xf   : > { %s261_s26 = scalar_lea.vmem %s1241_s0, %s1049_s23 }
  0x10   : > { %v275_v0 = vld [vmem:[%s261_s26] sm:$0xff]  ;;  %v276_v1 = vld [vmem:[%s261_s26 + $0x8] sm:$0xff] }
  0x11   : > { %v277_v2 = vunpack.c.l.bf16 %v275_v0  ;;  %v278_v3 = vunpack.c.h.bf16 %v275_v0  ;;  %v1055_v4 = vunpack.c.l.bf16 %v276_v1  ;;  %v1057_v5 = vunpack.c.h.bf16 %v276_v1 }
  0x13   : > { %v317_v6 = vsel %vm316_vm0, %v277_v2, 0.0  ;;  %v318_v7 = vsel %vm316_vm0, %v278_v3, 0.0  ;;  %v282_v8 = vsel %vm281_vm1, %v277_v2, 0.0  ;;  %v283_v9 = vsel %vm281_vm1, %v278_v3, 0.0 }
  0x14   : > { %v319_v10 = vadd.f32 %v318_v7, %v317_v6  ;;  %v284_v11 = vadd.f32 %v283_v9, %v282_v8  ;;  %v391_v12 = vsel %vm316_vm0, %v1055_v4, 0.0  ;;  %v392_v13 = vsel %vm316_vm0, %v1057_v5, 0.0 }
  0x15   : > { %v357_v14 = vsel %vm281_vm1, %v1055_v4, 0.0  ;;  %v358_v15 = vsel %vm281_vm1, %v1057_v5, 0.0  ;;  %v393_v16 = vadd.f32 %v392_v13, %v391_v12 }
  0x16   : > { %320 = vadd.xlane.f32.xlu0 %v319_v10  ;;  %285 = vadd.xlane.f32.xlu1 %v284_v11  ;;  %v359_v17 = vadd.f32 %v358_v15, %v357_v14 }
  0x1a   : > { %394 = vadd.xlane.f32.xlu0 %v393_v16  ;;  %360 = vadd.xlane.f32.xlu1 %v359_v17 }
  0xa3   : > { %v321_v19 = vpop.xlane.xlu0 %320  ;;  %v286_v20 = vpop.xlane.xlu1 %285 }
  0xa4   : > { %v323_v21 = vrot.slane %v321_v19, 4  ;;  %v287_v22 = vsel %vm281_vm1, %v286_v20, 0.0 }
  0xa5   : > { %v288_v23 = vrot.slane %v287_v22, 4 }
  0xa6   : > { %v325_v24 = vsel %vm281_vm1, %v323_v21, 0.0 }
  0xa7   : > { %v326_v25 = vrot.slane %v325_v24, 4  ;;  %v289_v26 = vadd.f32 %v288_v23, %v287_v22  ;;  %v395_v27 = vpop.xlane.xlu0 %394  ;;  %v361_v28 = vpop.xlane.xlu1 %360  ;;  %v436_v22 = vld [vmem:[%s1242_s1 + $0x8] sm:$0xff]  ;;  %v435_v23 = vld [vmem:[%s1242_s1] sm:$0xff] }
  0xa8   : > { %v397_v29 = vrot.slane %v395_v27, 4  ;;  %v362_v30 = vsel %vm281_vm1, %v361_v28, 0.0 }
  0xa9   : > { %v327_v31 = vadd.f32 %v326_v25, %v325_v24  ;;  %v290_v32 = vrot.slane %v289_v26, 2  ;;  %v363_v33 = vrot.slane %v362_v30, 4  ;;  %v451_v24 = vld [vmem:[%s1243_s2] sm:$0xff]  ;;  %v452_v25 = vld [vmem:[%s1243_s2 + $0x8] sm:$0xff] }
  0xaa   : > { %v399_v34 = vsel %vm281_vm1, %v397_v29, 0.0 }
  0xab   : > { %v328_v35 = vrot.slane %v327_v31, 2  ;;  %v291_v36 = vadd.f32 %v290_v32, %v289_v26  ;;  %v400_v37 = vrot.slane %v399_v34, 4  ;;  %v364_v38 = vadd.f32 %v363_v33, %v362_v30 }
  0xac   : > { %v514_v26 = vlaneseq }
  0xad   : > { %v329_v39 = vadd.f32 %v328_v35, %v327_v31  ;;  %v292_v40 = vrot.slane %v291_v36, 1  ;;  %v401_v41 = vadd.f32 %v400_v37, %v399_v34  ;;  %v365_v42 = vrot.slane %v364_v38, 2 }
  0xae   : > { %v515_v27 = vand.u32 127, %v514_v26  ;;  %v552_v31 = vshrl.u32 %v514_v26, 7 }
  0xaf   : > { %v330_v43 = vrot.slane %v329_v39, 1  ;;  %v293_v44 = vadd.f32 %v292_v40, %v291_v36  ;;  %v402_v45 = vrot.slane %v401_v41, 2  ;;  %v366_v46 = vadd.f32 %v365_v42, %v364_v38 }
  0xb0   : > { %v516_v28 = vadd.s32 128, %v515_v27  ;;  %v521_v29 = vand.u32 15, %v515_v27  ;;  %v557_v32 = vsub.s32 4, %v552_v31  ;;  %v553_v35 = vsub.s32 0, %v552_v31 }
  0xb1   : > { %v331_v47 = vadd.f32 %v330_v43, %v329_v39  ;;  %v294_v48 = vmul.f32 0.0009765625, %v293_v44  ;;  %v403_v49 = vadd.f32 %v402_v45, %v401_v41  ;;  %v367_v50 = vrot.slane %v366_v46, 1 }
  0xb2   : > { %v528_v30 = vand.u32 15, %v516_v28  ;;  %vm541_vm2 = vcmp.ge.s32.totalorder %v521_v29, 1  ;;  %vm543_vm5 = vcmp.le.s32.totalorder %v521_v29, 14 }
  0xb3   : > { %v332_v51 = vmul.f32 0.0009765625, %v331_v47  ;;  %v404_v52 = vrot.slane %v403_v49, 1  ;;  %v368_v53 = vadd.f32 %v367_v50, %v366_v46  ;;  %v1077_v54 = vsub.f32 %v277_v2, %v294_v48 }
  0xb4   : > { %v1079_v55 = vsub.f32 %v278_v3, %v294_v48  ;;  %vm542_vm3 = vcmp.ge.s32.totalorder %v528_v30, 1  ;;  %vm544_vm6 = vcmp.le.s32.totalorder %v528_v30, 14 }
  0xb5   : > { %v405_v56 = vadd.f32 %v404_v52, %v403_v49  ;;  %v369_v57 = vmul.f32 0.0009765625, %v368_v53  ;;  %v1081_v58 = vsub.f32 %v277_v2, %v332_v51  ;;  %v1083_v59 = vsub.f32 %v278_v3, %v332_v51  ;;  %vm549_vm4 = vmpackc.low %vm542_vm3, %vm541_vm2 }
  0xb6   : > { %v297_v60 = vmul.f32 %v1077_v54, %v1077_v54  ;;  %v298_v61 = vmul.f32 %v1079_v55, %v1079_v55  ;;  %v550_v33 = vsel %vm549_vm4, 65537, %v991_v18  ;;  %vm567_vm7 = vmpackc.low %vm544_vm6, %vm543_vm5  ;;  %vm605_vm2 = vcmask 146432  }
  0xb7   : > { %v406_v62 = vmul.f32 0.0009765625, %v405_v56  ;;  %v335_v63 = vmul.f32 %v1081_v58, %v1081_v58  ;;  %v336_v0 = vmul.f32 %v1083_v59, %v1083_v59  ;;  %v1094_v1 = vsub.f32 %v1055_v4, %v369_v57 }
  0xb8   : > { %v1097_v2 = vsub.f32 %v1057_v5, %v369_v57  ;;  %v299_v13 = vsel %vm281_vm1, %v297_v60, 0.0  ;;  %v300_v14 = vsel %vm281_vm1, %v298_v61, 0.0  ;;  %v1134_v34 = vrot.slane %v550_v33, %v557_v32 }
  0xb9   : > { %v337_v3 = vsel %vm316_vm0, %v335_v63, 0.0  ;;  %v338_v6 = vsel %vm316_vm0, %v336_v0, 0.0  ;;  %v372_v7 = vmul.f32 %v1094_v1, %v1094_v1  ;;  %v1106_v10 = vsub.f32 %v1055_v4, %v406_v62 }
  0xba   : > { %v339_v8 = vadd.f32 %v338_v6, %v337_v3  ;;  %v373_v9 = vmul.f32 %v1097_v2, %v1097_v2  ;;  %v1109_v11 = vsub.f32 %v1057_v5, %v406_v62  ;;  %v301_v19 = vadd.f32 %v300_v14, %v299_v13 }
  0xbb   : > { %v374_v12 = vsel %vm281_vm1, %v372_v7, 0.0  ;;  %v409_v16 = vmul.f32 %v1106_v10, %v1106_v10  ;;  %v568_v36 = vsel %vm567_vm7, 65537, %v991_v18  ;;  %v1151_v18 = vrot.slane %v550_v33, %v553_v35 }
  0xbc   : > { %340 = vadd.xlane.f32.xlu0 %v339_v8  ;;  %v375_v15 = vsel %vm281_vm1, %v373_v9, 0.0  ;;  %v410_v17 = vmul.f32 %v1109_v11, %v1109_v11  ;;  %v1139_v37 = vrot.slane %v568_v36, %v557_v32  ;;  %v1141_v38 = vrot.slane %v568_v36, %v553_v35 }
  0xbd   : > { %v376_v4 = vadd.f32 %v375_v15, %v374_v12  ;;  %v411_v5 = vsel %vm316_vm0, %v409_v16, 0.0  ;;  %vm560_vm9 = vcmp.ne.s16.totalorder %v1134_v34, 0  ;;  %vm559_vm10 = vcmp.ne.s16.totalorder %v1151_v18, 0 }
  0xbe   : > { %v412_v20 = vsel %vm316_vm0, %v410_v17, 0.0  ;;  %vm617_vm4 = vcmask 261120  }
  0xbf   : > { %377 = vadd.xlane.f32.xlu1 %v376_v4  ;;  %v413_v21 = vadd.f32 %v412_v20, %v411_v5 }
  0xc0   : > { %302 = vadd.xlane.f32.xlu0 %v301_v19 }
  0xc3   : > { %414 = vadd.xlane.f32.xlu1 %v413_v21 }
  0xd4   : > { %444 = vperm.xlu1 %955, %v436_v22  }
  0xd6   : > { %439 = vperm.xlu0 %954, %v435_v23  }
  0xd8   : > { %455 = vperm.xlu1 %955, %v451_v24  }
  0xda   : > { %591 = vrot.lane.b32.xlu0 %v1134_v34, %s992_s11 }
  0xdc   : > { %460 = vperm.xlu1 %955, %v452_v25  }
  0xde   : > { %603 = vrot.lane.b32.xlu0 %v1139_v37, %s993_s12 }
  0xe0   : > { %577 = vrot.lane.b32.xlu1 %v1141_v38, %s994_s13 }
  0xe2   : > { %615 = vrot.lane.b32.xlu0 %v1134_v34, %s995_s14 }
  0xe6   : > { %627 = vrot.lane.b32.xlu0 %v1139_v37, %s996_s15 }
 0x149   : > { %v341_v39 = vpop.xlane.xlu0 %340 }
 0x14a   : > { %v343_v40 = vrot.slane %v341_v39, 4 }
 0x14c   : > { %v345_v41 = vsel %vm281_vm1, %v343_v40, 0.0  ;;  %v378_v42 = vpop.xlane.xlu1 %377 }
 0x14d   : > { %v346_v43 = vrot.slane %v345_v41, 4  ;;  %v379_v44 = vsel %vm281_vm1, %v378_v42, 0.0  ;;  %v303_v45 = vpop.xlane.xlu0 %302 }
 0x14e   : > { %v380_v46 = vrot.slane %v379_v44, 4  ;;  %v304_v47 = vsel %vm281_vm1, %v303_v45, 0.0 }
 0x14f   : > { %v347_v48 = vadd.f32 %v346_v43, %v345_v41  ;;  %v305_v49 = vrot.slane %v304_v47, 4 }
 0x150   : > { %v381_v50 = vadd.f32 %v380_v46, %v379_v44  ;;  %v415_v51 = vpop.xlane.xlu1 %414 }
 0x151   : > { %v348_v52 = vrot.slane %v347_v48, 2  ;;  %v306_v53 = vadd.f32 %v305_v49, %v304_v47  ;;  %v417_v56 = vrot.slane %v415_v51, 4 }
 0x152   : > { %v382_v57 = vrot.slane %v381_v50, 2 }
 0x153   : > { %v349_v60 = vadd.f32 %v348_v52, %v347_v48  ;;  %v307_v61 = vrot.slane %v306_v53, 2  ;;  %v419_v62 = vsel %vm281_vm1, %v417_v56, 0.0 }
 0x154   : > { %v383_v63 = vadd.f32 %v382_v57, %v381_v50  ;;  %v420_v0 = vrot.slane %v419_v62, 4  ;;  %v445_v27 = vpop.permute.xlu1 %444 }
 0x155   : > { %v350_v3 = vrot.slane %v349_v60, 1  ;;  %v308_v6 = vadd.f32 %v307_v61, %v306_v53  ;;  %v440_v33 = vpop.permute.xlu0 %439 }
 0x156   : > { %v384_v7 = vrot.slane %v383_v63, 1  ;;  %v421_v8 = vadd.f32 %v420_v0, %v419_v62 }
 0x157   : > { %v351_v9 = vadd.f32 %v350_v3, %v349_v60  ;;  %v309_v12 = vrot.slane %v308_v6, 1 }
 0x158   : > { %v385_v13 = vadd.f32 %v384_v7, %v383_v63  ;;  %v422_v14 = vrot.slane %v421_v8, 2  ;;  %v456_v40 = vpop.permute.xlu1 %455 }
 0x159   : > { %v352_v15 = vmul.f32 0.0009765625, %v351_v9  ;;  %v310_v16 = vadd.f32 %v309_v12, %v308_v6 }
 0x15a   : > { %v386_v17 = vmul.f32 0.0009765625, %v385_v13  ;;  %v423_v4 = vadd.f32 %v422_v14, %v421_v8 }
 0x15b   : > { %v353_v19 = vadd.f32 1e-06, %v352_v15  ;;  %v311_v5 = vmul.f32 0.0009765625, %v310_v16 }
 0x15c   : > { %v424_v20 = vrot.slane %v423_v4, 1  ;;  %v387_v21 = vadd.f32 1e-06, %v386_v17  ;;  %v461_v52 = vpop.permute.xlu1 %460 }
 0x15d   : > { %959 = vrsqrt.f32 %v353_v19  ;;  %v312_v22 = vadd.f32 1e-06, %v311_v5 }
 0x15e   : > { %v425_v23 = vadd.f32 %v424_v20, %v423_v4 }
 0x15f   : > { %961 = vrsqrt.f32 %v312_v22 }
 0x160   : > { %v426_v24 = vmul.f32 0.0009765625, %v425_v23  ;;  %963 = vrsqrt.f32 %v387_v21  ;;  %v578_v17 = vpop.permute.xlu1 %577  ;;  %v592_v23 = vpop.permute.xlu0 %591 }
 0x161   : > { %vm583_vm15 = vcmp.ne.s16.totalorder %v578_v17, 0  ;;  %vm597_vm0 = vcmp.ne.s16.totalorder %v592_v23, 0 }
 0x162   : > { %v427_v25 = vadd.f32 1e-06, %v426_v24 }
 0x164   : > { %965 = vrsqrt.f32 %v427_v25 }
 0x167   : > { %v960_v26 = vpop.eup %959 }
 0x168   : > { %v355_v31 = vmul.f32 %v960_v26, %v1081_v58  ;;  %v356_v32 = vmul.f32 %v960_v26, %v1083_v59 }
 0x169   : > { %v962_v28 = vpop.eup %961 }
 0x16a   : > { %v314_v29 = vmul.f32 %v962_v28, %v1077_v54  ;;  %v315_v30 = vmul.f32 %v962_v28, %v1079_v55  ;;  %v964_v35 = vpop.eup %963  ;;  %v604_v28 = vpop.permute.xlu0 %603 }
 0x16b   : > { %v389_v44 = vmul.f32 %v964_v35, %v1094_v1  ;;  %v390_v54 = vmul.f32 %v964_v35, %v1097_v2  ;;  %vm609_vm5 = vcmp.ne.s16.totalorder %v604_v28, 0 }
 0x16c   : > { %v431_v36 = vsel %vm281_vm1, %v314_v29, %v355_v31  ;;  %v432_v39 = vsel %vm281_vm1, %v315_v30, %v356_v32 }
 0x16d   : > { %v447_v41 = vmul.f32 %v440_v33, %v431_v36  ;;  %v448_v42 = vmul.f32 %v440_v33, %v432_v39 }
 0x16e   : > { %v966_v43 = vpop.eup %965  ;;  %v616_v35 = vpop.permute.xlu0 %615 }
 0x16f   : > { %v429_v55 = vmul.f32 %v966_v43, %v1106_v10  ;;  %v430_v58 = vmul.f32 %v966_v43, %v1109_v11  ;;  %v463_v45 = vadd.f32 %v456_v40, %v447_v41  ;;  %v464_v59 = vadd.f32 %v456_v40, %v448_v42 }
 0x171   : > { %v433_v46 = vsel %vm281_vm1, %v389_v44, %v429_v55  ;;  %v434_v47 = vsel %vm281_vm1, %v390_v54, %v430_v58  ;;  %v914_v48 = vmul.f32 -1.442695, %v463_v45  ;;  %v915_v51 = vmul.f32 -1.442695, %v464_v59  ;;  %v958_v55 = vld [vmem:[%s1244_s3 + $0x4] ss:$8 sps:$4 sm:$0xff]  }
 0x172   : > { %v449_v49 = vmul.f32 %v445_v27, %v433_v46  ;;  %v450_v50 = vmul.f32 %v445_v27, %v434_v47  ;;  %v628_v44 = vpop.permute.xlu0 %627  ;;  %921 = vmatprep.mubr.msk.bf16.mxu0 %vm593_vm13, %v958_v55 }
 0x173   : > { %967 = vpow2.f32 %v914_v48  ;;  %v744_v48 = vld [vmem:[%s1245_s4] sm:$0xff] }
 0x174   : > { %v465_v53 = vadd.f32 %v461_v52, %v449_v49  ;;  %v466_v1 = vadd.f32 %v461_v52, %v450_v50  ;;  %969 = vpow2.f32 %v915_v51  ;;  %v745_v49 = vld [vmem:[%s1245_s4 + $0x8] sm:$0xff] }
 0x176   : > { %v916_v56 = vmul.f32 -1.442695, %v465_v53  ;;  %v917_v2 = vmul.f32 -1.442695, %v466_v1 }
 0x178   : > { %971 = vpow2.f32 %v916_v56 }
 0x179   : > { %973 = vpow2.f32 %v917_v2 }
 0x17d   : > { %v968_v10 = vpop.eup %967 }
 0x17e   : > { %v479_v11 = vadd.f32 1.0, %v968_v10  ;;  %v970_v57 = vpop.eup %969 }
 0x17f   : > { %v480_v63 = vadd.f32 1.0, %v970_v57 }
 0x180   : > { %975 = vrcp.f32 %v479_v11 }
 0x182   : > { %v972_v60 = vpop.eup %971 }
 0x183   : > { %v974_v61 = vpop.eup %973  ;;  %v481_v62 = vadd.f32 1.0, %v972_v60 }
 0x184   : > { %v482_v0 = vadd.f32 1.0, %v974_v61 }
 0x185   : > { %977 = vrcp.f32 %v481_v62 }
 0x186   : > { %979 = vrcp.f32 %v482_v0 }
 0x187   : > { %981 = vrcp.f32 %v480_v63 }
 0x18a   : > { %v976_v3 = vpop.eup %975 }
 0x18b   : > { %v491_v9 = vmul.f32 %v976_v3, %v463_v45 }
 0x18f   : > { %v978_v6 = vpop.eup %977 }
 0x190   : > { %v980_v7 = vpop.eup %979  ;;  %v493_v8 = vmul.f32 %v978_v6, %v465_v53 }
 0x191   : > { %v982_v12 = vpop.eup %981  ;;  %v494_v13 = vmul.f32 %v980_v7, %v466_v1 }
 0x192   : > { %v495_v14 = vpack.c.bf16 %v493_v8, %v491_v9  ;;  %v492_v15 = vmul.f32 %v982_v12, %v464_v59 }
 0x194   : > { %499 = vrot.lane.b32.xlu1 %v495_v14, %s997_s16  ;;  %v496_v16 = vpack.c.bf16 %v494_v13, %v492_v15 }
 0x198   : > { %501 = vrot.lane.b32.xlu1 %v496_v16, %s997_s16  ;;  %s271_s16 = scalar_lea.vmem %s1247_s6, %s1049_s23 }
 0x19c   : > { %579 = vrot.lane.b32.xlu1 %v1139_v37, %s994_s13  ;;  %s266_s13 = scalar_lea.vmem %s1246_s5, %s1049_s23 }
 0x1a0   : > { %589 = vrot.lane.b32.xlu1 %v1151_v18, %s992_s11 }
 0x1a4   : > { %601 = vrot.lane.b32.xlu1 %v1141_v38, %s993_s12 }
 0x1a8   : > { %613 = vrot.lane.b32.xlu1 %v1151_v18, %s995_s14 }
 0x1ac   : > { %625 = vrot.lane.b32.xlu1 %v1141_v38, %s996_s15 }
 0x206   : > { %v500_v4 = vpop.permute.xlu1 %499 }
 0x207   : > { %v1179_v19 = vsel %vm503_vm8, 0, %v500_v4 }
 0x208   : > { %v561_v38 = vsel %vm559_vm10, %v1179_v19, 0  ;;  %v586_v26 = vsel %vm583_vm15, %v1179_v19, 0  ;;  %vm621_vm10 = vcmp.ne.s16.totalorder %v616_v35, 0 }
 0x20a   : > { %v502_v5 = vpop.permute.xlu1 %501 }
 0x20b   : > { %v1183_v37 = vsel %vm503_vm8, %v500_v4, %v502_v5  ;;  %v1185_v20 = vsel %vm503_vm8, %v502_v5, 0 }
 0x20c   : > { %643 = vrot.lane.b32.xlu0 %v1185_v20, %s998_s17  ;;  %641 = vrot.lane.b32.xlu1 %v1183_v37, %s998_s17  ;;  %v600_v29 = vsel %vm597_vm0, %v1185_v20, 0  ;;  %v612_v39 = vsel %vm609_vm5, %v1185_v20, 0  ;;  %v624_v58 = vsel %vm621_vm10, %v1185_v20, 0  ;;  %vm659_vm0 = vcmask 1031168  }
 0x20d   : > { %920 = vmatprep.subr.msk.bf16.mxu0 %vm560_vm9, %v1183_v37  ;;  %vm629_vm9 = vcmask 277504   ;;  %vm723_vm5 = vcmask 777216  }
 0x20e   : > { %770 = vmatpush1.bf16.msra.mxu0 %v561_v38  ;;  %v580_v21 = vpop.permute.xlu1 %579 }
 0x20f   : > { %v582_v34 = vsel %vm581_vm11, %v578_v17, %v580_v21  ;;  %vm585_vm14 = vcmp.ne.s16.totalorder %v580_v21, 0 }
 0x210   : > { %680 = vrot.lane.b32.xlu0 %v1183_v37, %s999_s18  ;;  %639 = vrot.lane.b32.xlu1 %v1179_v19, %s998_s17  ;;  %vm584_vm12 = vcmp.ne.s16.totalorder %v582_v34, 0  ;;  %v588_v25 = vsel %vm585_vm14, %v1185_v20, 0  ;;  %vm633_vm14 = vcmp.ne.s16.totalorder %v628_v44, 0 }
 0x211   : > { %v587_v22 = vsel %vm584_vm12, %v1183_v37, 0  ;;  %v636_v46 = vsel %vm633_vm14, %v1185_v20, 0 }
 0x212   : > { %v590_v18 = vpop.permute.xlu1 %589 }
 0x213   : > { %v594_v24 = vsel %vm593_vm13, %v590_v18, %v592_v23  ;;  %vm595_vm3 = vcmp.ne.s16.totalorder %v590_v18, 0  ;;  %vm645_vm13 = vcmask 1039360  }
 0x214   : > { %678 = vrot.lane.b32.xlu0 %v1179_v19, %s999_s18  ;;  %682 = vrot.lane.b32.xlu1 %v1185_v20, %s999_s18  ;;  %vm596_vm1 = vcmp.ne.s16.totalorder %v594_v24, 0  ;;  %v598_v33 = vsel %vm595_vm3, %v1179_v19, 0  ;;  %vm698_vm3 = vcmask 900096  }
 0x215   : > { %v599_v30 = vsel %vm596_vm1, %v1183_v37, 0  ;;  %vm673_vm1 = vcmask 916480  }
 0x216   : > { %v602_v27 = vpop.permute.xlu1 %601 }
 0x217   : > { %v606_v31 = vsel %vm605_vm2, %v602_v27, %v604_v28  ;;  %vm607_vm7 = vcmp.ne.s16.totalorder %v602_v27, 0  ;;  %vm684_vm2 = vcmask 908288   ;;  %v956_v27 = vld [vmem:[%s1244_s3] ss:$8 sps:$4 sm:$0xff]  }
 0x218   : > { %719 = vrot.lane.b32.xlu1 %v1183_v37, %s1000_s19  ;;  %655 = vrot.lane.b32.xlu0 %v587_v22, %s1001_s20  ;;  %vm608_vm6 = vcmp.ne.s16.totalorder %v606_v31, 0  ;;  %v610_v42 = vsel %vm607_vm7, %v1179_v19, 0  ;;  %v812_v28 = vld [vmem:[%s266_s13] sm:$0xff] }
 0x219   : > { %v611_v40 = vsel %vm608_vm6, %v1183_v37, 0  ;;  %vm737_vm6 = vcmask 769024  }
 0x21a   : > { %v614_v32 = vpop.permute.xlu1 %613 }
 0x21b   : > { %v618_v36 = vsel %vm617_vm4, %v614_v32, %v616_v35  ;;  %vm619_vm11 = vcmp.ne.s16.totalorder %v614_v32, 0  ;;  %vm712_vm4 = vcmask 785408  }
 0x21c   : > { %657 = vrot.lane.b32.xlu1 %v588_v25, %s1001_s20  ;;  %653 = vrot.lane.b32.xlu0 %v586_v26, %s1001_s20  ;;  %vm620_vm8 = vcmp.ne.s16.totalorder %v618_v36, 0  ;;  %v622_v45 = vsel %vm619_vm11, %v1179_v19, 0 }
 0x21d   : > { %v623_v43 = vsel %vm620_vm8, %v1183_v37, 0 }
 0x21e   : > { %v626_v41 = vpop.permute.xlu1 %625 }
 0x21f   : > { %v630_v54 = vsel %vm629_vm9, %v626_v41, %v628_v44  ;;  %vm631_vm15 = vcmp.ne.s16.totalorder %v626_v41, 0 }
 0x220   : > { %671 = vrot.lane.b32.xlu0 %v600_v29, %s1002_s22  ;;  %669 = vrot.lane.b32.xlu1 %v599_v30, %s1002_s22  ;;  %vm632_vm12 = vcmp.ne.s16.totalorder %v630_v54, 0  ;;  %v634_v47 = vsel %vm631_vm15, %v1179_v19, 0  ;;  %v813_v29 = vld [vmem:[%s266_s13 + $0x8] sm:$0xff]  ;;  %v814_v30 = vunpack.c.l.bf16 %v812_v28 }
 0x221   : > { %v635_v59 = vsel %vm632_vm12, %v1183_v37, 0 }
 0x224   : > { %721 = vrot.lane.b32.xlu0 %v1185_v20, %s1000_s19  ;;  %667 = vrot.lane.b32.xlu1 %v598_v33, %s1002_s22  ;;  %v815_v33 = vunpack.c.h.bf16 %v812_v28 }
 0x228   : > { %696 = vrot.lane.b32.xlu0 %v612_v39, %s1003_s24  ;;  %694 = vrot.lane.b32.xlu1 %v611_v40, %s1003_s24  ;;  %v816_v39 = vunpack.c.l.bf16 %v813_v29 }
 0x22c   : > { %692 = vrot.lane.b32.xlu1 %v610_v42, %s1003_s24  ;;  %708 = vrot.lane.b32.xlu0 %v623_v43, %s1004_s25  ;;  %v817_v43 = vunpack.c.h.bf16 %v813_v29 }
 0x230   : > { %710 = vrot.lane.b32.xlu1 %v624_v58, %s1004_s25  ;;  %706 = vrot.lane.b32.xlu0 %v622_v45, %s1004_s25 }
 0x234   : > { %717 = vrot.lane.b32.xlu1 %v1179_v19, %s1000_s19  ;;  %733 = vrot.lane.b32.xlu0 %v635_v59, %s1005_s28 }
 0x238   : > { %735 = vrot.lane.b32.xlu1 %v636_v46, %s1005_s28  ;;  %731 = vrot.lane.b32.xlu0 %v634_v47, %s1005_s28 }
 0x23c   : > { %748 = vperm.xlu1 %955, %v744_v48   ;;  %753 = vperm.xlu0 %954, %v745_v49  }
 0x27e   : > { %v644_v50 = vpop.permute.xlu0 %643  ;;  %v642_v51 = vpop.permute.xlu1 %641 }
 0x27f   : > { %v647_v52 = vsel %vm645_vm13, %v642_v51, %v644_v50 }
 0x280   : > { %771 = vmatprep.subr.bf16.mxu0 %v647_v52 }
 0x282   : > { %v681_v53 = vpop.permute.xlu0 %680  ;;  %v640_v1 = vpop.permute.xlu1 %639 }
 0x283   : > { %v646_v56 = vsel %vm645_vm13, %v640_v1, %v642_v51 }
 0x284   : > { %772 = vmatpush1.bf16.msra.mxu0 %v646_v56 }
 0x286   : > { %v679_v2 = vpop.permute.xlu0 %678  ;;  %v683_v10 = vpop.permute.xlu1 %682 }
 0x287   : > { %v686_v12 = vsel %vm684_vm2, %v681_v53, %v683_v10  ;;  %v685_v15 = vsel %vm684_vm2, %v679_v2, %v681_v53 }
 0x28a   : > { %v656_v11 = vpop.permute.xlu0 %655  ;;  %v720_v57 = vpop.permute.xlu1 %719 }
 0x28e   : > { %v654_v60 = vpop.permute.xlu0 %653  ;;  %v658_v61 = vpop.permute.xlu1 %657 }
 0x28f   : > { %v661_v62 = vsel %vm659_vm0, %v656_v11, %v658_v61  ;;  %v660_v63 = vsel %vm659_vm0, %v654_v60, %v656_v11 }
 0x290   : > { %773 = vmatprep.subr.bf16.mxu0 %v661_v62 }
 0x291   : > { %774 = vmatpush1.bf16.msra.mxu0 %v660_v63 }
 0x292   : > { %v672_v0 = vpop.permute.xlu0 %671  ;;  %v670_v3 = vpop.permute.xlu1 %669 }
 0x293   : > { %v675_v6 = vsel %vm673_vm1, %v670_v3, %v672_v0 }
 0x294   : > { %775 = vmatprep.subr.bf16.mxu0 %v675_v6 }
 0x296   : > { %v722_v7 = vpop.permute.xlu0 %721  ;;  %v668_v8 = vpop.permute.xlu1 %667 }
 0x297   : > { %v674_v9 = vsel %vm673_vm1, %v668_v8, %v670_v3  ;;  %v725_v21 = vsel %vm723_vm5, %v720_v57, %v722_v7 }
 0x298   : > { %776 = vmatpush1.bf16.msra.mxu0 %v674_v9 }
 0x299   : > { %777 = vmatprep.subr.bf16.mxu0 %v686_v12 }
 0x29a   : > { %v697_v13 = vpop.permute.xlu0 %696  ;;  %v695_v14 = vpop.permute.xlu1 %694 }
 0x29b   : > { %v700_v16 = vsel %vm698_vm3, %v695_v14, %v697_v13 }
 0x29c   : > { %778 = vmatpush1.bf16.msra.mxu0 %v685_v15 }
 0x29d   : > { %779 = vmatprep.subr.bf16.mxu0 %v700_v16 }
 0x29e   : > { %v709_v17 = vpop.permute.xlu0 %708  ;;  %v693_v4 = vpop.permute.xlu1 %692 }
 0x29f   : > { %v699_v19 = vsel %vm698_vm3, %v693_v4, %v695_v14 }
 0x2a0   : > { %780 = vmatpush1.bf16.msra.mxu0 %v699_v19 }
 0x2a2   : > { %v707_v5 = vpop.permute.xlu0 %706  ;;  %v711_v37 = vpop.permute.xlu1 %710 }
 0x2a3   : > { %v714_v20 = vsel %vm712_vm4, %v709_v17, %v711_v37  ;;  %v713_v38 = vsel %vm712_vm4, %v707_v5, %v709_v17 }
 0x2a4   : > { %781 = vmatprep.subr.bf16.mxu0 %v714_v20 }
 0x2a5   : > { %782 = vmatpush1.bf16.msra.mxu0 %v713_v38 }
 0x2a6   : > { %v734_v34 = vpop.permute.xlu0 %733  ;;  %783 = vmatprep.subr.bf16.mxu0 %v725_v21  ;;  %v718_v18 = vpop.permute.xlu1 %717 }
 0x2a7   : > { %v724_v22 = vsel %vm723_vm5, %v718_v18, %v720_v57 }
 0x2a9   : > { %784 = vmatpush1.bf16.msra.mxu0 %v724_v22 }
 0x2aa   : > { %v732_v23 = vpop.permute.xlu0 %731  ;;  %v736_v24 = vpop.permute.xlu1 %735 }
 0x2ab   : > { %v739_v25 = vsel %vm737_vm6, %v734_v34, %v736_v24  ;;  %v738_v26 = vsel %vm737_vm6, %v732_v23, %v734_v34 }
 0x2ac   : > { %785 = vmatprep.subr.bf16.mxu0 %v739_v25 }
 0x2ad   : > { %786 = vmatpush1.bf16.msra.mxu0 %v738_v26 }
 0x2b0   : > { %802 = vmatmul.mubr.bf16.vlgmr.msra.gmra.mrb[0].mxu0 %v956_v27 }
 0x2bb   : > { %v749_v31 = vpop.permute.xlu1 %748  ;;  %v754_v40 = vpop.permute.xlu0 %753 }
 0x383   : > { %v803_v32 = vpop.f32.mrb[0].mxu0 }
 0x384   : > { %v804_v35 = vadd.f32 %v803_v32, %v749_v31  ;;  %v805_v36 = vpop.f32.mrb[1].mxu0 }
 0x385   : > { %v806_v41 = vadd.f32 %v805_v36, %v749_v31  ;;  %v807_v42 = vpop.f32.mrb[2].mxu0 }
 0x386   : > { %v818_v44 = vadd.f32 %v814_v30, %v804_v35  ;;  %v808_v54 = vadd.f32 %v807_v42, %v754_v40  ;;  %v809_v55 = vpop.f32.mrb[3].mxu0 }
 0x387   : > { %v819_v58 = vadd.f32 %v815_v33, %v806_v41  ;;  %v810_v45 = vadd.f32 %v809_v55, %v754_v40 }
 0x388   : > { %v820_v59 = vadd.f32 %v816_v39, %v808_v54 }
 0x389   : > { %v929_v46 = vpack.c.bf16 %v819_v58, %v818_v44  ;;  %v821_v47 = vadd.f32 %v817_v43, %v810_v45 }
 0x38b   : > { %834 = vst [vmem:[%s271_s16] sm:$0xff] %v929_v46  ;;  %v930_v48 = vpack.c.bf16 %v821_v47, %v820_v59 }
 0x38d   : > { %835 = vst [vmem:[%s271_s16 + $0x8] sm:$0xff] %v930_v48 }
 0x38e PF: > { %s16_s21 = sadd.s32 1, %s989_s21  }
 0x38f   : > { %p13_p4 = scmp.ge.s32.totalorder %s16_s21, 4  }
 0x391   :  { %15 = sbr.rel (!%p13_p4) target bundleno = 1 (0x1), region = 77 }

</bundles_post_ra>
